<compile_context>
chip_gen: v5e
topology: v5e:2x2
jax: 0.10.0
libtpu: 0.0.40
codegen_flags: <defaults>
</compile_context>

<pallas_src>
import functools

import jax
import jax.numpy as jnp
from jax.experimental import pallas as pl
from jax.experimental.pallas import tpu as pltpu

BN_EPS = 1e-5
LANE = 128


def autopad(k, p=None, d=1):
    """Pad to 'same' shape outputs (mirror of the PyTorch helper)."""
    if d > 1:
        k = d * (k - 1) + 1 if isinstance(k, int) else [d * (x - 1) + 1 for x in k]
    if p is None:
        p = k // 2 if isinstance(k, int) else [x // 2 for x in k]
    return p


def _round_up(x, m):
    return (x + m - 1) // m * m


def _largest_divisor_leq(n, cap):
    best = 1
    for d in range(1, n + 1):
        if n % d == 0 and d <= cap:
            best = d
    return best


def _vmem_budget():
    """(per-tile working-set budget, vmem_limit_bytes), generation-aware."""
    cap = 64 * 1024 * 1024
    try:
        cap = int(pltpu.get_tpu_info().vmem_capacity_bytes)
    except Exception:
        pass
    if cap >= 100 * 1024 * 1024:            # v5e / v6e: 128 MiB physical VMEM
        return 64 * 1024 * 1024, 100 * 1024 * 1024
    return 26 * 1024 * 1024, 40 * 1024 * 1024   # v7x: 64 MiB physical per TC


def _auto_tile_h(h, w_out, wp, kh_sz, kw_sz, cin_p, cout_p, budget):
    """Largest row tile whose modeled per-tile working set fits the VMEM budget.

    Models: double-buffered body/halo/output blocks, the (double-buffered)
    resident weight, the slab scratch, the f32 accumulator and a per-tap
    reshape temp.  Bigger tiles -> longer matmul M (amortizes MXU fill/drain
    and the ~0.35us/grid-step overhead).
    """
    kk = kh_sz * kw_sz
    fixed = 2 * kk * cin_p * cout_p * 2                    # weight, bf16, x2 buffers
    fixed += 2 * max(kh_sz - 1, 1) * wp * cin_p * 2        # halo block, x2 buffers
    avail = budget - fixed
    per_row = (2 * wp * cin_p * 2          # body input block, bf16, x2 buffers
               + wp * cin_p * 2            # slab scratch
               + 2 * w_out * cout_p * 2    # bf16 conv/out block, x2 buffers
               + w_out * cout_p * 4        # f32 accumulator
               + 2 * w_out * cin_p * 2)    # per-tap reshaped window temp (margin)
    cap = max(1, avail // per_row)
    return _largest_divisor_leq(h, int(cap))


def _make_conv_kernel(kh_sz, kw_sz, th, w_out, cin_p, cout_p, fused):
    """Pass-1 kernel: conv tile via kk unrolled accumulate matmuls (no im2col buffer).

    Refs (in order): body, [halo], weight, then
      fused=False: conv_out (bf16), stats (f32), slab scratch
      fused=True : scale, bias, out (bf16), slab scratch
    """
    has_halo = kh_sz > 1

    def kernel(*refs):
        slab_ref = refs[-1]
        idx = 0
        xb_ref = refs[idx]; idx += 1
        xh_ref = None
        if has_halo:
            xh_ref = refs[idx]; idx += 1
        w_ref = refs[idx]; idx += 1
        if fused:
            scale_ref, bias_ref, out_ref = refs[idx], refs[idx + 1], refs[idx + 2]
        else:
            conv_ref, stats_ref = refs[idx], refs[idx + 1]

        # Assemble the halo'd row slab (body rows + exactly k-1 halo rows).
        # TODO(synk): the body copy could be avoided by splitting each tap's
        # matmul across body/halo refs; kept for simplicity (few-% cost).
        slab_ref[:th] = xb_ref[0]
        if has_halo:
            slab_ref[th:] = xh_ref[0]

        # kk unrolled accumulate matmuls: bf16 x bf16 inputs, f32 accumulate.
        acc = jnp.zeros((th * w_out, cout_p), jnp.float32)
        for kh in range(kh_sz):
            for kw in range(kw_sz):
                t = kh * kw_sz + kw
                window = slab_ref[kh:kh + th, kw:kw + w_out, :].reshape(
                    th * w_out, cin_p)
                acc = acc + jnp.dot(window,
                                    w_ref[t * cin_p:(t + 1) * cin_p, :],
                                    preferred_element_type=jnp.float32)

        if fused:
            # Inference mode: BN (folded scale/bias) + SiLU fused into the epilogue.
            z = acc * scale_ref[...] + bias_ref[...]
            out_ref[...] = (z * jax.nn.sigmoid(z)).reshape(
                th, w_out, cout_p).astype(out_ref.dtype)
        else:
            # Training mode: bf16 conv intermediate + per-tile partial BN stats
            # taken from the f32 accumulator (before the bf16 cast).
            conv_ref[...] = acc.reshape(th, w_out, cout_p).astype(conv_ref.dtype)
            stats_ref[0, 0:1, :] = jnp.sum(acc, axis=0, keepdims=True)
            stats_ref[0, 1:2, :] = jnp.sum(acc * acc, axis=0, keepdims=True)

    return kernel


def _bn_silu_kernel(y_ref, scale_ref, bias_ref, o_ref):
    """Pass 2 (training mode): fused (x*scale + bias) -> SiLU, lane-dense tiles."""
    z = y_ref[...].astype(jnp.float32) * scale_ref[...] + bias_ref[...]
    o_ref[...] = (z * jax.nn.sigmoid(z)).astype(o_ref.dtype)


@functools.partial(jax.jit, static_argnames=("k", "eps", "tile_h"))
def conv_bn_silu(x_nchw, w_hwio, gamma, beta, running_mean=None, running_var=None,
                 *, k, eps=BN_EPS, tile_h=None):
    """Conv2d(k, s=1, 'same', bias=False) -> BatchNorm2d -> SiLU.

    running_mean/running_var None  -> training-mode BN (batch statistics, two passes).
    running_mean/running_var given -> inference-mode BN fused into the conv kernel.
    NCHW in / NCHW out for PyTorch parity; internally NHWC, channels padded to 128.
    """
    if k % 2 != 1:
        raise NotImplementedError("only odd square kernels (autopad 'same') supported")

    n, cin, h, w = x_nchw.shape
    kh_sz, kw_sz, _, cout = w_hwio.shape
    if kh_sz != k or kw_sz != k:
        raise NotImplementedError("weight kernel size must match k (square kernels)")
    p = autopad(k)
    kk = kh_sz * kw_sz
    cin_p = _round_up(cin, LANE)
    cout_p = _round_up(cout, LANE)
    wp = w + 2 * p

    tile_budget, vmem_limit = _vmem_budget()
    th = tile_h if tile_h is not None else _auto_tile_h(
        h, w, wp, kh_sz, kw_sz, cin_p, cout_p, tile_budget)
    if h % th != 0:
        raise ValueError(f"tile_h={th} must divide H={h}")
    num_h = h // th
    has_halo = kh_sz > 1
    fused = running_mean is not None and running_var is not None

    # NCHW -> NHWC; 'same' spatial zero-pad; channel pad to the 128-lane axis; bf16.
    x = jnp.transpose(x_nchw, (0, 2, 3, 1))
    x = jnp.pad(x, ((0, 0), (p, p), (p, p), (0, cin_p - cin))).astype(jnp.bfloat16)

    # Conv weight HWIO -> zero-padded im2col-row layout (KH*KW*Cin_p, Cout_p), bf16.
    w2d = jnp.pad(w_hwio, ((0, 0), (0, 0), (0, cin_p - cin), (0, cout_p - cout)))
    w2d = w2d.reshape(kk * cin_p, cout_p).astype(jnp.bfloat16)

    # Compact halo tensor: exactly the k-1 rows below each row tile.
    inputs = [x]
    in_specs = [pl.BlockSpec((1, th, wp, cin_p), lambda ni, hi: (ni, hi, 0, 0))]
    if has_halo:
        xh = jnp.stack(
            [x[:, (hi + 1) * th:(hi + 1) * th + kh_sz - 1] for hi in range(num_h)],
            axis=1).reshape(n * num_h, kh_sz - 1, wp, cin_p)
        inputs.append(xh)
        in_specs.append(pl.BlockSpec((1, kh_sz - 1, wp, cin_p),
                                     lambda ni, hi: (ni * num_h + hi, 0, 0, 0)))
    inputs.append(w2d)
    in_specs.append(pl.BlockSpec((kk * cin_p, cout_p), lambda ni, hi: (0, 0)))

    cparams = pltpu.CompilerParams(
        dimension_semantics=("parallel", "parallel"),
        vmem_limit_bytes=vmem_limit)
    out_spec_conv = pl.BlockSpec((th, w, cout_p),
                                 lambda ni, hi: (ni * num_h + hi, 0, 0))
    slab_scratch = pltpu.VMEM((th + kh_sz - 1, wp, cin_p), jnp.bfloat16)

    gamma_p = jnp.pad(gamma.astype(jnp.float32), (0, cout_p - cout))
    beta_p = jnp.pad(beta.astype(jnp.float32), (0, cout_p - cout))

    if fused:
        # ---- Single fused pass: conv -> folded BN (running stats) -> SiLU. ----
        inv_std = jax.lax.rsqrt(running_var.astype(jnp.float32) + eps)
        scale = jnp.pad(gamma.astype(jnp.float32) * inv_std,
                        (0, cout_p - cout)).reshape(1, cout_p)
        bias = jnp.pad(beta.astype(jnp.float32)
                       - running_mean.astype(jnp.float32)
                       * gamma.astype(jnp.float32) * inv_std,
                       (0, cout_p - cout)).reshape(1, cout_p)
        inputs += [scale, bias]
        in_specs += [pl.BlockSpec((1, cout_p), lambda ni, hi: (0, 0)),
                     pl.BlockSpec((1, cout_p), lambda ni, hi: (0, 0))]
        y = pl.pallas_call(
            _make_conv_kernel(kh_sz, kw_sz, th, w, cin_p, cout_p, fused=True),
            grid=(n, num_h),
            in_specs=in_specs,
            out_specs=out_spec_conv,
            out_shape=jax.ShapeDtypeStruct((n * h, w, cout_p), jnp.bfloat16),
            scratch_shapes=[slab_scratch],
            compiler_params=cparams,
        )(*inputs)
    else:
        # ---- Pass 1: conv tiles (bf16) + per-tile partial BN statistics (f32). ----
        conv_flat, part_stats = pl.pallas_call(
            _make_conv_kernel(kh_sz, kw_sz, th, w, cin_p, cout_p, fused=False),
            grid=(n, num_h),
            in_specs=in_specs,
            out_specs=[
                out_spec_conv,
                pl.BlockSpec((1, 2, cout_p), lambda ni, hi: (ni * num_h + hi, 0, 0)),
            ],
            out_shape=[
                jax.ShapeDtypeStruct((n * h, w, cout_p), jnp.bfloat16),
                jax.ShapeDtypeStruct((n * num_h, 2, cout_p), jnp.float32),
            ],
            scratch_shapes=[slab_scratch],
            compiler_params=cparams,
        )(*inputs)

        # ---- Tiny finalize of the batch statistics (Cout-sized, plain JAX). ----
        # NOTE: E[x^2]-E[x]^2 in f32 is adequate for conv activations; var is
        # clamped at 0 to guard against cancellation-induced tiny negatives.
        m = n * h * w
        sums = jnp.sum(part_stats, axis=0)                  # (2, Cout_p)
        mean = sums[0] / m
        var = jnp.maximum(sums[1] / m - mean * mean, 0.0)   # biased, training-mode BN
        inv_std = jax.lax.rsqrt(var + eps)
        scale = (gamma_p * inv_std).reshape(1, 1, cout_p)
        bias = (beta_p - mean * gamma_p * inv_std).reshape(1, 1, cout_p)

        # ---- Pass 2: HBM-bound normalize + SiLU with its own large row tiling. ----
        rows = n * h
        row_bytes = w * cout_p * 2 * 4    # bf16 in + bf16 out, double-buffered
        tr2 = _largest_divisor_leq(rows, max(1, min(8 * 1024 * 1024,
                                                    tile_budget // 3) // row_bytes))
        y = pl.pallas_call(
            _bn_silu_kernel,
            grid=(rows // tr2,),
            in_specs=[
                pl.BlockSpec((tr2, w, cout_p), lambda i: (i, 0, 0)),
                pl.BlockSpec((1, 1, cout_p), lambda i: (0, 0, 0)),
                pl.BlockSpec((1, 1, cout_p), lambda i: (0, 0, 0)),
            ],
            out_specs=pl.BlockSpec((tr2, w, cout_p), lambda i: (i, 0, 0)),
            out_shape=jax.ShapeDtypeStruct((rows, w, cout_p), jnp.bfloat16),
            compiler_params=pltpu.CompilerParams(
                dimension_semantics=("parallel",),
                vmem_limit_bytes=vmem_limit),
        )(conv_flat, scale, bias)

    # Drop the channel padding, back to NCHW for PyTorch output parity.
    y = y.reshape(n, h, w, cout_p)[..., :cout]
    return jnp.transpose(y, (0, 3, 1, 2)).astype(x_nchw.dtype)


# ----------------------------- references (pure JAX) -----------------------------

def _conv_ref(x_nchw, w_hwio, k, matmul_dtype=None):
    p = autopad(k)
    x = jnp.transpose(x_nchw, (0, 2, 3, 1)).astype(jnp.float32)
    wgt = w_hwio.astype(jnp.float32)
    if matmul_dtype is not None:   # mimic the kernel's mixed-precision matmul inputs
        x = x.astype(matmul_dtype).astype(jnp.float32)
        wgt = wgt.astype(matmul_dtype).astype(jnp.float32)
    return jax.lax.conv_general_dilated(
        x, wgt, window_strides=(1, 1), padding=[(p, p), (p, p)],
        dimension_numbers=("NHWC", "HWIO", "NHWC"),
        precision=jax.lax.Precision.HIGHEST)


def _reference_train(x, w, gamma, beta, k, eps, matched):
    conv = _conv_ref(x, w, k, jnp.bfloat16 if matched else None)
    mean = jnp.mean(conv, axis=(0, 1, 2))
    var = jnp.var(conv, axis=(0, 1, 2))
    conv_q = conv.astype(jnp.bfloat16).astype(jnp.float32) if matched else conv
    y = (conv_q - mean) * jax.lax.rsqrt(var + eps) * gamma + beta
    y = y * jax.nn.sigmoid(y)
    if matched:
        y = y.astype(jnp.bfloat16).astype(jnp.float32)
    return jnp.transpose(y, (0, 3, 1, 2))


def _reference_fused(x, w, gamma, beta, rmean, rvar, k, eps, matched):
    conv = _conv_ref(x, w, k, jnp.bfloat16 if matched else None)
    y = (conv - rmean) * jax.lax.rsqrt(rvar + eps) * gamma + beta
    y = y * jax.nn.sigmoid(y)
    if matched:
        y = y.astype(jnp.bfloat16).astype(jnp.float32)
    return jnp.transpose(y, (0, 3, 1, 2))


if __name__ == "__main__":
    # Small config consistent with the module: Conv(c1=4, c2=8, k=3, s=1).
    N, C1, H, W = 2, 4, 16, 16
    C2, K = 8, 3

    key = jax.random.PRNGKey(0)
    kx, kwt, kg, kb, km, kv = jax.random.split(key, 6)

    x = jax.random.normal(kx, (N, C1, H, W), dtype=jnp.float32)
    wgt = jax.random.normal(kwt, (K, K, C1, C2), dtype=jnp.float32) * 0.1
    gamma = 1.0 + 0.1 * jax.random.normal(kg, (C2,), dtype=jnp.float32)
    beta = 0.05 * jax.random.normal(kb, (C2,), dtype=jnp.float32)

    # ---- training-mode BN (batch statistics, two-pass path). tile_h=8 -> grid (2,2). ----
    out = conv_bn_silu(x, wgt, gamma, beta, k=K, tile_h=8)
    out = jax.block_until_ready(out)
    assert out.shape == (N, C2, H, W)

    ref_m = _reference_train(x, wgt, gamma, beta, K, BN_EPS, matched=True)
    err_m = jnp.max(jnp.abs(out - ref_m))
    assert jnp.allclose(out, ref_m, atol=2e-2, rtol=2e-2), (
        f"train-mode mismatch vs precision-matched reference, max abs err {err_m}")

    ref_f = _reference_train(x, wgt, gamma, beta, K, BN_EPS, matched=False)
    err_f = jnp.max(jnp.abs(out - ref_f))
    assert jnp.allclose(out, ref_f, atol=1e-1, rtol=1e-1), (
        f"train-mode mismatch vs f32 reference, max abs err {err_f}")

    # ---- inference-mode BN (running stats fused into the conv kernel). ----
    rmean = 0.1 * jax.random.normal(km, (C2,), dtype=jnp.float32)
    rvar = 0.5 + 0.2 * jax.random.uniform(kv, (C2,), dtype=jnp.float32)
    out_inf = conv_bn_silu(x, wgt, gamma, beta, rmean, rvar, k=K, tile_h=8)
    out_inf = jax.block_until_ready(out_inf)
    ref_im = _reference_fused(x, wgt, gamma, beta, rmean, rvar, K, BN_EPS, matched=True)
    err_i = jnp.max(jnp.abs(out_inf - ref_im))
    assert jnp.allclose(out_inf, ref_im, atol=2e-2, rtol=2e-2), (
        f"inference-mode mismatch vs precision-matched reference, max abs err {err_i}")

    print("KERNEL_OK")
</pallas_src>

<mosaic_0001>
module attributes {stable_mosaic.version = 11 : i64} {
  func.func @kernel(%arg0: i32, %arg1: i32, %arg2: memref<1x8x18x128xbf16, #tpu.memory_space<vmem>>, %arg3: memref<1x2x18x128xbf16, #tpu.memory_space<vmem>>, %arg4: memref<1152x128xbf16, #tpu.memory_space<vmem>>, %arg5: memref<8x16x128xbf16, #tpu.memory_space<vmem>>, %arg6: memref<1x2x128xf32, #tpu.memory_space<vmem>>, %arg7: memref<10x18x128xbf16, #tpu.memory_space<vmem>>) attributes {dimension_semantics = [#tpu.dimension_semantics<parallel>, #tpu.dimension_semantics<parallel>], iteration_bounds = array<i64: 2, 2>, scalar_prefetch = 0 : i64, scratch_operands = 1 : i64, tpu.core_type = #tpu.core_type<tc>, window_params = [{transform_indices = @transform_0, window_bounds = array<i64: 1, 8, 18, 128>}, {transform_indices = @transform_1, window_bounds = array<i64: 1, 2, 18, 128>}, {pipeline_mode = #tpu.pipeline_mode<synchronous>, transform_indices = @transform_2, window_bounds = array<i64: 1152, 128>}, {transform_indices = @transform_3, window_bounds = array<i64: 8, 16, 128>}, {transform_indices = @transform_4, window_bounds = array<i64: 1, 2, 128>}]} {
    %c0 = arith.constant 0 : index
    %c0_0 = arith.constant 0 : index
    %c0_1 = arith.constant 0 : index
    %c0_2 = arith.constant 0 : index
    %0 = vector.load %arg2[%c0, %c0_0, %c0_1, %c0_2] : memref<1x8x18x128xbf16, #tpu.memory_space<vmem>>, vector<1x8x18x128xbf16>
    %1 = vector.shape_cast %0 : vector<1x8x18x128xbf16> to vector<8x18x128xbf16>
    %c0_3 = arith.constant 0 : index
    %c0_4 = arith.constant 0 : index
    %c0_5 = arith.constant 0 : index
    %2 = vector.load %arg7[%c0_3, %c0_4, %c0_5] : memref<10x18x128xbf16, #tpu.memory_space<vmem>>, vector<8x18x128xbf16>
    tpu.vector_store %arg7[%c0_3, %c0_4, %c0_5], %1 {strides = array<i32>} : memref<10x18x128xbf16, #tpu.memory_space<vmem>>, vector<8x18x128xbf16>,
    %c0_6 = arith.constant 0 : index
    %c0_7 = arith.constant 0 : index
    %c0_8 = arith.constant 0 : index
    %c0_9 = arith.constant 0 : index
    %3 = vector.load %arg3[%c0_6, %c0_7, %c0_8, %c0_9] : memref<1x2x18x128xbf16, #tpu.memory_space<vmem>>, vector<1x2x18x128xbf16>
    %4 = vector.shape_cast %3 : vector<1x2x18x128xbf16> to vector<2x18x128xbf16>
    %c8 = arith.constant 8 : index
    %c0_10 = arith.constant 0 : index
    %c0_11 = arith.constant 0 : index
    %5 = vector.load %arg7[%c8, %c0_10, %c0_11] : memref<10x18x128xbf16, #tpu.memory_space<vmem>>, vector<2x18x128xbf16>
    tpu.vector_store %arg7[%c8, %c0_10, %c0_11], %4 {strides = array<i32>} : memref<10x18x128xbf16, #tpu.memory_space<vmem>>, vector<2x18x128xbf16>,
    %cst = arith.constant 0.000000e+00 : f32
    %6 = vector.broadcast %cst : f32 to vector<128x128xf32>
    %c0_12 = arith.constant 0 : index
    %c0_13 = arith.constant 0 : index
    %c0_14 = arith.constant 0 : index
    %7 = vector.load %arg7[%c0_12, %c0_13, %c0_14] : memref<10x18x128xbf16, #tpu.memory_space<vmem>>, vector<8x16x128xbf16>
    %8 = vector.shape_cast %7 : vector<8x16x128xbf16> to vector<128x128xbf16>
    %c0_15 = arith.constant 0 : index
    %c0_16 = arith.constant 0 : index
    %9 = vector.load %arg4[%c0_15, %c0_16] : memref<1152x128xbf16, #tpu.memory_space<vmem>>, vector<128x128xbf16>
    %cst_17 = arith.constant dense<0.000000e+00> : vector<128x128xf32>
    %10 = tpu.matmul %8, %9, %cst_17 {dimension_numbers = #tpu.dot_dimension_numbers<[1], [0], [0], [1], [0, 0, 1, 1], [], []>} : vector<128x128xbf16>, vector<128x128xbf16>, vector<128x128xf32> -> vector<128x128xf32>
    %11 = arith.addf %6, %10 : vector<128x128xf32>
    %c0_18 = arith.constant 0 : index
    %c1 = arith.constant 1 : index
    %c0_19 = arith.constant 0 : index
    %12 = vector.load %arg7[%c0_18, %c1, %c0_19] : memref<10x18x128xbf16, #tpu.memory_space<vmem>>, vector<8x16x128xbf16>
    %13 = vector.shape_cast %12 : vector<8x16x128xbf16> to vector<128x128xbf16>
    %c128 = arith.constant 128 : index
    %c0_20 = arith.constant 0 : index
    %14 = vector.load %arg4[%c128, %c0_20] : memref<1152x128xbf16, #tpu.memory_space<vmem>>, vector<128x128xbf16>
    %cst_21 = arith.constant dense<0.000000e+00> : vector<128x128xf32>
    %15 = tpu.matmul %13, %14, %cst_21 {dimension_numbers = #tpu.dot_dimension_numbers<[1], [0], [0], [1], [0, 0, 1, 1], [], []>} : vector<128x128xbf16>, vector<128x128xbf16>, vector<128x128xf32> -> vector<128x128xf32>
    %16 = arith.addf %11, %15 : vector<128x128xf32>
    %c0_22 = arith.constant 0 : index
    %c2 = arith.constant 2 : index
    %c0_23 = arith.constant 0 : index
    %17 = vector.load %arg7[%c0_22, %c2, %c0_23] : memref<10x18x128xbf16, #tpu.memory_space<vmem>>, vector<8x16x128xbf16>
    %18 = vector.shape_cast %17 : vector<8x16x128xbf16> to vector<128x128xbf16>
    %c256 = arith.constant 256 : index
    %c0_24 = arith.constant 0 : index
    %19 = vector.load %arg4[%c256, %c0_24] : memref<1152x128xbf16, #tpu.memory_space<vmem>>, vector<128x128xbf16>
    %cst_25 = arith.constant dense<0.000000e+00> : vector<128x128xf32>
    %20 = tpu.matmul %18, %19, %cst_25 {dimension_numbers = #tpu.dot_dimension_numbers<[1], [0], [0], [1], [0, 0, 1, 1], [], []>} : vector<128x128xbf16>, vector<128x128xbf16>, vector<128x128xf32> -> vector<128x128xf32>
    %21 = arith.addf %16, %20 : vector<128x128xf32>
    %c1_26 = arith.constant 1 : index
    %c0_27 = arith.constant 0 : index
    %c0_28 = arith.constant 0 : index
    %22 = vector.load %arg7[%c1_26, %c0_27, %c0_28] : memref<10x18x128xbf16, #tpu.memory_space<vmem>>, vector<8x16x128xbf16>
    %23 = vector.shape_cast %22 : vector<8x16x128xbf16> to vector<128x128xbf16>
    %c384 = arith.constant 384 : index
    %c0_29 = arith.constant 0 : index
    %24 = vector.load %arg4[%c384, %c0_29] : memref<1152x128xbf16, #tpu.memory_space<vmem>>, vector<128x128xbf16>
    %cst_30 = arith.constant dense<0.000000e+00> : vector<128x128xf32>
    %25 = tpu.matmul %23, %24, %cst_30 {dimension_numbers = #tpu.dot_dimension_numbers<[1], [0], [0], [1], [0, 0, 1, 1], [], []>} : vector<128x128xbf16>, vector<128x128xbf16>, vector<128x128xf32> -> vector<128x128xf32>
    %26 = arith.addf %21, %25 : vector<128x128xf32>
    %c1_31 = arith.constant 1 : index
    %c1_32 = arith.constant 1 : index
    %c0_33 = arith.constant 0 : index
    %27 = vector.load %arg7[%c1_31, %c1_32, %c0_33] : memref<10x18x128xbf16, #tpu.memory_space<vmem>>, vector<8x16x128xbf16>
    %28 = vector.shape_cast %27 : vector<8x16x128xbf16> to vector<128x128xbf16>
    %c512 = arith.constant 512 : index
    %c0_34 = arith.constant 0 : index
    %29 = vector.load %arg4[%c512, %c0_34] : memref<1152x128xbf16, #tpu.memory_space<vmem>>, vector<128x128xbf16>
    %cst_35 = arith.constant dense<0.000000e+00> : vector<128x128xf32>
    %30 = tpu.matmul %28, %29, %cst_35 {dimension_numbers = #tpu.dot_dimension_numbers<[1], [0], [0], [1], [0, 0, 1, 1], [], []>} : vector<128x128xbf16>, vector<128x128xbf16>, vector<128x128xf32> -> vector<128x128xf32>
    %31 = arith.addf %26, %30 : vector<128x128xf32>
    %c1_36 = arith.constant 1 : index
    %c2_37 = arith.constant 2 : index
    %c0_38 = arith.constant 0 : index
    %32 = vector.load %arg7[%c1_36, %c2_37, %c0_38] : memref<10x18x128xbf16, #tpu.memory_space<vmem>>, vector<8x16x128xbf16>
    %33 = vector.shape_cast %32 : vector<8x16x128xbf16> to vector<128x128xbf16>
    %c640 = arith.constant 640 : index
    %c0_39 = arith.constant 0 : index
    %34 = vector.load %arg4[%c640, %c0_39] : memref<1152x128xbf16, #tpu.memory_space<vmem>>, vector<128x128xbf16>
    %cst_40 = arith.constant dense<0.000000e+00> : vector<128x128xf32>
    %35 = tpu.matmul %33, %34, %cst_40 {dimension_numbers = #tpu.dot_dimension_numbers<[1], [0], [0], [1], [0, 0, 1, 1], [], []>} : vector<128x128xbf16>, vector<128x128xbf16>, vector<128x128xf32> -> vector<128x128xf32>
    %36 = arith.addf %31, %35 : vector<128x128xf32>
    %c2_41 = arith.constant 2 : index
    %c0_42 = arith.constant 0 : index
    %c0_43 = arith.constant 0 : index
    %37 = vector.load %arg7[%c2_41, %c0_42, %c0_43] : memref<10x18x128xbf16, #tpu.memory_space<vmem>>, vector<8x16x128xbf16>
    %38 = vector.shape_cast %37 : vector<8x16x128xbf16> to vector<128x128xbf16>
    %c768 = arith.constant 768 : index
    %c0_44 = arith.constant 0 : index
    %39 = vector.load %arg4[%c768, %c0_44] : memref<1152x128xbf16, #tpu.memory_space<vmem>>, vector<128x128xbf16>
    %cst_45 = arith.constant dense<0.000000e+00> : vector<128x128xf32>
    %40 = tpu.matmul %38, %39, %cst_45 {dimension_numbers = #tpu.dot_dimension_numbers<[1], [0], [0], [1], [0, 0, 1, 1], [], []>} : vector<128x128xbf16>, vector<128x128xbf16>, vector<128x128xf32> -> vector<128x128xf32>
    %41 = arith.addf %36, %40 : vector<128x128xf32>
    %c2_46 = arith.constant 2 : index
    %c1_47 = arith.constant 1 : index
    %c0_48 = arith.constant 0 : index
    %42 = vector.load %arg7[%c2_46, %c1_47, %c0_48] : memref<10x18x128xbf16, #tpu.memory_space<vmem>>, vector<8x16x128xbf16>
    %43 = vector.shape_cast %42 : vector<8x16x128xbf16> to vector<128x128xbf16>
    %c896 = arith.constant 896 : index
    %c0_49 = arith.constant 0 : index
    %44 = vector.load %arg4[%c896, %c0_49] : memref<1152x128xbf16, #tpu.memory_space<vmem>>, vector<128x128xbf16>
    %cst_50 = arith.constant dense<0.000000e+00> : vector<128x128xf32>
    %45 = tpu.matmul %43, %44, %cst_50 {dimension_numbers = #tpu.dot_dimension_numbers<[1], [0], [0], [1], [0, 0, 1, 1], [], []>} : vector<128x128xbf16>, vector<128x128xbf16>, vector<128x128xf32> -> vector<128x128xf32>
    %46 = arith.addf %41, %45 : vector<128x128xf32>
    %c2_51 = arith.constant 2 : index
    %c2_52 = arith.constant 2 : index
    %c0_53 = arith.constant 0 : index
    %47 = vector.load %arg7[%c2_51, %c2_52, %c0_53] : memref<10x18x128xbf16, #tpu.memory_space<vmem>>, vector<8x16x128xbf16>
    %48 = vector.shape_cast %47 : vector<8x16x128xbf16> to vector<128x128xbf16>
    %c1024 = arith.constant 1024 : index
    %c0_54 = arith.constant 0 : index
    %49 = vector.load %arg4[%c1024, %c0_54] : memref<1152x128xbf16, #tpu.memory_space<vmem>>, vector<128x128xbf16>
    %cst_55 = arith.constant dense<0.000000e+00> : vector<128x128xf32>
    %50 = tpu.matmul %48, %49, %cst_55 {dimension_numbers = #tpu.dot_dimension_numbers<[1], [0], [0], [1], [0, 0, 1, 1], [], []>} : vector<128x128xbf16>, vector<128x128xbf16>, vector<128x128xf32> -> vector<128x128xf32>
    %51 = arith.addf %46, %50 : vector<128x128xf32>
    %52 = vector.shape_cast %51 : vector<128x128xf32> to vector<8x16x128xf32>
    %53 = arith.truncf %52 : vector<8x16x128xf32> to vector<8x16x128xbf16>
    %c0_56 = arith.constant 0 : index
    %c0_57 = arith.constant 0 : index
    %c0_58 = arith.constant 0 : index
    %54 = vector.load %arg5[%c0_56, %c0_57, %c0_58] : memref<8x16x128xbf16, #tpu.memory_space<vmem>>, vector<8x16x128xbf16>
    tpu.vector_store %arg5[%c0_56, %c0_57, %c0_58], %53 {strides = array<i32>} : memref<8x16x128xbf16, #tpu.memory_space<vmem>>, vector<8x16x128xbf16>,
    %cst_59 = arith.constant dense<0.000000e+00> : vector<128xf32>
    %55 = vector.multi_reduction <add>, %51, %cst_59 [0] : vector<128x128xf32> to vector<128xf32>
    %56 = vector.shape_cast %55 : vector<128xf32> to vector<1x128xf32>
    %c0_60 = arith.constant 0 : index
    %c0_61 = arith.constant 0 : index
    %c0_62 = arith.constant 0 : index
    %57 = vector.load %arg6[%c0_60, %c0_61, %c0_62] : memref<1x2x128xf32, #tpu.memory_space<vmem>>, vector<1x1x128xf32>
    %58 = vector.shape_cast %57 : vector<1x1x128xf32> to vector<1x128xf32>
    %59 = vector.shape_cast %56 : vector<1x128xf32> to vector<1x1x128xf32>
    tpu.vector_store %arg6[%c0_60, %c0_61, %c0_62], %59 {strides = array<i32>} : memref<1x2x128xf32, #tpu.memory_space<vmem>>, vector<1x1x128xf32>,
    %60 = arith.mulf %51, %51 : vector<128x128xf32>
    %cst_63 = arith.constant dense<0.000000e+00> : vector<128xf32>
    %61 = vector.multi_reduction <add>, %60, %cst_63 [0] : vector<128x128xf32> to vector<128xf32>
    %62 = vector.shape_cast %61 : vector<128xf32> to vector<1x128xf32>
    %c0_64 = arith.constant 0 : index
    %c1_65 = arith.constant 1 : index
    %c0_66 = arith.constant 0 : index
    %63 = vector.load %arg6[%c0_64, %c1_65, %c0_66] : memref<1x2x128xf32, #tpu.memory_space<vmem>>, vector<1x1x128xf32>
    %64 = vector.shape_cast %63 : vector<1x1x128xf32> to vector<1x128xf32>
    %65 = vector.shape_cast %62 : vector<1x128xf32> to vector<1x1x128xf32>
    tpu.vector_store %arg6[%c0_64, %c1_65, %c0_66], %65 {strides = array<i32>} : memref<1x2x128xf32, #tpu.memory_space<vmem>>, vector<1x1x128xf32>,
    return
  }
  func.func @transform_0(%arg0: i32, %arg1: i32) -> (i32, i32, i32, i32) {
    %c0_i32 = arith.constant 0 : i32
    %c0_i32_0 = arith.constant 0 : i32
    %c0_i32_1 = arith.constant 0 : i32
    return %arg0, %arg1, %c0_i32, %c0_i32_0 : i32, i32, i32, i32
  }
  func.func @transform_1(%arg0: i32, %arg1: i32) -> (i32, i32, i32, i32) {
    %c2_i32 = arith.constant 2 : i32
    %0 = arith.muli %arg0, %c2_i32 : i32
    %1 = arith.addi %0, %arg1 : i32
    %c0_i32 = arith.constant 0 : i32
    %c0_i32_0 = arith.constant 0 : i32
    %c0_i32_1 = arith.constant 0 : i32
    %c0_i32_2 = arith.constant 0 : i32
    return %1, %c0_i32, %c0_i32_0, %c0_i32_1 : i32, i32, i32, i32
  }
  func.func @transform_2(%arg0: i32, %arg1: i32) -> (i32, i32) {
    %c0_i32 = arith.constant 0 : i32
    %c0_i32_0 = arith.constant 0 : i32
    %c0_i32_1 = arith.constant 0 : i32
    return %c0_i32, %c0_i32_0 : i32, i32
  }
  func.func @transform_3(%arg0: i32, %arg1: i32) -> (i32, i32, i32) {
    %c2_i32 = arith.constant 2 : i32
    %0 = arith.muli %arg0, %c2_i32 : i32
    %1 = arith.addi %0, %arg1 : i32
    %c0_i32 = arith.constant 0 : i32
    %c0_i32_0 = arith.constant 0 : i32
    %c0_i32_1 = arith.constant 0 : i32
    return %1, %c0_i32, %c0_i32_0 : i32, i32, i32
  }
  func.func @transform_4(%arg0: i32, %arg1: i32) -> (i32, i32, i32) {
    %c2_i32 = arith.constant 2 : i32
    %0 = arith.muli %arg0, %c2_i32 : i32
    %1 = arith.addi %0, %arg1 : i32
    %c0_i32 = arith.constant 0 : i32
    %c0_i32_0 = arith.constant 0 : i32
    %c0_i32_1 = arith.constant 0 : i32
    return %1, %c0_i32, %c0_i32_0 : i32, i32, i32
  }
}

module attributes {stable_mosaic.version = 11 : i64} {
  func.func @_bn_silu_kernel(%arg0: i32, %arg1: memref<32x16x128xbf16, #tpu.memory_space<vmem>>, %arg2: memref<1x1x128xf32, #tpu.memory_space<vmem>>, %arg3: memref<1x1x128xf32, #tpu.memory_space<vmem>>, %arg4: memref<32x16x128xbf16, #tpu.memory_space<vmem>>) attributes {dimension_semantics = [#tpu.dimension_semantics<parallel>], iteration_bounds = array<i64: 1>, scalar_prefetch = 0 : i64, scratch_operands = 0 : i64, tpu.core_type = #tpu.core_type<tc>, window_params = [{transform_indices = @transform_0, window_bounds = array<i64: 32, 16, 128>}, {pipeline_mode = #tpu.pipeline_mode<synchronous>, transform_indices = @transform_1, window_bounds = array<i64: 1, 1, 128>}, {pipeline_mode = #tpu.pipeline_mode<synchronous>, transform_indices = @transform_2, window_bounds = array<i64: 1, 1, 128>}, {transform_indices = @transform_3, window_bounds = array<i64: 32, 16, 128>}]} {
    %c0 = arith.constant 0 : index
    %c0_0 = arith.constant 0 : index
    %c0_1 = arith.constant 0 : index
    %0 = vector.load %arg1[%c0, %c0_0, %c0_1] : memref<32x16x128xbf16, #tpu.memory_space<vmem>>, vector<32x16x128xbf16>
    %1 = arith.extf %0 : vector<32x16x128xbf16> to vector<32x16x128xf32>
    %c0_2 = arith.constant 0 : index
    %c0_3 = arith.constant 0 : index
    %c0_4 = arith.constant 0 : index
    %2 = vector.load %arg2[%c0_2, %c0_3, %c0_4] : memref<1x1x128xf32, #tpu.memory_space<vmem>>, vector<1x1x128xf32>
    %3 = vector.broadcast %2 : vector<1x1x128xf32> to vector<32x16x128xf32>
    %4 = arith.mulf %1, %3 : vector<32x16x128xf32>
    %c0_5 = arith.constant 0 : index
    %c0_6 = arith.constant 0 : index
    %c0_7 = arith.constant 0 : index
    %5 = vector.load %arg3[%c0_5, %c0_6, %c0_7] : memref<1x1x128xf32, #tpu.memory_space<vmem>>, vector<1x1x128xf32>
    %6 = vector.broadcast %5 : vector<1x1x128xf32> to vector<32x16x128xf32>
    %7 = arith.addf %4, %6 : vector<32x16x128xf32>
    %8 = arith.negf %7 : vector<32x16x128xf32>
    %9 = math.exp %8 : vector<32x16x128xf32>
    %cst = arith.constant 1.000000e+00 : f32
    %10 = vector.broadcast %cst : f32 to vector<32x16x128xf32>
    %11 = arith.addf %10, %9 : vector<32x16x128xf32>
    %12 = arith.divf %10, %11 : vector<32x16x128xf32>
    %13 = arith.mulf %7, %12 : vector<32x16x128xf32>
    %14 = arith.truncf %13 : vector<32x16x128xf32> to vector<32x16x128xbf16>
    %c0_8 = arith.constant 0 : index
    %c0_9 = arith.constant 0 : index
    %c0_10 = arith.constant 0 : index
    %15 = vector.load %arg4[%c0_8, %c0_9, %c0_10] : memref<32x16x128xbf16, #tpu.memory_space<vmem>>, vector<32x16x128xbf16>
    tpu.vector_store %arg4[%c0_8, %c0_9, %c0_10], %14 {strides = array<i32>} : memref<32x16x128xbf16, #tpu.memory_space<vmem>>, vector<32x16x128xbf16>,
    return
  }
  func.func @transform_0(%arg0: i32) -> (i32, i32, i32) {
    %c0_i32 = arith.constant 0 : i32
    %c0_i32_0 = arith.constant 0 : i32
    %c0_i32_1 = arith.constant 0 : i32
    return %arg0, %c0_i32, %c0_i32_0 : i32, i32, i32
  }
  func.func @transform_1(%arg0: i32) -> (i32, i32, i32) {
    %c0_i32 = arith.constant 0 : i32
    %c0_i32_0 = arith.constant 0 : i32
    %c0_i32_1 = arith.constant 0 : i32
    %c0_i32_2 = arith.constant 0 : i32
    return %c0_i32, %c0_i32_0, %c0_i32_1 : i32, i32, i32
  }
  func.func @transform_2(%arg0: i32) -> (i32, i32, i32) {
    %c0_i32 = arith.constant 0 : i32
    %c0_i32_0 = arith.constant 0 : i32
    %c0_i32_1 = arith.constant 0 : i32
    %c0_i32_2 = arith.constant 0 : i32
    return %c0_i32, %c0_i32_0, %c0_i32_1 : i32, i32, i32
  }
  func.func @transform_3(%arg0: i32) -> (i32, i32, i32) {
    %c0_i32 = arith.constant 0 : i32
    %c0_i32_0 = arith.constant 0 : i32
    %c0_i32_1 = arith.constant 0 : i32
    return %arg0, %c0_i32, %c0_i32_0 : i32, i32, i32
  }
}

</mosaic_0001>

<bundles_post_ra>
// kernel: conv_bn_silu.3
= control target key start
LH: loop header
LB: loop body
LE: loop exit
PB: predicated region body
PF: predicated region fallthrough
CT: control target
= control target key end

     0   :  { %s4291_s0 = inlined_call_operand.vmem [shape: bf16[32,16,128], index: 0, kind: input, shape index: {}]   ;;  %s4292_s1 = inlined_call_operand.vmem [shape: f32[1,1,128], index: 1, kind: input, shape index: {}]   ;;  %s4293_s2 = inlined_call_operand.vmem [shape: f32[1,1,128], index: 2, kind: input, shape index: {}]   ;;  %s4294_s3 = inlined_call_operand.vmem [shape: bf16[32,16,128], index: 3, kind: output, shape index: {}]  }
   0x1   :  { %v1755_v0 = vld [vmem:[%s4291_s0] sm:$0xff]   ;;  %v2042_v5 = vld [vmem:[%s4291_s0 + $0x8] sm:$0xff]   ;;  %v2043_v8 = vld [vmem:[%s4291_s0 + $0x10] sm:$0xff]  }
   0x2   :  { %v2392_v1 = vld [vmem:[%s4292_s1] ss:$0 sm:$0xff]  ;;  %v1756_v2 = vunpack.c.l.bf16 %v1755_v0  ;;  %v1757_v3 = vunpack.c.h.bf16 %v1755_v0  ;;  %v1760_v6 = vunpack.c.l.bf16 %v2042_v5  ;;  %v1761_v7 = vunpack.c.h.bf16 %v2042_v5  ;;  %v2044_v9 = vld [vmem:[%s4291_s0 + $0x18] sm:$0xff]   ;;  %v2046_v34 = vld [vmem:[%s4291_s0 + $0x28] sm:$0xff]  }
   0x3   :  { %v2397_v4 = vld [vmem:[%s4293_s2] ss:$0 sm:$0xff]  ;;  %v1764_v12 = vunpack.c.l.bf16 %v2043_v8  ;;  %v1765_v13 = vunpack.c.h.bf16 %v2043_v8  ;;  %v1768_v16 = vunpack.c.l.bf16 %v2044_v9  ;;  %v1769_v17 = vunpack.c.h.bf16 %v2044_v9  ;;  %v2047_v40 = vld [vmem:[%s4291_s0 + $0x30] sm:$0xff]  }
   0x4   :  { %v146_v10 = vmul.f32 %v2392_v1, %v1756_v2  ;;  %v147_v11 = vmul.f32 %v2392_v1, %v1757_v3  ;;  %v148_v14 = vmul.f32 %v2392_v1, %v1760_v6  ;;  %v149_v15 = vmul.f32 %v2392_v1, %v1761_v7  ;;  %v2045_v26 = vld [vmem:[%s4291_s0 + $0x20] sm:$0xff]  }
   0x5   :  { %v150_v20 = vmul.f32 %v2392_v1, %v1764_v12  ;;  %v151_v21 = vmul.f32 %v2392_v1, %v1765_v13  ;;  %v152_v24 = vmul.f32 %v2392_v1, %v1768_v16  ;;  %v153_v25 = vmul.f32 %v2392_v1, %v1769_v17 }
   0x6   :  { %v2413_v18 = vadd.f32 %v2397_v4, %v146_v10  ;;  %v2416_v19 = vadd.f32 %v2397_v4, %v147_v11  ;;  %v2421_v22 = vadd.f32 %v2397_v4, %v148_v14  ;;  %v2424_v23 = vadd.f32 %v2397_v4, %v149_v15 }
   0x7   :  { %v2434_v29 = vadd.f32 %v2397_v4, %v150_v20  ;;  %v2437_v30 = vadd.f32 %v2397_v4, %v151_v21  ;;  %v2442_v33 = vadd.f32 %v2397_v4, %v152_v24  ;;  %v2449_v36 = vadd.f32 %v2397_v4, %v153_v25 }
   0x8   :  { %v1690_v27 = vmul.f32 -1.442695, %v2413_v18  ;;  %v1691_v28 = vmul.f32 -1.442695, %v2416_v19  ;;  %v1692_v31 = vmul.f32 -1.442695, %v2421_v22  ;;  %v1772_v37 = vunpack.c.l.bf16 %v2045_v26 }
   0x9   :  { %v1693_v32 = vmul.f32 -1.442695, %v2424_v23  ;;  %v1694_v35 = vmul.f32 -1.442695, %v2434_v29  ;;  %v1695_v38 = vmul.f32 -1.442695, %v2437_v30  ;;  %v1773_v39 = vunpack.c.h.bf16 %v2045_v26 }
   0xa   :  { %2106 = vpow2.f32 %v1690_v27  ;;  %v154_v41 = vmul.f32 %v2392_v1, %v1772_v37  ;;  %v1776_v42 = vunpack.c.l.bf16 %v2046_v34  ;;  %v1777_v43 = vunpack.c.h.bf16 %v2046_v34 }
   0xb   :  { %2108 = vpow2.f32 %v1691_v28  ;;  %v1696_v44 = vmul.f32 -1.442695, %v2442_v33  ;;  %v155_v45 = vmul.f32 %v2392_v1, %v1773_v39  ;;  %v1697_v46 = vmul.f32 -1.442695, %v2449_v36 }
   0xc   :  { %2110 = vpow2.f32 %v1692_v31  ;;  %v2460_v47 = vadd.f32 %v2397_v4, %v154_v41  ;;  %v1780_v48 = vunpack.c.l.bf16 %v2047_v40  ;;  %v156_v49 = vmul.f32 %v2392_v1, %v1776_v42 }
   0xd   :  { %2112 = vpow2.f32 %v1693_v32  ;;  %v1781_v50 = vunpack.c.h.bf16 %v2047_v40  ;;  %v2464_v52 = vadd.f32 %v2397_v4, %v155_v45  ;;  %v157_v53 = vmul.f32 %v2392_v1, %v1777_v43 }
   0xe   :  { %2114 = vpow2.f32 %v1694_v35  ;;  %v1698_v58 = vmul.f32 -1.442695, %v2460_v47  ;;  %v158_v59 = vmul.f32 %v2392_v1, %v1780_v48  ;;  %v2476_v62 = vadd.f32 %v2397_v4, %v156_v49 }
   0xf   :  { %2116 = vpow2.f32 %v1695_v38  ;;  %v2479_v63 = vmul.f32 %v2392_v1, %v1781_v50  ;;  %v2484_v3 = vmul.f32 -1.442695, %v2464_v52  ;;  %v2487_v5 = vadd.f32 %v2397_v4, %v157_v53 }
  0x10   :  { %v2107_v51 = vpop.eup %2106  ;;  %2118 = vpow2.f32 %v1696_v44  ;;  %v2499_v12 = vadd.f32 %v2397_v4, %v158_v59 }
  0x11   :  { %v2109_v54 = vpop.eup %2108  ;;  %v2467_v55 = vadd.f32 1.0, %v2107_v51  ;;  %2120 = vpow2.f32 %v1697_v46 }
  0x12   :  { %v2111_v56 = vpop.eup %2110  ;;  %v2469_v57 = vadd.f32 1.0, %v2109_v54 }
  0x13   :  { %v2113_v60 = vpop.eup %2112  ;;  %2122 = vrcp.f32 %v2467_v55  ;;  %v545_v61 = vand.u32 2147483648, %v2467_v55  ;;  %v543_v2 = vand.u32 2147483647, %v2467_v55  ;;  %v2491_v9 = vadd.f32 1.0, %v2111_v56 }
  0x14   :  { %v2115_v0 = vpop.eup %2114  ;;  %2124 = vrcp.f32 %v2469_v57  ;;  %v558_v7 = vand.u32 2147483647, %v2469_v57  ;;  %v560_v8 = vand.u32 2147483648, %v2469_v57  ;;  %v2493_v10 = vadd.f32 1.0, %v2113_v60 }
  0x15   :  { %v2117_v6 = vpop.eup %2116  ;;  %vm539_vm0 = vweird.f32 %v2467_v55  ;;  %v2496_v11 = vadd.f32 1.0, %v2115_v0  ;;  %2126 = vpow2.f32 %v1698_v58  ;;  %v546_v14 = vor.u32 1.1754944e-38, %v545_v61 }
  0x16   :  { %v2119_v13 = vpop.eup %2118  ;;  %vm554_vm1 = vweird.f32 %v2469_v57  ;;  %2128 = vrcp.f32 %v2491_v9  ;;  %v575_v15 = vand.u32 2147483648, %v2491_v9  ;;  %vm2506_vm2 = vcmp.eq.f32.partialorder %v543_v2, 8.507059e+37 }
  0x17   :  { %v2504_v16 = vpop.eup %2120  ;;  %v573_v20 = vand.u32 2147483647, %v2491_v9  ;;  %2130 = vrcp.f32 %v2493_v10  ;;  %v590_v21 = vand.u32 2147483648, %v2493_v10  ;;  %v2513_v24 = vadd.f32 1.0, %v2117_v6 }
  0x18   :  { %vm2515_vm3 = vcmp.eq.f32.partialorder %v558_v7, 8.507059e+37  ;;  %v561_v27 = vor.u32 1.1754944e-38, %v560_v8  ;;  %v588_v28 = vand.u32 2147483647, %v2493_v10  ;;  %2132 = vrcp.f32 %v2496_v11 }
  0x19   :  { %v2123_v25 = vpop.eup %2122  ;;  %vm569_vm4 = vweird.f32 %v2491_v9  ;;  %v2523_v34 = vor.u32 1.1754944e-38, %v575_v15  ;;  %vm584_vm5 = vweird.f32 %v2493_v10  ;;  %vm599_vm6 = vweird.f32 %v2496_v11 }
  0x1a   :  { %v2125_v31 = vpop.eup %2124  ;;  %v535_v32 = vmul.f32 %v2123_v25, %v2467_v55  ;;  %v603_v37 = vand.u32 2147483647, %v2496_v11  ;;  %v605_v38 = vand.u32 2147483648, %v2496_v11  ;;  %vm540_vm7 = vweird.f32 %v2123_v25 }
  0x1b   :  { %v550_v35 = vmul.f32 %v2125_v31, %v2469_v57  ;;  %v2530_v39 = vpop.eup %2126  ;;  %vm2532_vm8 = vcmp.eq.f32.partialorder %v573_v20, 8.507059e+37  ;;  %v591_v42 = vor.u32 1.1754944e-38, %v590_v21  ;;  %2134 = vrcp.f32 %v2513_v24  ;;  %vm2551_vm13 = vmor %vm539_vm0, %vm540_vm7 }
  0x1c   :  { %v536_v40 = vsub.f32 1.0, %v535_v32  ;;  %v2129_v43 = vpop.eup %2128  ;;  %vm555_vm9 = vweird.f32 %v2125_v31  ;;  %vm2537_vm10 = vcmp.eq.f32.partialorder %v588_v28, 8.507059e+37  ;;  %v618_v46 = vand.u32 2147483647, %v2513_v24 }
  0x1d   :  { %v551_v44 = vsub.f32 1.0, %v550_v35  ;;  %v2131_v48 = vpop.eup %2130  ;;  %v565_v50 = vmul.f32 %v2129_v43, %v2491_v9  ;;  %vm2544_vm12 = vcmp.eq.f32.partialorder %v603_v37, 8.507059e+37  ;;  %v606_v53 = vor.u32 1.1754944e-38, %v605_v38  ;;  %vm2560_vm15 = vmor %vm554_vm1, %vm555_vm9 }
  0x1e   :  { %v537_v49 = vmul.f32 %v2123_v25, %v536_v40  ;;  %v2133_v54 = vpop.eup %2132  ;;  %vm570_vm14 = vweird.f32 %v2129_v43  ;;  %v580_v59 = vmul.f32 %v2131_v48, %v2493_v10  ;;  %v620_v60 = vand.u32 2147483648, %v2513_v24 }
  0x1f   :  { %v552_v58 = vmul.f32 %v2125_v31, %v551_v44  ;;  %v566_v2 = vsub.f32 1.0, %v565_v50  ;;  %vm585_vm11 = vweird.f32 %v2131_v48  ;;  %v595_v55 = vmul.f32 %v2133_v54, %v2496_v11  ;;  %vm2577_vm1 = vmor %vm569_vm4, %vm570_vm14 }
  0x20   :  { %v538_v61 = vadd.f32 %v2123_v25, %v537_v49  ;;  %v581_v7 = vsub.f32 1.0, %v580_v59  ;;  %vm600_vm0 = vweird.f32 %v2133_v54  ;;  %v2565_v8 = vadd.f32 1.0, %v2119_v13 }
  0x21   :  { %v553_v6 = vadd.f32 %v2125_v31, %v552_v58  ;;  %v2135_v15 = vpop.eup %2134  ;;  %v567_v21 = vmul.f32 %v2129_v43, %v566_v2  ;;  %v596_v28 = vsub.f32 1.0, %v595_v55  ;;  %2136 = vpow2.f32 %v2484_v3  ;;  %vm2596_vm4 = vmor %vm599_vm6, %vm600_vm0 }
  0x22   :  { %v542_v20 = vsel %vm2551_vm13, %v2123_v25, %v538_v61  ;;  %v582_v35 = vmul.f32 %v2131_v48, %v581_v7  ;;  %v610_v25 = vmul.f32 %v2135_v15, %v2513_v24  ;;  %v2603_v40 = vadd.f32 1.0, %v2504_v16 }
  0x23   :  { %v547_v57 = vsel %vm2506_vm2, %v546_v14, %v542_v20  ;;  %v557_v32 = vsel %vm2560_vm15, %v2125_v31, %v553_v6  ;;  %v568_v17 = vadd.f32 %v2129_v43, %v567_v21  ;;  %vm2588_vm2 = vmor %vm584_vm5, %vm585_vm11  ;;  %v597_v9 = vmul.f32 %v2133_v54, %v596_v28 }
  0x24   :  { %v562_v37 = vsel %vm2515_vm3, %v561_v27, %v557_v32  ;;  %v1494_v3 = vmul.f32 %v547_v57, %v2413_v18  ;;  %v583_v38 = vadd.f32 %v2131_v48, %v582_v35  ;;  %v611_v18 = vsub.f32 1.0, %v610_v25 }
  0x25   :  { %v1495_v31 = vmul.f32 %v562_v37, %v2416_v19  ;;  %vm615_vm3 = vweird.f32 %v2135_v15  ;;  %v572_v10 = vsel %vm2577_vm1, %v2129_v43, %v568_v17  ;;  %v598_v27 = vadd.f32 %v2133_v54, %v597_v9 }
  0x26   :  { %2138 = vrcp.f32 %v2565_v8  ;;  %v577_v11 = vsel %vm2532_vm8, %v2523_v34, %v572_v10  ;;  %v587_v44 = vsel %vm2588_vm2, %v2131_v48, %v583_v38  ;;  %v612_v49 = vmul.f32 %v2135_v15, %v611_v18 }
  0x27   :  { %v1885_v19 = vpack.c.bf16 %v1495_v31, %v1494_v3  ;;  %v2137_v50 = vpop.eup %2136  ;;  %v592_v56 = vsel %vm2537_vm10, %v591_v42, %v587_v44  ;;  %v1496_v43 = vmul.f32 %v577_v11, %v2421_v22  ;;  %v602_v16 = vsel %vm2596_vm4, %v2133_v54, %v598_v27  ;;  %v2048_v3 = vld [vmem:[%s4291_s0 + $0x38] sm:$0xff]  }
  0x28   :  { %vm4315_vm5 = vweird.f32 %v2513_v24  ;;  %v621_v34 = vor.u32 1.1754944e-38, %v620_v60  ;;  %v1497_v41 = vmul.f32 %v592_v56, %v2424_v23  ;;  %v607_v42 = vsel %vm2544_vm12, %v606_v53, %v602_v16 }
  0x29   :  { %vm2618_vm6 = vmor %vm4315_vm5, %vm615_vm3  ;;  %1886 = vst [vmem:[%s4294_s3] sm:$0xff] %v1885_v19   ;;  %v613_v22 = vadd.f32 %v2135_v15, %v612_v49  ;;  %vm619_vm7 = vcmp.eq.f32.partialorder %v618_v46, 8.507059e+37  ;;  %v633_v45 = vand.u32 2147483647, %v2565_v8  ;;  %2140 = vrcp.f32 %v2603_v40  ;;  %v2700_v49 = vld [vmem:[%s4291_s0 + $0x40] sm:$0xff]  }
  0x2a   :  { %v1700_v24 = vmul.f32 -1.442695, %v2476_v62  ;;  %v1701_v48 = vmul.f32 -1.442695, %v2487_v5  ;;  %v1890_v54 = vpack.c.bf16 %v1497_v41, %v1496_v43  ;;  %v1498_v60 = vmul.f32 %v607_v42, %v2434_v29 }
  0x2b   :  { %v617_v59 = vsel %vm2618_vm6, %v2135_v15, %v613_v22  ;;  %v635_v23 = vand.u32 2147483648, %v2565_v8  ;;  %v648_v46 = vand.u32 2147483647, %v2603_v40  ;;  %v2638_v61 = vadd.f32 1.0, %v2530_v39 }
  0x2c   :  { %v2139_v51 = vpop.eup %2138  ;;  %v622_v53 = vsel %vm619_vm7, %v621_v34, %v617_v59  ;;  %v2640_v0 = vadd.f32 1.0, %v2137_v50  ;;  %2073 = vst [vmem:[%s4294_s3 + $0x8] sm:$0xff] %v1890_v54   ;;  %vm629_vm8 = vweird.f32 %v2565_v8  ;;  %v650_v29 = vand.u32 2147483648, %v2603_v40 }
  0x2d   :  { %v1499_v2 = vmul.f32 %v622_v53, %v2437_v30  ;;  %v625_v55 = vmul.f32 %v2139_v51, %v2565_v8  ;;  %vm630_vm9 = vweird.f32 %v2139_v51  ;;  %vm2649_vm10 = vcmp.eq.f32.partialorder %v633_v45, 8.507059e+37 }
  0x2e   :  { %vm644_vm11 = vweird.f32 %v2603_v40  ;;  %2142 = vrcp.f32 %v2638_v61  ;;  %v663_v15 = vand.u32 2147483647, %v2638_v61  ;;  %v636_v20 = vor.u32 1.1754944e-38, %v635_v23  ;;  %vm2671_vm14 = vmor %vm629_vm8, %vm630_vm9 }
  0x2f   :  { %v1895_v39 = vpack.c.bf16 %v1499_v2, %v1498_v60  ;;  %v626_v7 = vsub.f32 1.0, %v625_v55  ;;  %2144 = vrcp.f32 %v2640_v0  ;;  %v2141_v30 = vpop.eup %2140  ;;  %vm2657_vm12 = vcmp.eq.f32.partialorder %v648_v46, 8.507059e+37 }
  0x30   :  { %v665_v28 = vand.u32 2147483648, %v2638_v61  ;;  %v678_v57 = vand.u32 2147483647, %v2640_v0  ;;  %v640_v13 = vmul.f32 %v2141_v30, %v2603_v40  ;;  %v651_v35 = vor.u32 1.1754944e-38, %v650_v29 }
  0x31   :  { %2074 = vst [vmem:[%s4294_s3 + $0x10] sm:$0xff] %v1895_v39   ;;  %v627_v32 = vmul.f32 %v2139_v51, %v626_v7  ;;  %vm659_vm13 = vweird.f32 %v2638_v61  ;;  %vm645_vm15 = vweird.f32 %v2141_v30  ;;  %vm674_vm0 = vweird.f32 %v2640_v0 }
  0x32   :  { %2146 = vpow2.f32 %v1700_v24  ;;  %v2678_v37 = vadd.f32 %v2397_v4, %v2479_v63  ;;  %v641_v14 = vsub.f32 1.0, %v640_v13  ;;  %vm2683_vm1 = vcmp.eq.f32.partialorder %v663_v15, 8.507059e+37  ;;  %vm2707_vm4 = vmor %vm644_vm11, %vm645_vm15 }
  0x33   :  { %v628_v17 = vadd.f32 %v2139_v51, %v627_v32  ;;  %2148 = vpow2.f32 %v1701_v48  ;;  %v1702_v9 = vmul.f32 -1.442695, %v2499_v12  ;;  %v666_v38 = vor.u32 1.1754944e-38, %v665_v28 }
  0x34   :  { %v2143_v31 = vpop.eup %2142  ;;  %vm2688_vm2 = vcmp.eq.f32.partialorder %v678_v57, 8.507059e+37  ;;  %v680_v63 = vand.u32 2147483648, %v2640_v0  ;;  %v1703_v18 = vmul.f32 -1.442695, %v2678_v37  ;;  %v642_v19 = vmul.f32 %v2141_v30, %v641_v14 }
  0x35   :  { %v2145_v10 = vpop.eup %2144  ;;  %v632_v27 = vsel %vm2671_vm14, %v2139_v51, %v628_v17  ;;  %v655_v11 = vmul.f32 %v2143_v31, %v2638_v61  ;;  %v1784_v44 = vunpack.c.l.bf16 %v2048_v3  ;;  %2150 = vpow2.f32 %v1702_v9 }
  0x36   :  { %v637_v50 = vsel %vm2649_vm10, %v636_v20, %v632_v27  ;;  %v670_v43 = vmul.f32 %v2145_v10, %v2640_v0  ;;  %v1785_v16 = vunpack.c.h.bf16 %v2048_v3  ;;  %v643_v58 = vadd.f32 %v2141_v30, %v642_v19 }
  0x37   :  { %v656_v34 = vsub.f32 1.0, %v655_v11  ;;  %vm660_vm3 = vweird.f32 %v2143_v31  ;;  %2152 = vpow2.f32 %v1703_v18  ;;  %vm675_vm5 = vweird.f32 %v2145_v10 }
  0x38   :  { %v2147_v41 = vpop.eup %2146  ;;  %v671_v42 = vsub.f32 1.0, %v670_v43  ;;  %v681_v22 = vor.u32 1.1754944e-38, %v680_v63  ;;  %v1788_v45 = vunpack.c.l.bf16 %v2700_v49  ;;  %v647_v40 = vsel %vm2707_vm4, %v2141_v30, %v643_v58  ;;  %vm2720_vm6 = vmor %vm659_vm13, %vm660_vm3  ;;  %v2050_v43 = vld [vmem:[%s4291_s0 + $0x48] sm:$0xff]  }
  0x39   :  { %v2149_v24 = vpop.eup %2148  ;;  %v1500_v48 = vmul.f32 %v637_v50, %v2442_v33  ;;  %v657_v54 = vmul.f32 %v2143_v31, %v656_v34  ;;  %v480_v59 = vadd.f32 1.0, %v2147_v41  ;;  %v652_v60 = vsel %vm2657_vm12, %v651_v35, %v647_v40  ;;  %vm2731_vm7 = vmor %vm674_vm0, %vm675_vm5 }
  0x3a   :  { %v672_v51 = vmul.f32 %v2145_v10, %v671_v42  ;;  %v2724_v53 = vadd.f32 1.0, %v2149_v24  ;;  %v160_v46 = vmul.f32 %v2392_v1, %v1784_v44  ;;  %v1501_v2 = vmul.f32 %v652_v60, %v2449_v36 }
  0x3b   :  { %v658_v55 = vadd.f32 %v2143_v31, %v657_v54  ;;  %2154 = vrcp.f32 %v480_v59  ;;  %v161_v61 = vmul.f32 %v2392_v1, %v1785_v16  ;;  %v2151_v29 = vpop.eup %2150  ;;  %v693_v39 = vand.u32 2147483647, %v480_v59 }
  0x3c   :  { %v673_v6 = vadd.f32 %v2145_v10, %v672_v51  ;;  %2156 = vrcp.f32 %v2724_v53  ;;  %v1789_v7 = vunpack.c.h.bf16 %v2700_v49  ;;  %v1900_v36 = vpack.c.bf16 %v1501_v2, %v1500_v48 }
  0x3d   :  { %v2153_v15 = vpop.eup %2152  ;;  %v662_v30 = vsel %vm2720_vm6, %v2143_v31, %v658_v55  ;;  %v695_v0 = vand.u32 2147483648, %v480_v59  ;;  %v708_v20 = vand.u32 2147483647, %v2724_v53  ;;  %v2746_v57 = vadd.f32 %v2397_v4, %v160_v46 }
  0x3e   :  { %v667_v21 = vsel %vm2683_vm1, %v666_v38, %v662_v30  ;;  %v677_v28 = vsel %vm2731_vm7, %v2145_v10, %v673_v6  ;;  %v162_v32 = vmul.f32 %v2392_v1, %v1788_v45  ;;  %2075 = vst [vmem:[%s4294_s3 + $0x18] sm:$0xff] %v1900_v36   ;;  %vm689_vm8 = vweird.f32 %v480_v59 }
  0x3f   :  { %v682_v13 = vsel %vm2688_vm2, %v681_v22, %v677_v28  ;;  %v1502_v35 = vmul.f32 %v667_v21, %v2460_v47  ;;  %v710_v25 = vand.u32 2147483648, %v2724_v53  ;;  %vm704_vm9 = vweird.f32 %v2724_v53 }
  0x40   :  { %v1503_v3 = vmul.f32 %v682_v13, %v2464_v52  ;;  %v2758_v17 = vadd.f32 1.0, %v2151_v29  ;;  %v2760_v14 = vadd.f32 1.0, %v2153_v15  ;;  %vm2762_vm10 = vcmp.eq.f32.partialorder %v693_v39, 8.507059e+37 }
  0x41   :  { %v2155_v8 = vpop.eup %2154  ;;  %v696_v31 = vor.u32 1.1754944e-38, %v695_v0  ;;  %vm2766_vm11 = vcmp.eq.f32.partialorder %v708_v20, 8.507059e+37  ;;  %v2771_v47 = vadd.f32 %v2397_v4, %v161_v61  ;;  %v1704_v18 = vmul.f32 -1.442695, %v2746_v57 }
  0x42   :  { %v2157_v52 = vpop.eup %2156  ;;  %v1905_v26 = vpack.c.bf16 %v1503_v3, %v1502_v35  ;;  %v685_v63 = vmul.f32 %v2155_v8, %v480_v59  ;;  %2158 = vrcp.f32 %v2758_v17  ;;  %v711_v27 = vor.u32 1.1754944e-38, %v710_v25 }
  0x43   :  { %v700_v10 = vmul.f32 %v2157_v52, %v2724_v53  ;;  %v163_v19 = vmul.f32 %v2392_v1, %v1789_v7  ;;  %v2778_v11 = vadd.f32 %v2397_v4, %v162_v32  ;;  %vm690_vm12 = vweird.f32 %v2155_v8 }
  0x44   :  { %2076 = vst [vmem:[%s4294_s3 + $0x20] sm:$0xff] %v1905_v26   ;;  %v686_v44 = vsub.f32 1.0, %v685_v63  ;;  %vm705_vm13 = vweird.f32 %v2157_v52  ;;  %2160 = vrcp.f32 %v2760_v14  ;;  %vm719_vm14 = vweird.f32 %v2758_v17  ;;  %vm2793_vm0 = vmor %vm689_vm8, %vm690_vm12 }
  0x45   :  { %v701_v49 = vsub.f32 1.0, %v700_v10  ;;  %v723_v50 = vand.u32 2147483647, %v2758_v17  ;;  %v725_v56 = vand.u32 2147483648, %v2758_v17  ;;  %vm734_vm15 = vweird.f32 %v2760_v14  ;;  %vm2805_vm1 = vmor %vm704_vm9, %vm705_vm13 }
  0x46   :  { %v687_v16 = vmul.f32 %v2155_v8, %v686_v44  ;;  %2162 = vpow2.f32 %v1704_v18  ;;  %v1705_v58 = vmul.f32 -1.442695, %v2771_v47  ;;  %v738_v42 = vand.u32 2147483647, %v2760_v14 }
  0x47   :  { %v702_v41 = vmul.f32 %v2157_v52, %v701_v49  ;;  %v740_v22 = vand.u32 2147483648, %v2760_v14  ;;  %v2800_v45 = vadd.f32 %v2397_v4, %v163_v19  ;;  %v1706_v54 = vmul.f32 -1.442695, %v2778_v11 }
  0x48   :  { %v2159_v24 = vpop.eup %2158  ;;  %v688_v40 = vadd.f32 %v2155_v8, %v687_v16  ;;  %2164 = vpow2.f32 %v1705_v58  ;;  %v1792_v59 = vunpack.c.l.bf16 %v2050_v43  ;;  %v1793_v53 = vunpack.c.h.bf16 %v2050_v43 }
  0x49   :  { %v703_v60 = vadd.f32 %v2157_v52, %v702_v41  ;;  %v715_v23 = vmul.f32 %v2159_v24, %v2758_v17  ;;  %vm720_vm2 = vweird.f32 %v2159_v24  ;;  %v1707_v51 = vmul.f32 -1.442695, %v2800_v45  ;;  %v2051_v17 = vld [vmem:[%s4291_s0 + $0x50] sm:$0xff]  }
  0x4a   :  { %v2161_v46 = vpop.eup %2160  ;;  %v692_v2 = vsel %vm2793_vm0, %v2155_v8, %v688_v40  ;;  %2166 = vpow2.f32 %v1706_v54  ;;  %v164_v55 = vmul.f32 %v2392_v1, %v1792_v59  ;;  %vm2829_vm3 = vmor %vm719_vm14, %vm720_vm2  ;;  %vm2833_vm5 = vcmp.eq.f32.partialorder %v723_v50, 8.507059e+37 }
  0x4b   :  { %v697_v33 = vsel %vm2762_vm10, %v696_v31, %v692_v2  ;;  %v707_v61 = vsel %vm2805_vm1, %v2157_v52, %v703_v60  ;;  %v716_v29 = vsub.f32 1.0, %v715_v23  ;;  %v730_v6 = vmul.f32 %v2161_v46, %v2760_v14  ;;  %v2052_v2 = vld [vmem:[%s4291_s0 + $0x58] sm:$0xff]  }
  0x4c   :  { %v2163_v39 = vpop.eup %2162  ;;  %v712_v7 = vsel %vm2766_vm11, %v711_v27, %v707_v61  ;;  %v1504_v15 = vmul.f32 %v697_v33, %v2476_v62  ;;  %vm735_vm4 = vweird.f32 %v2161_v46  ;;  %2168 = vpow2.f32 %v1707_v51 }
  0x4d   :  { %v1505_v36 = vmul.f32 %v712_v7, %v2487_v5  ;;  %v717_v30 = vmul.f32 %v2159_v24, %v716_v29  ;;  %v731_v0 = vsub.f32 1.0, %v730_v6  ;;  %v2824_v20 = vadd.f32 1.0, %v2163_v39  ;;  %vm2849_vm7 = vmor %vm734_vm15, %vm735_vm4 }
  0x4e   :  { %v2165_v21 = vpop.eup %2164  ;;  %v726_v62 = vor.u32 1.1754944e-38, %v725_v56  ;;  %vm2837_vm6 = vcmp.eq.f32.partialorder %v738_v42, 8.507059e+37  ;;  %v741_v5 = vor.u32 1.1754944e-38, %v740_v22  ;;  %v165_v52 = vmul.f32 %v2392_v1, %v1793_v53  ;;  %v3058_v42 = vld [vmem:[%s4293_s2] ss:$0 sm:$0xff] }
  0x4f   :  { %v1910_v35 = vpack.c.bf16 %v1505_v36, %v1504_v15  ;;  %v718_v25 = vadd.f32 %v2159_v24, %v717_v30  ;;  %v732_v3 = vmul.f32 %v2161_v46, %v731_v0  ;;  %v2841_v8 = vadd.f32 1.0, %v2165_v21 }
  0x50   :  { %v2167_v9 = vpop.eup %2166  ;;  %2170 = vrcp.f32 %v2824_v20  ;;  %v753_v38 = vand.u32 2147483647, %v2824_v20  ;;  %v2857_v26 = vadd.f32 %v2397_v4, %v164_v55  ;;  %v755_v18 = vand.u32 2147483648, %v2824_v20 }
  0x51   :  { %2077 = vst [vmem:[%s4294_s3 + $0x28] sm:$0xff] %v1910_v35   ;;  %v722_v14 = vsel %vm2829_vm3, %v2159_v24, %v718_v25  ;;  %v733_v63 = vadd.f32 %v2161_v46, %v732_v3  ;;  %2172 = vrcp.f32 %v2841_v8  ;;  %v768_v19 = vand.u32 2147483647, %v2841_v8 }
  0x52   :  { %v2169_v10 = vpop.eup %2168  ;;  %v727_v27 = vsel %vm2833_vm5, %v726_v62, %v722_v14  ;;  %v1796_v44 = vunpack.c.l.bf16 %v2051_v17  ;;  %v1797_v49 = vunpack.c.h.bf16 %v2051_v17  ;;  %v770_v43 = vand.u32 2147483648, %v2841_v8 }
  0x53   :  { %v737_v50 = vsel %vm2849_vm7, %v2161_v46, %v733_v63  ;;  %v1506_v56 = vmul.f32 %v727_v27, %v2499_v12  ;;  %v2873_v16 = vadd.f32 1.0, %v2167_v9  ;;  %vm749_vm8 = vweird.f32 %v2824_v20 }
  0x54   :  { %v742_v58 = vsel %vm2837_vm6, %v741_v5, %v737_v50  ;;  %vm764_vm9 = vweird.f32 %v2841_v8  ;;  %v2879_v34 = vadd.f32 1.0, %v2169_v10  ;;  %vm2882_vm10 = vcmp.eq.f32.partialorder %v753_v38, 8.507059e+37 }
  0x55   :  { %v1507_v41 = vmul.f32 %v742_v58, %v2678_v37  ;;  %v756_v12 = vor.u32 1.1754944e-38, %v755_v18  ;;  %2174 = vrcp.f32 %v2873_v16  ;;  %v2888_v22 = vadd.f32 %v2397_v4, %v165_v52 }
  0x56   :  { %v2171_v24 = vpop.eup %2170  ;;  %vm2890_vm11 = vcmp.eq.f32.partialorder %v768_v19, 8.507059e+37  ;;  %v771_v48 = vor.u32 1.1754944e-38, %v770_v43  ;;  %v783_v54 = vand.u32 2147483647, %v2873_v16  ;;  %v785_v37 = vand.u32 2147483648, %v2873_v16 }
  0x57   :  { %2176 = vrcp.f32 %v2879_v34  ;;  %v2173_v59 = vpop.eup %2172  ;;  %v1915_v60 = vpack.c.bf16 %v1507_v41, %v1506_v56  ;;  %v745_v23 = vmul.f32 %v2171_v24, %v2824_v20  ;;  %vm779_vm12 = vweird.f32 %v2873_v16 }
  0x58   :  { %vm794_vm13 = vweird.f32 %v2879_v34  ;;  %vm750_vm14 = vweird.f32 %v2171_v24  ;;  %v760_v51 = vmul.f32 %v2173_v59, %v2841_v8  ;;  %vm765_vm15 = vweird.f32 %v2173_v59 }
  0x59   :  { %v798_v46 = vand.u32 2147483647, %v2879_v34  ;;  %2078 = vst [vmem:[%s4294_s3 + $0x30] sm:$0xff] %v1915_v60   ;;  %v746_v53 = vsub.f32 1.0, %v745_v23  ;;  %v786_v55 = vor.u32 1.1754944e-38, %v785_v37  ;;  %v800_v33 = vand.u32 2147483648, %v2879_v34  ;;  %vm2920_vm1 = vmor %vm749_vm8, %vm750_vm14 }
  0x5a   :  { %v1708_v61 = vmul.f32 -1.442695, %v2857_v26  ;;  %v761_v29 = vsub.f32 1.0, %v760_v51  ;;  %vm2910_vm0 = vcmp.eq.f32.partialorder %v783_v54, 8.507059e+37  ;;  %v1709_v39 = vmul.f32 -1.442695, %v2888_v22  ;;  %vm2928_vm4 = vmor %vm764_vm9, %vm765_vm15 }
  0x5b   :  { %v166_v7 = vmul.f32 %v2392_v1, %v1796_v44  ;;  %v167_v15 = vmul.f32 %v2392_v1, %v1797_v49  ;;  %v2175_v36 = vpop.eup %2174  ;;  %v747_v30 = vmul.f32 %v2171_v24, %v746_v53  ;;  %v801_v0 = vor.u32 1.1754944e-38, %v800_v33  ;;  %v2053_v33 = vld [vmem:[%s4291_s0 + $0x60] sm:$0xff]  }
  0x5c   :  { %2178 = vpow2.f32 %v1708_v61  ;;  %v1800_v21 = vunpack.c.l.bf16 %v2052_v2  ;;  %v762_v62 = vmul.f32 %v2173_v59, %v761_v29  ;;  %v775_v13 = vmul.f32 %v2175_v36, %v2873_v16 }
  0x5d   :  { %v2177_v28 = vpop.eup %2176  ;;  %vm780_vm2 = vweird.f32 %v2175_v36  ;;  %2180 = vpow2.f32 %v1709_v39  ;;  %v748_v5 = vadd.f32 %v2171_v24, %v747_v30  ;;  %v2934_v20 = vadd.f32 %v2397_v4, %v166_v7 }
  0x5e   :  { %v790_v25 = vmul.f32 %v2177_v28, %v2879_v34  ;;  %vm795_vm3 = vweird.f32 %v2177_v28  ;;  %v763_v3 = vadd.f32 %v2173_v59, %v762_v62  ;;  %v776_v17 = vsub.f32 1.0, %v775_v13  ;;  %vm2954_vm5 = vmor %vm779_vm12, %vm780_vm2 }
  0x5f   :  { %v2937_v9 = vadd.f32 %v2397_v4, %v167_v15  ;;  %v1801_v31 = vunpack.c.h.bf16 %v2052_v2  ;;  %v752_v38 = vsel %vm2920_vm1, %v2171_v24, %v748_v5  ;;  %v1710_v52 = vmul.f32 -1.442695, %v2934_v20  ;;  %vm2962_vm6 = vmor %vm794_vm13, %vm795_vm3 }
  0x60   :  { %v791_v8 = vsub.f32 1.0, %v790_v25  ;;  %v168_v14 = vmul.f32 %v2392_v1, %v1800_v21  ;;  %v757_v63 = vsel %vm2882_vm10, %v756_v12, %v752_v38  ;;  %v767_v18 = vsel %vm2928_vm4, %v2173_v59, %v763_v3  ;;  %v3022_v25 = vld [vmem:[%s4291_s0 + $0x68] sm:$0xff]  }
  0x61   :  { %v777_v10 = vmul.f32 %v2175_v36, %v776_v17  ;;  %v1711_v27 = vmul.f32 -1.442695, %v2937_v9  ;;  %v772_v44 = vsel %vm2890_vm11, %v771_v48, %v767_v18  ;;  %v1508_v49 = vmul.f32 %v757_v63, %v2746_v57 }
  0x62   :  { %v2179_v19 = vpop.eup %2178  ;;  %v792_v56 = vmul.f32 %v2177_v28, %v791_v8  ;;  %2182 = vpow2.f32 %v1710_v52  ;;  %v1509_v58 = vmul.f32 %v772_v44, %v2771_v47  ;;  %vm799_vm7 = vcmp.eq.f32.partialorder %v798_v46, 8.507059e+37  ;;  %v3031_v8 = vld [vmem:[%s4292_s1] ss:$0 sm:$0xff] }
  0x63   :  { %v2181_v43 = vpop.eup %2180  ;;  %v778_v41 = vadd.f32 %v2175_v36, %v777_v10  ;;  %v488_v57 = vadd.f32 1.0, %v2179_v19  ;;  %2184 = vpow2.f32 %v1711_v27  ;;  %v169_v47 = vmul.f32 %v2392_v1, %v1801_v31 }
  0x64   :  { %v793_v16 = vadd.f32 %v2177_v28, %v792_v56  ;;  %v2966_v12 = vadd.f32 1.0, %v2181_v43  ;;  %v1920_v24 = vpack.c.bf16 %v1509_v58, %v1508_v49  ;;  %v2976_v37 = vadd.f32 %v2397_v4, %v168_v14 }
  0x65   :  { %v782_v40 = vsel %vm2954_vm5, %v2175_v36, %v778_v41  ;;  %2186 = vrcp.f32 %v488_v57  ;;  %v813_v54 = vand.u32 2147483647, %v488_v57  ;;  %v815_v23 = vand.u32 2147483648, %v488_v57 }
  0x66   :  { %v787_v34 = vsel %vm2910_vm0, %v786_v55, %v782_v40  ;;  %v797_v48 = vsel %vm2962_vm6, %v2177_v28, %v793_v16  ;;  %2079 = vst [vmem:[%s4294_s3 + $0x38] sm:$0xff] %v1920_v24   ;;  %2188 = vrcp.f32 %v2966_v12  ;;  %v828_v46 = vand.u32 2147483647, %v2966_v12 }
  0x67   :  { %v802_v59 = vsel %vm799_vm7, %v801_v0, %v797_v48  ;;  %v1510_v60 = vmul.f32 %v787_v34, %v2778_v11  ;;  %vm809_vm8 = vweird.f32 %v488_v57  ;;  %v830_v53 = vand.u32 2147483648, %v2966_v12 }
  0x68   :  { %v2183_v1 = vpop.eup %2182  ;;  %v1511_v51 = vmul.f32 %v802_v59, %v2800_v45  ;;  %vm2991_vm9 = vcmp.eq.f32.partialorder %v813_v54, 8.507059e+37  ;;  %vm824_vm10 = vweird.f32 %v2966_v12  ;;  %v816_v6 = vor.u32 1.1754944e-38, %v815_v23 }
  0x69   :  { %v2185_v2 = vpop.eup %2184  ;;  %v2986_v55 = vadd.f32 1.0, %v2183_v1  ;;  %v3000_v39 = vadd.f32 %v2397_v4, %v169_v47  ;;  %v1712_v7 = vmul.f32 -1.442695, %v2976_v37  ;;  %vm3006_vm11 = vcmp.eq.f32.partialorder %v828_v46, 8.507059e+37 }
  0x6a   :  { %v1925_v61 = vpack.c.bf16 %v1511_v51, %v1510_v60  ;;  %v2996_v45 = vadd.f32 1.0, %v2185_v2  ;;  %v1804_v0 = vunpack.c.l.bf16 %v2053_v33  ;;  %v831_v28 = vor.u32 1.1754944e-38, %v830_v53 }
  0x6b   :  { %v2187_v29 = vpop.eup %2186  ;;  %2190 = vrcp.f32 %v2986_v55  ;;  %v843_v30 = vand.u32 2147483647, %v2986_v55  ;;  %v845_v4 = vand.u32 2147483648, %v2986_v55  ;;  %vm839_vm13 = vweird.f32 %v2986_v55 }
  0x6c   :  { %2080 = vst [vmem:[%s4294_s3 + $0x40] sm:$0xff] %v1925_v61   ;;  %v805_v15 = vmul.f32 %v2187_v29, %v488_v57  ;;  %2192 = vrcp.f32 %v2996_v45  ;;  %v2189_v21 = vpop.eup %2188  ;;  %v858_v32 = vand.u32 2147483647, %v2996_v45  ;;  %v860_v62 = vand.u32 2147483648, %v2996_v45 }
  0x6d   :  { %vm810_vm12 = vweird.f32 %v2187_v29  ;;  %v820_v5 = vmul.f32 %v2189_v21, %v2966_v12  ;;  %vm825_vm14 = vweird.f32 %v2189_v21  ;;  %vm854_vm15 = vweird.f32 %v2996_v45 }
  0x6e   :  { %v806_v13 = vsub.f32 1.0, %v805_v15  ;;  %2194 = vpow2.f32 %v1712_v7  ;;  %v1713_v35 = vmul.f32 -1.442695, %v3000_v39  ;;  %vm3024_vm0 = vcmp.eq.f32.partialorder %v843_v30, 8.507059e+37  ;;  %vm3036_vm1 = vmor %vm809_vm8, %vm810_vm12 }
  0x6f   :  { %v821_v17 = vsub.f32 1.0, %v820_v5  ;;  %v1805_v38 = vunpack.c.h.bf16 %v2053_v33  ;;  %v170_v52 = vmul.f32 %v3031_v8, %v1804_v0  ;;  %v846_v18 = vor.u32 1.1754944e-38, %v845_v4  ;;  %vm3049_vm4 = vmor %vm824_vm10, %vm825_vm14 }
  0x70   :  { %v807_v3 = vmul.f32 %v2187_v29, %v806_v13  ;;  %vm3040_vm2 = vcmp.eq.f32.partialorder %v858_v32, 8.507059e+37  ;;  %v861_v27 = vor.u32 1.1754944e-38, %v860_v62  ;;  %2196 = vpow2.f32 %v1713_v35 }
  0x71   :  { %v2191_v14 = vpop.eup %2190  ;;  %v822_v49 = vmul.f32 %v2189_v21, %v821_v17  ;;  %v1808_v56 = vunpack.c.l.bf16 %v3022_v25  ;;  %v171_v41 = vmul.f32 %v3031_v8, %v1805_v38  ;;  %v3061_v57 = vadd.f32 %v3058_v42, %v170_v52 }
  0x72   :  { %v2193_v19 = vpop.eup %2192  ;;  %v808_v44 = vadd.f32 %v2187_v29, %v807_v3  ;;  %v835_v50 = vmul.f32 %v2191_v14, %v2986_v55  ;;  %vm840_vm3 = vweird.f32 %v2191_v14  ;;  %v1809_v33 = vunpack.c.h.bf16 %v3022_v25 }
  0x73   :  { %v850_v58 = vmul.f32 %v2193_v19, %v2996_v45  ;;  %v823_v12 = vadd.f32 %v2189_v21, %v822_v49  ;;  %vm855_vm5 = vweird.f32 %v2193_v19  ;;  %v3068_v48 = vadd.f32 %v3058_v42, %v171_v41  ;;  %vm3079_vm6 = vmor %vm839_vm13, %vm840_vm3 }
  0x74   :  { %v812_v16 = vsel %vm3036_vm1, %v2187_v29, %v808_v44  ;;  %v836_v24 = vsub.f32 1.0, %v835_v50  ;;  %v2195_v40 = vpop.eup %2194  ;;  %v1714_v54 = vmul.f32 -1.442695, %v3061_v57  ;;  %vm3088_vm7 = vmor %vm854_vm15, %vm855_vm5  ;;  %v172_v15 = vmul.f32 %v3031_v8, %v1808_v56 }
  0x75   :  { %v817_v47 = vsel %vm2991_vm9, %v816_v6, %v812_v16  ;;  %v851_v34 = vsub.f32 1.0, %v850_v58  ;;  %v827_v59 = vsel %vm3049_vm4, %v2189_v21, %v823_v12  ;;  %v492_v1 = vadd.f32 1.0, %v2195_v40 }
  0x76   :  { %v1512_v60 = vmul.f32 %v817_v47, %v2857_v26  ;;  %v837_v23 = vmul.f32 %v2191_v14, %v836_v24  ;;  %v2197_v51 = vpop.eup %2196  ;;  %v832_v46 = vsel %vm3006_vm11, %v831_v28, %v827_v59  ;;  %2198 = vpow2.f32 %v1714_v54 }
  0x77   :  { %v852_v53 = vmul.f32 %v2193_v19, %v851_v34  ;;  %v1513_v61 = vmul.f32 %v832_v46, %v2888_v22  ;;  %v493_v29 = vadd.f32 1.0, %v2197_v51  ;;  %2200 = vrcp.f32 %v492_v1  ;;  %v2055_v22 = vld [vmem:[%s4291_s0 + $0x70] sm:$0xff]   ;;  %v2056_v34 = vld [vmem:[%s4291_s0 + $0x78] sm:$0xff]  }
  0x78   :  { %v838_v26 = vadd.f32 %v2191_v14, %v837_v23  ;;  %v873_v6 = vand.u32 2147483647, %v492_v1  ;;  %v1715_v7 = vmul.f32 -1.442695, %v3068_v48  ;;  %v875_v30 = vand.u32 2147483648, %v492_v1 }
  0x79   :  { %v853_v55 = vadd.f32 %v2193_v19, %v852_v53  ;;  %v1930_v36 = vpack.c.bf16 %v1513_v61, %v1512_v60  ;;  %2202 = vrcp.f32 %v493_v29  ;;  %vm869_vm8 = vweird.f32 %v492_v1 }
  0x7a   :  { %v842_v45 = vsel %vm3079_vm6, %v2191_v14, %v838_v26  ;;  %v1812_v32 = vunpack.c.l.bf16 %v2055_v22  ;;  %2204 = vpow2.f32 %v1715_v7  ;;  %v173_v5 = vmul.f32 %v3031_v8, %v1809_v33 }
  0x7b   :  { %v847_v0 = vsel %vm3024_vm0, %v846_v18, %v842_v45  ;;  %v857_v21 = vsel %vm3088_vm7, %v2193_v19, %v853_v55  ;;  %2081 = vst [vmem:[%s4294_s3 + $0x48] sm:$0xff] %v1930_v36   ;;  %v3112_v35 = vadd.f32 %v3058_v42, %v172_v15  ;;  %vm3114_vm9 = vcmp.eq.f32.partialorder %v873_v6, 8.507059e+37 }
  0x7c   :  { %v862_v28 = vsel %vm3040_vm2, %v861_v27, %v857_v21  ;;  %v1514_v4 = vmul.f32 %v847_v0, %v2934_v20  ;;  %v2199_v62 = vpop.eup %2198  ;;  %v876_v17 = vor.u32 1.1754944e-38, %v875_v30  ;;  %vm884_vm10 = vweird.f32 %v493_v29 }
  0x7d   :  { %v1515_v13 = vmul.f32 %v862_v28, %v2937_v9  ;;  %v2201_v25 = vpop.eup %2200  ;;  %v3118_v31 = vadd.f32 1.0, %v2199_v62  ;;  %v3121_v52 = vadd.f32 %v3058_v42, %v173_v5  ;;  %v1813_v9 = vunpack.c.h.bf16 %v2055_v22 }
  0x7e   :  { %v865_v38 = vmul.f32 %v2201_v25, %v492_v1  ;;  %vm870_vm11 = vweird.f32 %v2201_v25  ;;  %v888_v63 = vand.u32 2147483647, %v493_v29  ;;  %v890_v18 = vand.u32 2147483648, %v493_v29 }
  0x7f   :  { %v1935_v20 = vpack.c.bf16 %v1515_v13, %v1514_v4  ;;  %v2203_v14 = vpop.eup %2202  ;;  %2206 = vrcp.f32 %v3118_v31  ;;  %v903_v19 = vand.u32 2147483647, %v3118_v31  ;;  %v1716_v44 = vmul.f32 -1.442695, %v3112_v35  ;;  %vm3135_vm13 = vmor %vm869_vm8, %vm870_vm11 }
  0x80   :  { %v866_v10 = vsub.f32 1.0, %v865_v38  ;;  %v880_v27 = vmul.f32 %v2203_v14, %v493_v29  ;;  %vm885_vm12 = vweird.f32 %v2203_v14  ;;  %v905_v49 = vand.u32 2147483648, %v3118_v31  ;;  %v2205_v43 = vpop.eup %2204 }
  0x81   :  { %2082 = vst [vmem:[%s4294_s3 + $0x50] sm:$0xff] %v1935_v20   ;;  %v1717_v50 = vmul.f32 -1.442695, %v3121_v52  ;;  %v174_v56 = vmul.f32 %v3031_v8, %v1812_v32  ;;  %2208 = vpow2.f32 %v1716_v44  ;;  %v175_v16 = vmul.f32 %v3031_v8, %v1813_v9  ;;  %vm3156_vm15 = vmor %vm884_vm10, %vm885_vm12 }
  0x82   :  { %v867_v58 = vmul.f32 %v2201_v25, %v866_v10  ;;  %v881_v41 = vsub.f32 1.0, %v880_v27  ;;  %vm3139_vm14 = vcmp.eq.f32.partialorder %v888_v63, 8.507059e+37  ;;  %v3143_v40 = vadd.f32 1.0, %v2205_v43 }
  0x83   :  { %2210 = vpow2.f32 %v1717_v50  ;;  %v3146_v47 = vadd.f32 %v3058_v42, %v174_v56  ;;  %v891_v60 = vor.u32 1.1754944e-38, %v890_v18  ;;  %v3152_v23 = vadd.f32 %v3058_v42, %v175_v16  ;;  %v2057_v18 = vld [vmem:[%s4291_s0 + $0x80] sm:$0xff]  }
  0x84   :  { %v868_v54 = vadd.f32 %v2201_v25, %v867_v58  ;;  %v882_v59 = vmul.f32 %v2203_v14, %v881_v41  ;;  %vm899_vm0 = vweird.f32 %v3118_v31  ;;  %vm3161_vm1 = vcmp.eq.f32.partialorder %v903_v19, 8.507059e+37 }
  0x85   :  { %v2207_v1 = vpop.eup %2206  ;;  %v906_v2 = vor.u32 1.1754944e-38, %v905_v49  ;;  %2212 = vrcp.f32 %v3143_v40  ;;  %v1816_v26 = vunpack.c.l.bf16 %v2056_v34  ;;  %v918_v29 = vand.u32 2147483647, %v3143_v40 }
  0x86   :  { %v872_v53 = vsel %vm3135_vm13, %v2201_v25, %v868_v54  ;;  %v883_v33 = vadd.f32 %v2203_v14, %v882_v59  ;;  %v895_v61 = vmul.f32 %v2207_v1, %v3118_v31  ;;  %vm900_vm2 = vweird.f32 %v2207_v1 }
  0x87   :  { %v877_v11 = vsel %vm3114_vm9, %v876_v17, %v872_v53  ;;  %v1718_v55 = vmul.f32 -1.442695, %v3146_v47  ;;  %v2209_v6 = vpop.eup %2208  ;;  %v1719_v36 = vmul.f32 -1.442695, %v3152_v23  ;;  %v920_v0 = vand.u32 2147483648, %v3143_v40  ;;  %vm3188_vm4 = vmor %vm899_vm0, %vm900_vm2 }
  0x88   :  { %v887_v7 = vsel %vm3156_vm15, %v2203_v14, %v883_v33  ;;  %v1516_v15 = vmul.f32 %v877_v11, %v2976_v37  ;;  %v896_v22 = vsub.f32 1.0, %v895_v61  ;;  %v3180_v21 = vadd.f32 1.0, %v2209_v6 }
  0x89   :  { %v2211_v45 = vpop.eup %2210  ;;  %v892_v30 = vsel %vm3139_vm14, %v891_v60, %v887_v7  ;;  %2214 = vpow2.f32 %v1718_v55  ;;  %v1817_v5 = vunpack.c.h.bf16 %v2056_v34  ;;  %v176_v25 = vmul.f32 %v3031_v8, %v1816_v26 }
  0x8a   :  { %v1517_v28 = vmul.f32 %v892_v30, %v3000_v39  ;;  %v897_v4 = vmul.f32 %v2207_v1, %v896_v22  ;;  %v3183_v32 = vadd.f32 1.0, %v2211_v45  ;;  %2216 = vpow2.f32 %v1719_v36 }
  0x8b   :  { %v2213_v62 = vpop.eup %2212  ;;  %2218 = vrcp.f32 %v3180_v21  ;;  %v933_v13 = vand.u32 2147483647, %v3180_v21  ;;  %v935_v20 = vand.u32 2147483648, %v3180_v21  ;;  %vm914_vm3 = vweird.f32 %v3143_v40 }
  0x8c   :  { %v1940_v39 = vpack.c.bf16 %v1517_v28, %v1516_v15  ;;  %v898_v3 = vadd.f32 %v2207_v1, %v897_v4  ;;  %v910_v17 = vmul.f32 %v2213_v62, %v3143_v40  ;;  %vm3198_vm5 = vcmp.eq.f32.partialorder %v918_v29, 8.507059e+37 }
  0x8d   :  { %v921_v38 = vor.u32 1.1754944e-38, %v920_v0  ;;  %2220 = vrcp.f32 %v3183_v32  ;;  %vm915_vm6 = vweird.f32 %v2213_v62  ;;  %v948_v63 = vand.u32 2147483647, %v3183_v32 }
  0x8e   :  { %2083 = vst [vmem:[%s4294_s3 + $0x58] sm:$0xff] %v1940_v39   ;;  %v902_v9 = vsel %vm3188_vm4, %v2207_v1, %v898_v3  ;;  %v911_v14 = vsub.f32 1.0, %v910_v17  ;;  %vm929_vm7 = vweird.f32 %v3180_v21  ;;  %v177_v19 = vmul.f32 %v3031_v8, %v1817_v5  ;;  %vm3228_vm10 = vmor %vm914_vm3, %vm915_vm6  ;;  %v2058_v39 = vld [vmem:[%s4291_s0 + $0x88] sm:$0xff]  }
  0x8f   :  { %v2215_v10 = vpop.eup %2214  ;;  %v907_v27 = vsel %vm3161_vm1, %v906_v2, %v902_v9  ;;  %v3217_v44 = vadd.f32 %v3058_v42, %v176_v25  ;;  %vm3219_vm8 = vcmp.eq.f32.partialorder %v933_v13, 8.507059e+37  ;;  %v936_v43 = vor.u32 1.1754944e-38, %v935_v20 }
  0x90   :  { %v2217_v49 = vpop.eup %2216  ;;  %v912_v50 = vmul.f32 %v2213_v62, %v911_v14  ;;  %vm944_vm9 = vweird.f32 %v3183_v32  ;;  %v950_v58 = vand.u32 2147483648, %v3183_v32  ;;  %v1518_v12 = vmul.f32 %v907_v27, %v3061_v57 }
  0x91   :  { %v2219_v41 = vpop.eup %2218  ;;  %v3233_v24 = vadd.f32 1.0, %v2215_v10  ;;  %v3235_v34 = vadd.f32 1.0, %v2217_v49  ;;  %v1820_v54 = vunpack.c.l.bf16 %v2057_v18  ;;  %vm3238_vm11 = vcmp.eq.f32.partialorder %v948_v63, 8.507059e+37 }
  0x92   :  { %v913_v59 = vadd.f32 %v2213_v62, %v912_v50  ;;  %v925_v60 = vmul.f32 %v2219_v41, %v3180_v21  ;;  %v3243_v40 = vadd.f32 %v3058_v42, %v177_v19  ;;  %vm930_vm12 = vweird.f32 %v2219_v41 }
  0x93   :  { %v2221_v51 = vpop.eup %2220  ;;  %2222 = vrcp.f32 %v3233_v24  ;;  %v965_v57 = vand.u32 2147483648, %v3233_v24  ;;  %v1720_v46 = vmul.f32 -1.442695, %v3217_v44  ;;  %v963_v61 = vand.u32 2147483647, %v3233_v24  ;;  %vm3259_vm14 = vmor %vm929_vm7, %vm930_vm12 }
  0x94   :  { %v917_v2 = vsel %vm3228_vm10, %v2213_v62, %v913_v59  ;;  %v926_v53 = vsub.f32 1.0, %v925_v60  ;;  %v940_v33 = vmul.f32 %v2221_v51, %v3183_v32  ;;  %v951_v11 = vor.u32 1.1754944e-38, %v950_v58 }
  0x95   :  { %v922_v26 = vsel %vm3198_vm5, %v921_v38, %v917_v2  ;;  %2224 = vrcp.f32 %v3235_v34  ;;  %v1821_v29 = vunpack.c.h.bf16 %v2057_v18  ;;  %vm945_vm13 = vweird.f32 %v2221_v51 }
  0x96   :  { %v1519_v55 = vmul.f32 %v922_v26, %v3068_v48  ;;  %v927_v6 = vmul.f32 %v2219_v41, %v926_v53  ;;  %v941_v7 = vsub.f32 1.0, %v940_v33  ;;  %vm959_vm15 = vweird.f32 %v3233_v24  ;;  %vm3272_vm1 = vmor %vm944_vm9, %vm945_vm13 }
  0x97   :  { %v966_v22 = vor.u32 1.1754944e-38, %v965_v57  ;;  %2226 = vpow2.f32 %v1720_v46  ;;  %v1721_v36 = vmul.f32 -1.442695, %v3243_v40  ;;  %vm3265_vm0 = vcmp.eq.f32.partialorder %v963_v61, 8.507059e+37 }
  0x98   :  { %v1945_v45 = vpack.c.bf16 %v1519_v55, %v1518_v12  ;;  %v928_v30 = vadd.f32 %v2219_v41, %v927_v6  ;;  %v942_v0 = vmul.f32 %v2221_v51, %v941_v7  ;;  %v178_v28 = vmul.f32 %v3031_v8, %v1820_v54 }
  0x99   :  { %v2223_v21 = vpop.eup %2222  ;;  %vm974_vm2 = vweird.f32 %v3235_v34  ;;  %v978_v62 = vand.u32 2147483647, %v3235_v34  ;;  %2228 = vpow2.f32 %v1721_v36  ;;  %v179_v37 = vmul.f32 %v3031_v8, %v1821_v29 }
  0x9a   :  { %2084 = vst [vmem:[%s4294_s3 + $0x60] sm:$0xff] %v1945_v45   ;;  %v932_v13 = vsel %vm3259_vm14, %v2219_v41, %v928_v30  ;;  %v943_v5 = vadd.f32 %v2221_v51, %v942_v0  ;;  %v955_v32 = vmul.f32 %v2223_v21, %v3233_v24  ;;  %v980_v25 = vand.u32 2147483648, %v3235_v34  ;;  %v2059_v24 = vld [vmem:[%s4291_s0 + $0x90] sm:$0xff]  }
  0x9b   :  { %v2225_v3 = vpop.eup %2224  ;;  %v937_v17 = vsel %vm3219_vm8, %v936_v43, %v932_v13  ;;  %vm960_vm4 = vweird.f32 %v2223_v21  ;;  %v3292_v20 = vadd.f32 %v3058_v42, %v178_v28  ;;  %v3295_v31 = vadd.f32 %v3058_v42, %v179_v37 }
  0x9c   :  { %v947_v38 = vsel %vm3272_vm1, %v2221_v51, %v943_v5  ;;  %v1520_v9 = vmul.f32 %v937_v17, %v3112_v35  ;;  %v956_v14 = vsub.f32 1.0, %v955_v32  ;;  %v970_v63 = vmul.f32 %v2225_v3, %v3235_v34  ;;  %vm3310_vm5 = vmor %vm959_vm15, %vm960_vm4 }
  0x9d   :  { %v2227_v18 = vpop.eup %2226  ;;  %v952_v10 = vsel %vm3238_vm11, %v951_v11, %v947_v38  ;;  %vm975_vm3 = vweird.f32 %v2225_v3  ;;  %v1722_v27 = vmul.f32 -1.442695, %v3292_v20  ;;  %v1824_v19 = vunpack.c.l.bf16 %v2058_v39 }
  0x9e   :  { %v1521_v49 = vmul.f32 %v952_v10, %v3121_v52  ;;  %v957_v50 = vmul.f32 %v2223_v21, %v956_v14  ;;  %v971_v56 = vsub.f32 1.0, %v970_v63  ;;  %v3305_v43 = vadd.f32 1.0, %v2227_v18  ;;  %vm3327_vm7 = vmor %vm974_vm2, %vm975_vm3 }
  0x9f   :  { %v2229_v58 = vpop.eup %2228  ;;  %vm3314_vm6 = vcmp.eq.f32.partialorder %v978_v62, 8.507059e+37  ;;  %v981_v16 = vor.u32 1.1754944e-38, %v980_v25  ;;  %2230 = vpow2.f32 %v1722_v27  ;;  %v1723_v52 = vmul.f32 -1.442695, %v3295_v31 }
  0xa0   :  { %v1950_v12 = vpack.c.bf16 %v1521_v49, %v1520_v9  ;;  %v958_v54 = vadd.f32 %v2223_v21, %v957_v50  ;;  %v972_v59 = vmul.f32 %v2225_v3, %v971_v56  ;;  %v3319_v60 = vadd.f32 1.0, %v2229_v58 }
  0xa1   :  { %2232 = vrcp.f32 %v3305_v43  ;;  %v993_v51 = vand.u32 2147483647, %v3305_v43  ;;  %v1825_v57 = vunpack.c.h.bf16 %v2058_v39  ;;  %v180_v46 = vmul.f32 %v3031_v8, %v1824_v19  ;;  %v3379_v39 = vld [vmem:[%s4291_s0 + $0x98] sm:$0xff]  }
  0xa2   :  { %2085 = vst [vmem:[%s4294_s3 + $0x68] sm:$0xff] %v1950_v12   ;;  %v962_v2 = vsel %vm3310_vm5, %v2223_v21, %v958_v54  ;;  %v973_v53 = vadd.f32 %v2225_v3, %v972_v59  ;;  %v995_v34 = vand.u32 2147483648, %v3305_v43  ;;  %2234 = vrcp.f32 %v3319_v60 }
  0xa3   :  { %v967_v33 = vsel %vm3265_vm0, %v966_v22, %v962_v2  ;;  %vm989_vm8 = vweird.f32 %v3305_v43  ;;  %v1008_v61 = vand.u32 2147483647, %v3319_v60  ;;  %v1828_v26 = vunpack.c.l.bf16 %v2059_v24 }
  0xa4   :  { %v977_v11 = vsel %vm3327_vm7, %v2225_v3, %v973_v53  ;;  %v1522_v29 = vmul.f32 %v967_v33, %v3146_v47  ;;  %vm1004_vm9 = vweird.f32 %v3319_v60  ;;  %2236 = vpow2.f32 %v1723_v52 }
  0xa5   :  { %v2231_v55 = vpop.eup %2230  ;;  %v982_v6 = vsel %vm3314_vm6, %v981_v16, %v977_v11  ;;  %v1010_v7 = vand.u32 2147483648, %v3319_v60  ;;  %v181_v15 = vmul.f32 %v3031_v8, %v1825_v57  ;;  %v3354_v22 = vadd.f32 %v3058_v42, %v180_v46 }
  0xa6   :  { %v1523_v36 = vmul.f32 %v982_v6, %v3152_v23  ;;  %vm3357_vm10 = vcmp.eq.f32.partialorder %v993_v51, 8.507059e+37  ;;  %v996_v47 = vor.u32 1.1754944e-38, %v995_v34  ;;  %v3361_v30 = vadd.f32 1.0, %v2231_v55 }
  0xa7   :  { %v2233_v0 = vpop.eup %2232  ;;  %vm3363_vm11 = vcmp.eq.f32.partialorder %v1008_v61, 8.507059e+37  ;;  %v3368_v28 = vadd.f32 %v3058_v42, %v181_v15  ;;  %v1724_v21 = vmul.f32 -1.442695, %v3354_v22  ;;  %v1829_v4 = vunpack.c.h.bf16 %v2059_v24 }
  0xa8   :  { %v2235_v62 = vpop.eup %2234  ;;  %v1955_v23 = vpack.c.bf16 %v1523_v36, %v1522_v29  ;;  %v985_v37 = vmul.f32 %v2233_v0, %v3305_v43  ;;  %2238 = vrcp.f32 %v3361_v30  ;;  %v182_v13 = vmul.f32 %v3031_v8, %v1828_v26 }
  0xa9   :  { %vm990_vm12 = vweird.f32 %v2233_v0  ;;  %v1000_v5 = vmul.f32 %v2235_v62, %v3319_v60  ;;  %v1011_v32 = vor.u32 1.1754944e-38, %v1010_v7  ;;  %v1023_v25 = vand.u32 2147483647, %v3361_v30 }
  0xaa   :  { %v2237_v3 = vpop.eup %2236  ;;  %2086 = vst [vmem:[%s4294_s3 + $0x70] sm:$0xff] %v1955_v23   ;;  %v986_v17 = vsub.f32 1.0, %v985_v37  ;;  %v1025_v38 = vand.u32 2147483648, %v3361_v30  ;;  %2240 = vpow2.f32 %v1724_v21  ;;  %v1725_v9 = vmul.f32 -1.442695, %v3368_v28  ;;  %vm3396_vm14 = vmor %vm989_vm8, %vm990_vm12 }
  0xab   :  { %v1001_v14 = vsub.f32 1.0, %v1000_v5  ;;  %vm1005_vm13 = vweird.f32 %v2235_v62  ;;  %v3386_v63 = vadd.f32 1.0, %v2237_v3  ;;  %v183_v18 = vmul.f32 %v3031_v8, %v1829_v4 }
  0xac   :  { %v987_v10 = vmul.f32 %v2233_v0, %v986_v17  ;;  %2242 = vpow2.f32 %v1725_v9  ;;  %v3390_v27 = vadd.f32 %v3058_v42, %v182_v13  ;;  %v1832_v19 = vunpack.c.l.bf16 %v3379_v39  ;;  %vm3408_vm1 = vmor %vm1004_vm9, %vm1005_vm13 }
  0xad   :  { %v1002_v50 = vmul.f32 %v2235_v62, %v1001_v14  ;;  %vm1019_vm15 = vweird.f32 %v3361_v30  ;;  %vm3401_vm0 = vcmp.eq.f32.partialorder %v1023_v25, 8.507059e+37  ;;  %2244 = vrcp.f32 %v3386_v63 }
  0xae   :  { %v2239_v58 = vpop.eup %2238  ;;  %v988_v35 = vadd.f32 %v2233_v0, %v987_v10  ;;  %v1026_v43 = vor.u32 1.1754944e-38, %v1025_v38  ;;  %v3413_v16 = vadd.f32 %v3058_v42, %v183_v18  ;;  %v1726_v52 = vmul.f32 -1.442695, %v3390_v27 }
  0xaf   :  { %v1003_v12 = vadd.f32 %v2235_v62, %v1002_v50  ;;  %v1015_v54 = vmul.f32 %v2239_v58, %v3361_v30  ;;  %v1038_v59 = vand.u32 2147483647, %v3386_v63  ;;  %v1040_v24 = vand.u32 2147483648, %v3386_v63 }
  0xb0   :  { %v2241_v1 = vpop.eup %2240  ;;  %v992_v60 = vsel %vm3396_vm14, %v2233_v0, %v988_v35  ;;  %vm1020_vm2 = vweird.f32 %v2239_v58  ;;  %2246 = vpow2.f32 %v1726_v52  ;;  %v1727_v51 = vmul.f32 -1.442695, %v3413_v16 }
  0xb1   :  { %v997_v57 = vsel %vm3357_vm10, %v996_v47, %v992_v60  ;;  %v1007_v46 = vsel %vm3408_vm1, %v2235_v62, %v1003_v12  ;;  %v1016_v2 = vsub.f32 1.0, %v1015_v54  ;;  %v3426_v53 = vadd.f32 1.0, %v2241_v1  ;;  %vm3439_vm3 = vmor %vm1019_vm15, %vm1020_vm2 }
  0xb2   :  { %v2243_v34 = vpop.eup %2242  ;;  %v1012_v33 = vsel %vm3363_vm11, %v1011_v32, %v1007_v46  ;;  %v1524_v61 = vmul.f32 %v997_v57, %v3217_v44  ;;  %vm1034_vm4 = vweird.f32 %v3386_v63  ;;  %2248 = vpow2.f32 %v1727_v51 }
  0xb3   :  { %v2245_v26 = vpop.eup %2244  ;;  %v1525_v11 = vmul.f32 %v1012_v33, %v3243_v40  ;;  %v1017_v29 = vmul.f32 %v2239_v58, %v1016_v2  ;;  %v3433_v55 = vadd.f32 1.0, %v2243_v34  ;;  %2250 = vrcp.f32 %v3426_v53 }
  0xb4   :  { %v1030_v44 = vmul.f32 %v2245_v26, %v3386_v63  ;;  %vm3444_vm5 = vcmp.eq.f32.partialorder %v1038_v59, 8.507059e+37  ;;  %v1041_v15 = vor.u32 1.1754944e-38, %v1040_v24  ;;  %v1053_v40 = vand.u32 2147483647, %v3426_v53  ;;  %v2061_v59 = vld [vmem:[%s4291_s0 + $0xa0] sm:$0xff]  }
  0xb5   :  { %v1960_v36 = vpack.c.bf16 %v1525_v11, %v1524_v61  ;;  %v1018_v45 = vadd.f32 %v2239_v58, %v1017_v29  ;;  %v1055_v47 = vand.u32 2147483648, %v3426_v53  ;;  %2252 = vrcp.f32 %v3433_v55 }
  0xb6   :  { %v2247_v30 = vpop.eup %2246  ;;  %v1031_v0 = vsub.f32 1.0, %v1030_v44  ;;  %vm1035_vm6 = vweird.f32 %v2245_v26  ;;  %v1068_v48 = vand.u32 2147483647, %v3433_v55  ;;  %v1833_v21 = vunpack.c.h.bf16 %v3379_v39 }
  0xb7   :  { %2087 = vst [vmem:[%s4294_s3 + $0x78] sm:$0xff] %v1960_v36   ;;  %v1022_v4 = vsel %vm3439_vm3, %v2239_v58, %v1018_v45  ;;  %vm1049_vm7 = vweird.f32 %v3426_v53  ;;  %v1070_v62 = vand.u32 2147483648, %v3433_v55  ;;  %v3460_v23 = vadd.f32 1.0, %v2247_v30  ;;  %vm3471_vm10 = vmor %vm1034_vm4, %vm1035_vm6  ;;  %v2062_v45 = vld [vmem:[%s4291_s0 + $0xa8] sm:$0xff]  }
  0xb8   :  { %v2249_v37 = vpop.eup %2248  ;;  %v1027_v13 = vsel %vm3401_vm0, %v1026_v43, %v1022_v4  ;;  %v1032_v5 = vmul.f32 %v2245_v26, %v1031_v0  ;;  %vm3464_vm8 = vcmp.eq.f32.partialorder %v1053_v40, 8.507059e+37  ;;  %vm1064_vm9 = vweird.f32 %v3433_v55 }
  0xb9   :  { %v2251_v25 = vpop.eup %2250  ;;  %v1056_v17 = vor.u32 1.1754944e-38, %v1055_v47  ;;  %v3475_v38 = vadd.f32 1.0, %v2249_v37  ;;  %2254 = vrcp.f32 %v3460_v23  ;;  %v184_v9 = vmul.f32 %v3031_v8, %v1832_v19 }
  0xba   :  { %v1033_v14 = vadd.f32 %v2245_v26, %v1032_v5  ;;  %v1526_v18 = vmul.f32 %v1027_v13, %v3292_v20  ;;  %v1045_v10 = vmul.f32 %v2251_v25, %v3426_v53  ;;  %vm3483_vm11 = vcmp.eq.f32.partialorder %v1068_v48, 8.507059e+37 }
  0xbb   :  { %v1071_v49 = vor.u32 1.1754944e-38, %v1070_v62  ;;  %v2253_v50 = vpop.eup %2252  ;;  %vm1050_vm12 = vweird.f32 %v2251_v25  ;;  %v1083_v56 = vand.u32 2147483647, %v3460_v23  ;;  %v1085_v58 = vand.u32 2147483648, %v3460_v23 }
  0xbc   :  { %2256 = vrcp.f32 %v3475_v38  ;;  %v1037_v39 = vsel %vm3471_vm10, %v2245_v26, %v1033_v14  ;;  %v1046_v19 = vsub.f32 1.0, %v1045_v10  ;;  %v1060_v20 = vmul.f32 %v2253_v50, %v3433_v55  ;;  %vm3509_vm1 = vmor %vm1049_vm7, %vm1050_vm12 }
  0xbd   :  { %vm1079_vm13 = vweird.f32 %v3460_v23  ;;  %v1042_v35 = vsel %vm3444_vm5, %v1041_v15, %v1037_v39  ;;  %vm1065_vm14 = vweird.f32 %v2253_v50  ;;  %vm1094_vm15 = vweird.f32 %v3475_v38 }
  0xbe   :  { %v1098_v41 = vand.u32 2147483647, %v3475_v38  ;;  %v1527_v43 = vmul.f32 %v1042_v35, %v3295_v31  ;;  %v1047_v52 = vmul.f32 %v2251_v25, %v1046_v19  ;;  %v1061_v12 = vsub.f32 1.0, %v1060_v20  ;;  %vm3526_vm4 = vmor %vm1064_vm9, %vm1065_vm14 }
  0xbf   :  { %vm3499_vm0 = vcmp.eq.f32.partialorder %v1083_v56, 8.507059e+37  ;;  %v2255_v24 = vpop.eup %2254  ;;  %v1086_v60 = vor.u32 1.1754944e-38, %v1085_v58  ;;  %v1100_v31 = vand.u32 2147483648, %v3475_v38  ;;  %v185_v51 = vmul.f32 %v3031_v8, %v1833_v21 }
  0xc0   :  { %v3516_v57 = vadd.f32 %v3058_v42, %v184_v9  ;;  %v1965_v46 = vpack.c.bf16 %v1527_v43, %v1526_v18  ;;  %v1048_v2 = vadd.f32 %v2251_v25, %v1047_v52  ;;  %v1062_v34 = vmul.f32 %v2253_v50, %v1061_v12 }
  0xc1   :  { %v1075_v33 = vmul.f32 %v2255_v24, %v3460_v23  ;;  %vm3519_vm2 = vcmp.eq.f32.partialorder %v1098_v41, 8.507059e+37  ;;  %vm1080_vm3 = vweird.f32 %v2255_v24  ;;  %v3531_v11 = vadd.f32 %v3058_v42, %v185_v51 }
  0xc2   :  { %v2257_v53 = vpop.eup %2256  ;;  %v1728_v29 = vmul.f32 -1.442695, %v3516_v57  ;;  %v1836_v6 = vunpack.c.l.bf16 %v2061_v59  ;;  %2088 = vst [vmem:[%s4294_s3 + $0x80] sm:$0xff] %v1965_v46   ;;  %v1052_v44 = vsel %vm3509_vm1, %v2251_v25, %v1048_v2  ;;  %v1063_v7 = vadd.f32 %v2253_v50, %v1062_v34  ;;  %vm3554_vm6 = vmor %vm1079_vm13, %vm1080_vm3 }
  0xc3   :  { %v1076_v55 = vsub.f32 1.0, %v1075_v33  ;;  %v1090_v15 = vmul.f32 %v2257_v53, %v3475_v38  ;;  %v1057_v40 = vsel %vm3464_vm8, %v1056_v17, %v1052_v44  ;;  %vm1095_vm5 = vweird.f32 %v2257_v53  ;;  %v2063_v38 = vld [vmem:[%s4291_s0 + $0xb0] sm:$0xff]   ;;  %v3616_v33 = vld [vmem:[%s4291_s0 + $0xc0] sm:$0xff]  }
  0xc4   :  { %2258 = vpow2.f32 %v1728_v29  ;;  %v1729_v36 = vmul.f32 -1.442695, %v3531_v11  ;;  %v1067_v47 = vsel %vm3526_vm4, %v2253_v50, %v1063_v7  ;;  %v1528_v30 = vmul.f32 %v1057_v40, %v3354_v22  ;;  %vm3563_vm7 = vmor %vm1094_vm15, %vm1095_vm5 }
  0xc5   :  { %v1077_v0 = vmul.f32 %v2255_v24, %v1076_v55  ;;  %v1091_v48 = vsub.f32 1.0, %v1090_v15  ;;  %v1072_v21 = vsel %vm3483_vm11, %v1071_v49, %v1067_v47  ;;  %v1837_v62 = vunpack.c.h.bf16 %v2061_v59 }
  0xc6   :  { %2260 = vpow2.f32 %v1729_v36  ;;  %v186_v37 = vmul.f32 %v3031_v8, %v1836_v6  ;;  %v1529_v13 = vmul.f32 %v1072_v21, %v3368_v28  ;;  %v1840_v32 = vunpack.c.l.bf16 %v2062_v45 }
  0xc7   :  { %v1078_v5 = vadd.f32 %v2255_v24, %v1077_v0  ;;  %v1092_v22 = vmul.f32 %v2257_v53, %v1091_v48  ;;  %v1101_v23 = vor.u32 1.1754944e-38, %v1100_v31  ;;  %v187_v3 = vmul.f32 %v3031_v8, %v1837_v62 }
  0xc8   :  { %v3569_v17 = vadd.f32 %v3058_v42, %v186_v37  ;;  %v1841_v9 = vunpack.c.h.bf16 %v2062_v45  ;;  %v1970_v14 = vpack.c.bf16 %v1529_v13, %v1528_v30  ;;  %v188_v10 = vmul.f32 %v3031_v8, %v1840_v32 }
  0xc9   :  { %v1082_v28 = vsel %vm3554_vm6, %v2255_v24, %v1078_v5  ;;  %v1093_v18 = vadd.f32 %v2257_v53, %v1092_v22  ;;  %v3580_v50 = vadd.f32 %v3058_v42, %v187_v3  ;;  %v1844_v12 = vunpack.c.l.bf16 %v2063_v38 }
  0xca   :  { %v2259_v63 = vpop.eup %2258  ;;  %v1087_v49 = vsel %vm3499_vm0, %v1086_v60, %v1082_v28  ;;  %v1730_v56 = vmul.f32 -1.442695, %v3569_v17  ;;  %v189_v58 = vmul.f32 %v3031_v8, %v1841_v9  ;;  %2089 = vst [vmem:[%s4294_s3 + $0x88] sm:$0xff] %v1970_v14   ;;  %v3591_v35 = vadd.f32 %v3058_v42, %v188_v10 }
  0xcb   :  { %v1097_v39 = vsel %vm3563_vm7, %v2257_v53, %v1093_v18  ;;  %v1530_v19 = vmul.f32 %v1087_v49, %v3390_v27  ;;  %v508_v20 = vadd.f32 1.0, %v2259_v63  ;;  %v1731_v52 = vmul.f32 -1.442695, %v3580_v50 }
  0xcc   :  { %v2261_v41 = vpop.eup %2260  ;;  %v1102_v43 = vsel %vm3519_vm2, %v1101_v23, %v1097_v39  ;;  %2262 = vpow2.f32 %v1730_v56  ;;  %v3600_v24 = vadd.f32 %v3058_v42, %v189_v58  ;;  %v1732_v60 = vmul.f32 -1.442695, %v3591_v35 }
  0xcd   :  { %v1531_v54 = vmul.f32 %v1102_v43, %v3413_v16  ;;  %v3597_v59 = vadd.f32 1.0, %v2261_v41  ;;  %2264 = vrcp.f32 %v508_v20  ;;  %v1113_v27 = vand.u32 2147483647, %v508_v20  ;;  %v2064_v16 = vld [vmem:[%s4291_s0 + $0xb8] sm:$0xff]  }
  0xce   :  { %v1115_v1 = vand.u32 2147483648, %v508_v20  ;;  %2266 = vpow2.f32 %v1731_v52  ;;  %vm1109_vm8 = vweird.f32 %v508_v20  ;;  %v1733_v2 = vmul.f32 -1.442695, %v3600_v24 }
  0xcf   :  { %v1975_v31 = vpack.c.bf16 %v1531_v54, %v1530_v19  ;;  %2268 = vrcp.f32 %v3597_v59  ;;  %v1128_v51 = vand.u32 2147483647, %v3597_v59  ;;  %v1130_v46 = vand.u32 2147483648, %v3597_v59 }
  0xd0   :  { %2270 = vpow2.f32 %v1732_v60  ;;  %v1845_v34 = vunpack.c.h.bf16 %v2063_v38  ;;  %vm3618_vm9 = vcmp.eq.f32.partialorder %v1113_v27, 8.507059e+37  ;;  %v1116_v26 = vor.u32 1.1754944e-38, %v1115_v1 }
  0xd1   :  { %2090 = vst [vmem:[%s4294_s3 + $0x90] sm:$0xff] %v1975_v31   ;;  %vm1124_vm10 = vweird.f32 %v3597_v59  ;;  %v190_v29 = vmul.f32 %v3031_v8, %v1844_v12  ;;  %2272 = vpow2.f32 %v1733_v2  ;;  %v1848_v7 = vunpack.c.l.bf16 %v2064_v16 }
  0xd2   :  { %v2263_v61 = vpop.eup %2262  ;;  %v1849_v55 = vunpack.c.h.bf16 %v2064_v16  ;;  %vm3626_vm11 = vcmp.eq.f32.partialorder %v1128_v51, 8.507059e+37  ;;  %v1131_v45 = vor.u32 1.1754944e-38, %v1130_v46  ;;  %v1852_v47 = vunpack.c.l.bf16 %v3616_v33 }
  0xd3   :  { %v2265_v6 = vpop.eup %2264  ;;  %v3624_v44 = vadd.f32 1.0, %v2263_v61  ;;  %v191_v48 = vmul.f32 %v3031_v8, %v1845_v34  ;;  %v3640_v5 = vadd.f32 %v3058_v42, %v190_v29  ;;  %v192_v22 = vmul.f32 %v3031_v8, %v1848_v7 }
  0xd4   :  { %v2267_v15 = vpop.eup %2266  ;;  %v1105_v40 = vmul.f32 %v2265_v6, %v508_v20  ;;  %vm1110_vm12 = vweird.f32 %v2265_v6  ;;  %v193_v32 = vmul.f32 %v3031_v8, %v1849_v55 }
  0xd5   :  { %v2269_v30 = vpop.eup %2268  ;;  %v3631_v0 = vadd.f32 1.0, %v2267_v15  ;;  %2274 = vrcp.f32 %v3624_v44  ;;  %v1143_v37 = vand.u32 2147483647, %v3624_v44  ;;  %v1145_v13 = vand.u32 2147483648, %v3624_v44  ;;  %vm3647_vm14 = vmor %vm1109_vm8, %vm1110_vm12 }
  0xd6   :  { %v2271_v21 = vpop.eup %2270  ;;  %v1106_v4 = vsub.f32 1.0, %v1105_v40  ;;  %v1120_v62 = vmul.f32 %v2269_v30, %v3597_v59  ;;  %vm1125_vm13 = vweird.f32 %v2269_v30  ;;  %vm1139_vm15 = vweird.f32 %v3624_v44 }
  0xd7   :  { %2276 = vrcp.f32 %v3631_v0  ;;  %v1158_v3 = vand.u32 2147483647, %v3631_v0  ;;  %v2273_v9 = vpop.eup %2272  ;;  %vm1154_vm0 = vweird.f32 %v3631_v0  ;;  %v1160_v28 = vand.u32 2147483648, %v3631_v0  ;;  %vm3664_vm2 = vmor %vm1124_vm10, %vm1125_vm13 }
  0xd8   :  { %v1107_v25 = vmul.f32 %v2265_v6, %v1106_v4  ;;  %v1121_v23 = vsub.f32 1.0, %v1120_v62  ;;  %v3654_v18 = vadd.f32 1.0, %v2271_v21  ;;  %vm3656_vm1 = vcmp.eq.f32.partialorder %v1143_v37, 8.507059e+37 }
  0xd9   :  { %v1146_v63 = vor.u32 1.1754944e-38, %v1145_v13  ;;  %v3660_v49 = vadd.f32 1.0, %v2273_v9  ;;  %v3671_v19 = vadd.f32 %v3058_v42, %v191_v48  ;;  %v1734_v20 = vmul.f32 -1.442695, %v3640_v5 }
  0xda   :  { %v1108_v8 = vadd.f32 %v2265_v6, %v1107_v25  ;;  %v1122_v10 = vmul.f32 %v2269_v30, %v1121_v23  ;;  %2278 = vrcp.f32 %v3654_v18  ;;  %v1175_v39 = vand.u32 2147483648, %v3654_v18 }
  0xdb   :  { %v2275_v56 = vpop.eup %2274  ;;  %vm3677_vm4 = vcmp.eq.f32.partialorder %v1158_v3, 8.507059e+37  ;;  %v1173_v54 = vand.u32 2147483647, %v3654_v18  ;;  %v1161_v42 = vor.u32 1.1754944e-38, %v1160_v28  ;;  %2280 = vrcp.f32 %v3660_v49 }
  0xdc   :  { %v1112_v41 = vsel %vm3647_vm14, %v2265_v6, %v1108_v8  ;;  %v1123_v43 = vadd.f32 %v2269_v30, %v1122_v10  ;;  %v1135_v52 = vmul.f32 %v2275_v56, %v3624_v44  ;;  %vm1140_vm3 = vweird.f32 %v2275_v56  ;;  %v3710_v6 = vld [vmem:[%s4293_s2] ss:$0 sm:$0xff] }
  0xdd   :  { %v2277_v59 = vpop.eup %2276  ;;  %v1117_v27 = vsel %vm3618_vm9, %v1116_v26, %v1112_v41  ;;  %vm1169_vm6 = vweird.f32 %v3654_v18  ;;  %v1176_v16 = vor.u32 1.1754944e-38, %v1175_v39  ;;  %vm3693_vm7 = vcmp.eq.f32.partialorder %v1173_v54, 8.507059e+37  ;;  %vm3701_vm9 = vmor %vm1139_vm15, %vm1140_vm3  ;;  %v2066_v54 = vld [vmem:[%s4291_s0 + $0xc8] sm:$0xff]  }
  0xde   :  { %v1127_v1 = vsel %vm3664_vm2, %v2269_v30, %v1123_v43  ;;  %v1532_v60 = vmul.f32 %v1117_v27, %v3516_v57  ;;  %v1136_v31 = vsub.f32 1.0, %v1135_v52  ;;  %v1150_v51 = vmul.f32 %v2277_v59, %v3631_v0 }
  0xdf   :  { %v1132_v46 = vsel %vm3626_vm11, %v1131_v45, %v1127_v1  ;;  %vm1155_vm5 = vweird.f32 %v2277_v59  ;;  %vm1184_vm8 = vweird.f32 %v3660_v49  ;;  %v1188_v29 = vand.u32 2147483647, %v3660_v49 }
  0xe0   :  { %v1533_v2 = vmul.f32 %v1132_v46, %v3531_v11  ;;  %v1137_v34 = vmul.f32 %v2275_v56, %v1136_v31  ;;  %v1151_v61 = vsub.f32 1.0, %v1150_v51  ;;  %v2279_v57 = vpop.eup %2278  ;;  %2282 = vpow2.f32 %v1734_v20  ;;  %vm3719_vm10 = vmor %vm1154_vm0, %vm1155_vm5 }
  0xe1   :  { %v1735_v11 = vmul.f32 -1.442695, %v3671_v19  ;;  %v3713_v7 = vadd.f32 %v3710_v6, %v192_v22  ;;  %v1165_v40 = vmul.f32 %v2279_v57, %v3654_v18  ;;  %v2281_v36 = vpop.eup %2280  ;;  %vm1170_vm11 = vweird.f32 %v2279_v57 }
  0xe2   :  { %v1980_v55 = vpack.c.bf16 %v1533_v2, %v1532_v60  ;;  %v1138_v15 = vadd.f32 %v2275_v56, %v1137_v34  ;;  %v1152_v44 = vmul.f32 %v2277_v59, %v1151_v61  ;;  %v1190_v30 = vand.u32 2147483648, %v3660_v49  ;;  %vm3745_vm13 = vmor %vm1169_vm6, %vm1170_vm11 }
  0xe3   :  { %2284 = vpow2.f32 %v1735_v11  ;;  %v3725_v48 = vadd.f32 %v3710_v6, %v193_v32  ;;  %v1166_v0 = vsub.f32 1.0, %v1165_v40  ;;  %v1180_v62 = vmul.f32 %v2281_v36, %v3660_v49 }
  0xe4   :  { %2091 = vst [vmem:[%s4294_s3 + $0x98] sm:$0xff] %v1980_v55   ;;  %v1142_v21 = vsel %vm3701_vm9, %v2275_v56, %v1138_v15  ;;  %v1153_v4 = vadd.f32 %v2277_v59, %v1152_v44  ;;  %vm1185_vm12 = vweird.f32 %v2281_v36  ;;  %v1736_v13 = vmul.f32 -1.442695, %v3713_v7 }
  0xe5   :  { %v1147_v37 = vsel %vm3656_vm1, %v1146_v63, %v1142_v21  ;;  %v1737_v22 = vmul.f32 -1.442695, %v3725_v48  ;;  %v1167_v23 = vmul.f32 %v2279_v57, %v1166_v0  ;;  %v1181_v3 = vsub.f32 1.0, %v1180_v62  ;;  %vm3764_vm14 = vmor %vm1184_vm8, %vm1185_vm12 }
  0xe6   :  { %v1157_v32 = vsel %vm3719_vm10, %v2277_v59, %v1153_v4  ;;  %v1534_v25 = vmul.f32 %v1147_v37, %v3569_v17  ;;  %v2283_v9 = vpop.eup %2282  ;;  %2286 = vpow2.f32 %v1736_v13  ;;  %v1853_v8 = vunpack.c.h.bf16 %v3616_v33  ;;  %v3753_v17 = vld [vmem:[%s4292_s1] ss:$0 sm:$0xff]  ;;  %v3834_v37 = vld [vmem:[%s4291_s0 + $0xd0] sm:$0xff]  }
  0xe7   :  { %v1162_v14 = vsel %vm3677_vm4, %v1161_v42, %v1157_v32  ;;  %v194_v10 = vmul.f32 %v3753_v17, %v1852_v47  ;;  %v1168_v63 = vadd.f32 %v2279_v57, %v1167_v23  ;;  %v1182_v18 = vmul.f32 %v2281_v36, %v1181_v3 }
  0xe8   :  { %v1535_v38 = vmul.f32 %v1162_v14, %v3580_v50  ;;  %v3759_v56 = vadd.f32 1.0, %v2283_v9  ;;  %vm3768_vm15 = vcmp.eq.f32.partialorder %v1188_v29, 8.507059e+37  ;;  %v1191_v33 = vor.u32 1.1754944e-38, %v1190_v30 }
  0xe9   :  { %v2285_v58 = vpop.eup %2284  ;;  %2288 = vpow2.f32 %v1737_v22  ;;  %v1172_v50 = vsel %vm3745_vm13, %v2279_v57, %v1168_v63  ;;  %v1183_v41 = vadd.f32 %v2281_v36, %v1182_v18  ;;  %v195_v52 = vmul.f32 %v3753_v17, %v1853_v8 }
  0xea   :  { %v1985_v47 = vpack.c.bf16 %v1535_v38, %v1534_v25  ;;  %v3774_v43 = vadd.f32 1.0, %v2285_v58  ;;  %v1177_v49 = vsel %vm3693_vm7, %v1176_v16, %v1172_v50  ;;  %2290 = vrcp.f32 %v3759_v56 }
  0xeb   :  { %v3781_v12 = vadd.f32 %v3710_v6, %v194_v10  ;;  %v1187_v59 = vsel %vm3764_vm14, %v2281_v36, %v1183_v41  ;;  %v1536_v27 = vmul.f32 %v1177_v49, %v3591_v35  ;;  %v1203_v42 = vand.u32 2147483647, %v3759_v56 }
  0xec   :  { %2092 = vst [vmem:[%s4294_s3 + $0xa0] sm:$0xff] %v1985_v47   ;;  %2292 = vrcp.f32 %v3774_v43  ;;  %v2287_v1 = vpop.eup %2286  ;;  %v1192_v60 = vsel %vm3768_vm15, %v1191_v33, %v1187_v59  ;;  %v1205_v31 = vand.u32 2147483648, %v3759_v56  ;;  %v1218_v51 = vand.u32 2147483647, %v3774_v43 }
  0xed   :  { %v1537_v46 = vmul.f32 %v1192_v60, %v3600_v24  ;;  %v3799_v16 = vadd.f32 1.0, %v2287_v1  ;;  %v1856_v2 = vunpack.c.l.bf16 %v2066_v54  ;;  %vm1199_vm0 = vweird.f32 %v3759_v56 }
  0xee   :  { %vm1214_vm1 = vweird.f32 %v3774_v43  ;;  %v1220_v35 = vand.u32 2147483648, %v3774_v43  ;;  %v1738_v61 = vmul.f32 -1.442695, %v3781_v12  ;;  %vm3805_vm2 = vcmp.eq.f32.partialorder %v1203_v42, 8.507059e+37 }
  0xef   :  { %v2289_v34 = vpop.eup %2288  ;;  %v1990_v53 = vpack.c.bf16 %v1537_v46, %v1536_v27  ;;  %2294 = vrcp.f32 %v3799_v16  ;;  %v3813_v24 = vadd.f32 %v3710_v6, %v195_v52  ;;  %v1206_v11 = vor.u32 1.1754944e-38, %v1205_v31 }
  0xf0   :  { %v3809_v26 = vadd.f32 1.0, %v2289_v34  ;;  %v2291_v29 = vpop.eup %2290  ;;  %vm3815_vm4 = vcmp.eq.f32.partialorder %v1218_v51, 8.507059e+37  ;;  %v1233_v15 = vand.u32 2147483647, %v3799_v16  ;;  %2296 = vpow2.f32 %v1738_v61 }
  0xf1   :  { %2093 = vst [vmem:[%s4294_s3 + $0xa8] sm:$0xff] %v1990_v53   ;;  %v1195_v40 = vmul.f32 %v2291_v29, %v3759_v56  ;;  %v1235_v36 = vand.u32 2147483648, %v3799_v16  ;;  %v1857_v45 = vunpack.c.h.bf16 %v2066_v54  ;;  %vm1200_vm3 = vweird.f32 %v2291_v29 }
  0xf2   :  { %v2293_v44 = vpop.eup %2292  ;;  %2298 = vrcp.f32 %v3809_v26  ;;  %v1221_v21 = vor.u32 1.1754944e-38, %v1220_v35  ;;  %vm1229_vm5 = vweird.f32 %v3799_v16  ;;  %vm1244_vm6 = vweird.f32 %v3809_v26  ;;  %vm3845_vm9 = vmor %vm1199_vm0, %vm1200_vm3 }
  0xf3   :  { %v1210_v30 = vmul.f32 %v2293_v44, %v3774_v43  ;;  %v1196_v4 = vsub.f32 1.0, %v1195_v40  ;;  %v1248_v0 = vand.u32 2147483647, %v3809_v26  ;;  %v1739_v62 = vmul.f32 -1.442695, %v3813_v24 }
  0xf4   :  { %vm1215_vm7 = vweird.f32 %v2293_v44  ;;  %vm3836_vm8 = vcmp.eq.f32.partialorder %v1233_v15, 8.507059e+37  ;;  %v196_v32 = vmul.f32 %v3753_v17, %v1856_v2  ;;  %v1236_v3 = vor.u32 1.1754944e-38, %v1235_v36 }
  0xf5   :  { %v1211_v13 = vsub.f32 1.0, %v1210_v30  ;;  %v2295_v25 = vpop.eup %2294  ;;  %v1197_v23 = vmul.f32 %v2291_v29, %v1196_v4  ;;  %2300 = vpow2.f32 %v1739_v62  ;;  %v197_v9 = vmul.f32 %v3753_v17, %v1857_v45  ;;  %vm3855_vm10 = vmor %vm1214_vm1, %vm1215_vm7  ;;  %v2068_v4 = vld [vmem:[%s4291_s0 + $0xd8] sm:$0xff]  }
  0xf6   :  { %v2297_v14 = vpop.eup %2296  ;;  %v1225_v10 = vmul.f32 %v2295_v25, %v3799_v16  ;;  %v1250_v38 = vand.u32 2147483648, %v3809_v26  ;;  %v1860_v63 = vunpack.c.l.bf16 %v3834_v37  ;;  %vm1230_vm11 = vweird.f32 %v2295_v25 }
  0xf7   :  { %v1212_v8 = vmul.f32 %v2293_v44, %v1211_v13  ;;  %v1198_v58 = vadd.f32 %v2291_v29, %v1197_v23  ;;  %vm3859_vm12 = vcmp.eq.f32.partialorder %v1248_v0, 8.507059e+37  ;;  %v518_v20 = vadd.f32 1.0, %v2297_v14  ;;  %vm3882_vm14 = vmor %vm1229_vm5, %vm1230_vm11 }
  0xf8   :  { %v2299_v18 = vpop.eup %2298  ;;  %v1226_v47 = vsub.f32 1.0, %v1225_v10  ;;  %v3865_v41 = vadd.f32 %v3710_v6, %v196_v32  ;;  %v3870_v49 = vadd.f32 %v3710_v6, %v197_v9  ;;  %v1251_v16 = vor.u32 1.1754944e-38, %v1250_v38 }
  0xf9   :  { %v1213_v33 = vadd.f32 %v2293_v44, %v1212_v8  ;;  %v1240_v50 = vmul.f32 %v2299_v18, %v3809_v26  ;;  %v1202_v43 = vsel %vm3845_vm9, %v2291_v29, %v1198_v58  ;;  %vm1245_vm13 = vweird.f32 %v2299_v18 }
  0xfa   :  { %2302 = vrcp.f32 %v518_v20  ;;  %v1207_v52 = vsel %vm3805_vm2, %v1206_v11, %v1202_v43  ;;  %v1227_v59 = vmul.f32 %v2295_v25, %v1226_v47  ;;  %v1263_v51 = vand.u32 2147483647, %v518_v20  ;;  %vm3892_vm15 = vmor %vm1244_vm6, %vm1245_vm13 }
  0xfb   :  { %v1217_v54 = vsel %vm3855_vm10, %v2293_v44, %v1213_v33  ;;  %v1241_v27 = vsub.f32 1.0, %v1240_v50  ;;  %v2301_v42 = vpop.eup %2300  ;;  %v1538_v60 = vmul.f32 %v1207_v52, %v3640_v5  ;;  %v1265_v46 = vand.u32 2147483648, %v518_v20 }
  0xfc   :  { %v1222_v1 = vsel %vm3815_vm4, %v1221_v21, %v1217_v54  ;;  %v1228_v34 = vadd.f32 %v2295_v25, %v1227_v59  ;;  %v3887_v61 = vadd.f32 1.0, %v2301_v42  ;;  %v1740_v53 = vmul.f32 -1.442695, %v3865_v41 }
  0xfd   :  { %v1539_v2 = vmul.f32 %v1222_v1, %v3671_v19  ;;  %v1242_v35 = vmul.f32 %v2299_v18, %v1241_v27  ;;  %v1741_v57 = vmul.f32 -1.442695, %v3870_v49  ;;  %v1861_v29 = vunpack.c.h.bf16 %v3834_v37 }
  0xfe   :  { %v1232_v19 = vsel %vm3882_vm14, %v2295_v25, %v1228_v34  ;;  %2304 = vrcp.f32 %v3887_v61  ;;  %vm1259_vm0 = vweird.f32 %v518_v20  ;;  %vm3904_vm1 = vcmp.eq.f32.partialorder %v1263_v51, 8.507059e+37 }
  0xff   :  { %v1995_v11 = vpack.c.bf16 %v1539_v2, %v1538_v60  ;;  %v1243_v55 = vadd.f32 %v2299_v18, %v1242_v35  ;;  %v1237_v26 = vsel %vm3836_vm8, %v1236_v3, %v1232_v19  ;;  %v198_v40 = vmul.f32 %v3753_v17, %v1860_v63 }
 0x100   :  { %v2303_v15 = vpop.eup %2302  ;;  %v1540_v45 = vmul.f32 %v1237_v26, %v3713_v7  ;;  %v1266_v21 = vor.u32 1.1754944e-38, %v1265_v46  ;;  %vm1274_vm4 = vweird.f32 %v3887_v61  ;;  %2306 = vpow2.f32 %v1740_v53  ;;  %v2069_v7 = vld [vmem:[%s4291_s0 + $0xe0] sm:$0xff]  }
 0x101   :  { %2094 = vst [vmem:[%s4294_s3 + $0xb0] sm:$0xff] %v1995_v11   ;;  %v1247_v36 = vsel %vm3892_vm15, %v2299_v18, %v1243_v55  ;;  %v1255_v30 = vmul.f32 %v2303_v15, %v518_v20  ;;  %vm1260_vm2 = vweird.f32 %v2303_v15  ;;  %2308 = vpow2.f32 %v1741_v57 }
 0x102   :  { %v1252_v0 = vsel %vm3859_vm12, %v1251_v16, %v1247_v36  ;;  %v199_v13 = vmul.f32 %v3753_v17, %v1861_v29  ;;  %v1278_v22 = vand.u32 2147483647, %v3887_v61  ;;  %v3928_v32 = vadd.f32 %v3710_v6, %v198_v40  ;;  %vm3936_vm3 = vmor %vm1259_vm0, %vm1260_vm2 }
 0x103   :  { %v1541_v62 = vmul.f32 %v1252_v0, %v3725_v48  ;;  %v1256_v37 = vsub.f32 1.0, %v1255_v30  ;;  %v1864_v25 = vunpack.c.l.bf16 %v2068_v4  ;;  %v1865_v23 = vunpack.c.h.bf16 %v2068_v4 }
 0x104   :  { %v2305_v3 = vpop.eup %2304  ;;  %v1280_v48 = vand.u32 2147483648, %v3887_v61  ;;  %v3932_v28 = vadd.f32 %v3710_v6, %v199_v13  ;;  %v1742_v38 = vmul.f32 -1.442695, %v3928_v32  ;;  %v1868_v18 = vunpack.c.l.bf16 %v2069_v7 }
 0x105   :  { %v2000_v9 = vpack.c.bf16 %v1541_v62, %v1540_v45  ;;  %v1257_v14 = vmul.f32 %v2303_v15, %v1256_v37  ;;  %v1270_v10 = vmul.f32 %v2305_v3, %v3887_v61  ;;  %v200_v63 = vmul.f32 %v3753_v17, %v1864_v25 }
 0x106   :  { %v1743_v39 = vmul.f32 -1.442695, %v3932_v28  ;;  %v201_v56 = vmul.f32 %v3753_v17, %v1865_v23  ;;  %v1869_v20 = vunpack.c.h.bf16 %v2069_v7  ;;  %v2307_v33 = vpop.eup %2306  ;;  %vm1275_vm5 = vweird.f32 %v2305_v3 }
 0x107   :  { %2095 = vst [vmem:[%s4294_s3 + $0xb8] sm:$0xff] %v2000_v9   ;;  %v1258_v58 = vadd.f32 %v2303_v15, %v1257_v14  ;;  %v1271_v47 = vsub.f32 1.0, %v1270_v10  ;;  %2310 = vpow2.f32 %v1742_v38  ;;  %v3949_v50 = vadd.f32 %v3710_v6, %v200_v63  ;;  %v2309_v43 = vpop.eup %2308  ;;  %vm3965_vm6 = vmor %vm1274_vm4, %vm1275_vm5  ;;  %v4025_v10 = vld [vmem:[%s4291_s0 + $0xe8] sm:$0xff]  }
 0x108   :  { %v3953_v54 = vadd.f32 1.0, %v2307_v33  ;;  %2312 = vpow2.f32 %v1743_v39  ;;  %v3956_v59 = vadd.f32 %v3710_v6, %v201_v56  ;;  %v3960_v1 = vadd.f32 1.0, %v2309_v43 }
 0x109   :  { %v1262_v52 = vsel %vm3936_vm3, %v2303_v15, %v1258_v58  ;;  %v1272_v42 = vmul.f32 %v2305_v3, %v1271_v47  ;;  %v1744_v60 = vmul.f32 -1.442695, %v3949_v50  ;;  %vm3969_vm7 = vcmp.eq.f32.partialorder %v1278_v22, 8.507059e+37 }
 0x10a   :  { %v1267_v27 = vsel %vm3904_vm1, %v1266_v21, %v1262_v52  ;;  %v1281_v46 = vor.u32 1.1754944e-38, %v1280_v48  ;;  %2314 = vrcp.f32 %v3953_v54  ;;  %v1293_v34 = vand.u32 2147483647, %v3953_v54 }
 0x10b   :  { %v1273_v2 = vadd.f32 %v2305_v3, %v1272_v42  ;;  %v1295_v35 = vand.u32 2147483648, %v3953_v54  ;;  %2316 = vrcp.f32 %v3960_v1  ;;  %v1542_v61 = vmul.f32 %v1267_v27, %v3781_v12 }
 0x10c   :  { %2318 = vpow2.f32 %v1744_v60  ;;  %v202_v5 = vmul.f32 %v3753_v17, %v1868_v18  ;;  %v203_v16 = vmul.f32 %v3753_v17, %v1869_v20  ;;  %vm1289_vm8 = vweird.f32 %v3953_v54 }
 0x10d   :  { %v2311_v53 = vpop.eup %2310  ;;  %v1277_v57 = vsel %vm3965_vm6, %v2305_v3, %v1273_v2  ;;  %vm1304_vm9 = vweird.f32 %v3960_v1  ;;  %v1745_v29 = vmul.f32 -1.442695, %v3956_v59  ;;  %v1308_v12 = vand.u32 2147483647, %v3960_v1 }
 0x10e   :  { %v2313_v11 = vpop.eup %2312  ;;  %v1282_v19 = vsel %vm3969_vm7, %v1281_v46, %v1277_v57  ;;  %v1310_v55 = vand.u32 2147483648, %v3960_v1  ;;  %v3989_v15 = vadd.f32 1.0, %v2311_v53  ;;  %vm3992_vm10 = vcmp.eq.f32.partialorder %v1293_v34, 8.507059e+37 }
 0x10f   :  { %v1543_v26 = vmul.f32 %v1282_v19, %v3813_v24  ;;  %v1296_v40 = vor.u32 1.1754944e-38, %v1295_v35  ;;  %v3996_v36 = vadd.f32 1.0, %v2313_v11  ;;  %2320 = vpow2.f32 %v1745_v29 }
 0x110   :  { %v2315_v45 = vpop.eup %2314  ;;  %2322 = vrcp.f32 %v3989_v15  ;;  %v1325_v30 = vand.u32 2147483648, %v3989_v15  ;;  %v4001_v21 = vadd.f32 %v3710_v6, %v202_v5  ;;  %v4004_v4 = vadd.f32 %v3710_v6, %v203_v16 }
 0x111   :  { %v2317_v24 = vpop.eup %2316  ;;  %v2005_v0 = vpack.c.bf16 %v1543_v26, %v1542_v61  ;;  %v1285_v62 = vmul.f32 %v2315_v45, %v3953_v54  ;;  %v1323_v37 = vand.u32 2147483647, %v3989_v15  ;;  %2324 = vrcp.f32 %v3996_v36 }
 0x112   :  { %v2319_v13 = vpop.eup %2318  ;;  %v1300_v7 = vmul.f32 %v2317_v24, %v3960_v1  ;;  %vm4010_vm11 = vcmp.eq.f32.partialorder %v1308_v12, 8.507059e+37  ;;  %v1311_v25 = vor.u32 1.1754944e-38, %v1310_v55  ;;  %vm1319_vm12 = vweird.f32 %v3989_v15 }
 0x113   :  { %2096 = vst [vmem:[%s4294_s3 + $0xc0] sm:$0xff] %v2005_v0   ;;  %v1286_v23 = vsub.f32 1.0, %v1285_v62  ;;  %vm1290_vm13 = vweird.f32 %v2315_v45  ;;  %v1338_v3 = vand.u32 2147483647, %v3996_v36  ;;  %v1340_v9 = vand.u32 2147483648, %v3996_v36 }
 0x114   :  { %v1301_v14 = vsub.f32 1.0, %v1300_v7  ;;  %vm1305_vm14 = vweird.f32 %v2317_v24  ;;  %v1326_v48 = vor.u32 1.1754944e-38, %v1325_v30  ;;  %v4020_v8 = vadd.f32 1.0, %v2319_v13  ;;  %vm4037_vm1 = vmor %vm1289_vm8, %vm1290_vm13 }
 0x115   :  { %v2321_v38 = vpop.eup %2320  ;;  %v1287_v63 = vmul.f32 %v2315_v45, %v1286_v23  ;;  %vm4027_vm15 = vcmp.eq.f32.partialorder %v1323_v37, 8.507059e+37  ;;  %vm1334_vm0 = vweird.f32 %v3996_v36  ;;  %v1746_v58 = vmul.f32 -1.442695, %v4001_v21  ;;  %vm4051_vm4 = vmor %vm1304_vm9, %vm1305_vm14 }
 0x116   :  { %v1747_v39 = vmul.f32 -1.442695, %v4004_v4  ;;  %v2323_v56 = vpop.eup %2322  ;;  %v1302_v33 = vmul.f32 %v2317_v24, %v1301_v14  ;;  %vm4041_vm2 = vcmp.eq.f32.partialorder %v1338_v3, 8.507059e+37  ;;  %v4045_v43 = vadd.f32 1.0, %v2321_v38 }
 0x117   :  { %2326 = vrcp.f32 %v4020_v8  ;;  %v2325_v52 = vpop.eup %2324  ;;  %v1288_v27 = vadd.f32 %v2315_v45, %v1287_v63  ;;  %v1315_v42 = vmul.f32 %v2323_v56, %v3989_v15  ;;  %v1341_v60 = vor.u32 1.1754944e-38, %v1340_v9 }
 0x118   :  { %v1872_v31 = vunpack.c.l.bf16 %v4025_v10  ;;  %v1303_v51 = vadd.f32 %v2317_v24, %v1302_v33  ;;  %v1330_v46 = vmul.f32 %v2325_v52, %v3996_v36  ;;  %v1353_v2 = vand.u32 2147483647, %v4020_v8 }
 0x119   :  { %v1355_v34 = vand.u32 2147483648, %v4020_v8  ;;  %v1292_v35 = vsel %vm4037_vm1, %v2315_v45, %v1288_v27  ;;  %v1316_v1 = vsub.f32 1.0, %v1315_v42  ;;  %vm1320_vm3 = vweird.f32 %v2323_v56 }
 0x11a   :  { %2328 = vrcp.f32 %v4045_v43  ;;  %v1297_v61 = vsel %vm3992_vm10, %v1296_v40, %v1292_v35  ;;  %v1307_v5 = vsel %vm4051_vm4, %v2317_v24, %v1303_v51  ;;  %v1331_v16 = vsub.f32 1.0, %v1330_v46  ;;  %vm4074_vm7 = vmor %vm1319_vm12, %vm1320_vm3 }
 0x11b   :  { %vm1335_vm5 = vweird.f32 %v2325_v52  ;;  %v1312_v53 = vsel %vm4010_vm11, %v1311_v25, %v1307_v5  ;;  %v1544_v57 = vmul.f32 %v1297_v61, %v3865_v41  ;;  %v1317_v29 = vmul.f32 %v2323_v56, %v1316_v1  ;;  %v2071_v25 = vld [vmem:[%s4291_s0 + $0xf0] sm:$0xff]  }
 0x11c   :  { %vm1349_vm6 = vweird.f32 %v4020_v8  ;;  %v1545_v19 = vmul.f32 %v1312_v53, %v3870_v49  ;;  %v1332_v55 = vmul.f32 %v2325_v52, %v1331_v16  ;;  %vm4078_vm8 = vcmp.eq.f32.partialorder %v1353_v2, 8.507059e+37  ;;  %vm4084_vm9 = vmor %vm1334_vm0, %vm1335_vm5 }
 0x11d   :  { %v2327_v11 = vpop.eup %2326  ;;  %v1356_v44 = vor.u32 1.1754944e-38, %v1355_v34  ;;  %v1318_v40 = vadd.f32 %v2323_v56, %v1317_v29  ;;  %vm1364_vm10 = vweird.f32 %v4045_v43  ;;  %2330 = vpow2.f32 %v1746_v58 }
 0x11e   :  { %v1345_v49 = vmul.f32 %v2327_v11, %v4020_v8  ;;  %v2010_v15 = vpack.c.bf16 %v1545_v19, %v1544_v57  ;;  %v1333_v45 = vadd.f32 %v2325_v52, %v1332_v55  ;;  %vm1350_vm11 = vweird.f32 %v2327_v11 }
 0x11f   :  { %v1368_v30 = vand.u32 2147483647, %v4045_v43  ;;  %v1322_v0 = vsel %vm4074_vm7, %v2323_v56, %v1318_v40  ;;  %2332 = vpow2.f32 %v1747_v39  ;;  %v1873_v36 = vunpack.c.h.bf16 %v4025_v10  ;;  %vm4114_vm12 = vmor %vm1349_vm6, %vm1350_vm11 }
 0x120   :  { %v2329_v24 = vpop.eup %2328  ;;  %v1346_v62 = vsub.f32 1.0, %v1345_v49  ;;  %2097 = vst [vmem:[%s4294_s3 + $0xc8] sm:$0xff] %v2010_v15   ;;  %v1327_v37 = vsel %vm4027_vm15, %v1326_v48, %v1322_v0  ;;  %v1337_v13 = vsel %vm4084_vm9, %v2325_v52, %v1333_v45  ;;  %v1370_v22 = vand.u32 2147483648, %v4045_v43 }
 0x121   :  { %v1360_v7 = vmul.f32 %v2329_v24, %v4045_v43  ;;  %v1342_v23 = vsel %vm4041_vm2, %v1341_v60, %v1337_v13  ;;  %v1546_v3 = vmul.f32 %v1327_v37, %v3928_v32  ;;  %v204_v14 = vmul.f32 %v3753_v17, %v1872_v31  ;;  %v2072_v31 = vld [vmem:[%s4291_s0 + $0xf8] sm:$0xff]  }
 0x122   :  { %v1347_v9 = vmul.f32 %v2327_v11, %v1346_v62  ;;  %v1547_v48 = vmul.f32 %v1342_v23, %v3932_v28  ;;  %vm1365_vm13 = vweird.f32 %v2329_v24  ;;  %v205_v63 = vmul.f32 %v3753_v17, %v1873_v36 }
 0x123   :  { %v1361_v38 = vsub.f32 1.0, %v1360_v7  ;;  %v2331_v18 = vpop.eup %2330  ;;  %v4120_v32 = vadd.f32 %v3710_v6, %v204_v14  ;;  %v1876_v39 = vunpack.c.l.bf16 %v2071_v25  ;;  %v1877_v56 = vunpack.c.h.bf16 %v2071_v25  ;;  %vm4130_vm15 = vmor %vm1364_vm10, %vm1365_vm13 }
 0x124   :  { %v1348_v58 = vadd.f32 %v2327_v11, %v1347_v9  ;;  %v2015_v20 = vpack.c.bf16 %v1547_v48, %v1546_v3  ;;  %vm4122_vm14 = vcmp.eq.f32.partialorder %v1368_v30, 8.507059e+37  ;;  %v526_v8 = vadd.f32 1.0, %v2331_v18 }
 0x125   :  { %v1362_v28 = vmul.f32 %v2329_v24, %v1361_v38  ;;  %v2333_v47 = vpop.eup %2332  ;;  %v1371_v54 = vor.u32 1.1754944e-38, %v1370_v22  ;;  %v4135_v42 = vadd.f32 %v3710_v6, %v205_v63  ;;  %v1748_v60 = vmul.f32 -1.442695, %v4120_v32 }
 0x126   :  { %v1352_v52 = vsel %vm4114_vm12, %v2327_v11, %v1348_v58  ;;  %2098 = vst [vmem:[%s4294_s3 + $0xd0] sm:$0xff] %v2015_v20   ;;  %v527_v46 = vadd.f32 1.0, %v2333_v47  ;;  %2334 = vrcp.f32 %v526_v8  ;;  %v206_v2 = vmul.f32 %v3753_v17, %v1876_v39 }
 0x127   :  { %v1357_v43 = vsel %vm4078_vm8, %v1356_v44, %v1352_v52  ;;  %v1363_v51 = vadd.f32 %v2329_v24, %v1362_v28  ;;  %v207_v34 = vmul.f32 %v3753_v17, %v1877_v56  ;;  %v1880_v61 = vunpack.c.l.bf16 %v2072_v31 }
 0x128   :  { %v1548_v1 = vmul.f32 %v1357_v43, %v3949_v50  ;;  %2336 = vrcp.f32 %v527_v46  ;;  %v1749_v53 = vmul.f32 -1.442695, %v4135_v42  ;;  %vm1379_vm0 = vweird.f32 %v526_v8 }
 0x129   :  { %v1367_v35 = vsel %vm4130_vm15, %v2329_v24, %v1363_v51  ;;  %2338 = vpow2.f32 %v1748_v60  ;;  %v4156_v57 = vadd.f32 %v3710_v6, %v206_v2  ;;  %v4159_v29 = vadd.f32 %v3710_v6, %v207_v34 }
 0x12a   :  { %v1372_v5 = vsel %vm4122_vm14, %v1371_v54, %v1367_v35  ;;  %v1881_v11 = vunpack.c.h.bf16 %v2072_v31  ;;  %v1383_v12 = vand.u32 2147483647, %v526_v8  ;;  %2340 = vpow2.f32 %v1749_v53 }
 0x12b   :  { %v1549_v16 = vmul.f32 %v1372_v5, %v3956_v59  ;;  %v208_v55 = vmul.f32 %v3753_v17, %v1880_v61  ;;  %v1385_v44 = vand.u32 2147483648, %v526_v8  ;;  %v1750_v59 = vmul.f32 -1.442695, %v4156_v57 }
 0x12c   :  { %v2335_v19 = vpop.eup %2334  ;;  %v1751_v40 = vmul.f32 -1.442695, %v4159_v29  ;;  %vm1394_vm1 = vweird.f32 %v527_v46  ;;  %v1398_v49 = vand.u32 2147483647, %v527_v46  ;;  %v209_v15 = vmul.f32 %v3753_v17, %v1881_v11 }
 0x12d   :  { %v2020_v50 = vpack.c.bf16 %v1549_v16, %v1548_v1  ;;  %v1375_v26 = vmul.f32 %v2335_v19, %v526_v8  ;;  %v4169_v45 = vadd.f32 %v3710_v6, %v208_v55  ;;  %vm1380_vm2 = vweird.f32 %v2335_v19 }
 0x12e   :  { %v2337_v41 = vpop.eup %2336  ;;  %2342 = vpow2.f32 %v1750_v59  ;;  %v1400_v62 = vand.u32 2147483648, %v527_v46  ;;  %v4172_v36 = vadd.f32 %v3710_v6, %v209_v15  ;;  %vm4176_vm3 = vmor %vm1379_vm0, %vm1380_vm2  ;;  %vm4180_vm5 = vcmp.eq.f32.partialorder %v1383_v12, 8.507059e+37 }
 0x12f   :  { %2099 = vst [vmem:[%s4294_s3 + $0xd8] sm:$0xff] %v2020_v50   ;;  %v1376_v30 = vsub.f32 1.0, %v1375_v26  ;;  %v1390_v24 = vmul.f32 %v2337_v41, %v527_v46  ;;  %v2339_v0 = vpop.eup %2338  ;;  %2344 = vpow2.f32 %v1751_v40  ;;  %v1752_v37 = vmul.f32 -1.442695, %v4169_v45 }
 0x130   :  { %vm1395_vm4 = vweird.f32 %v2337_v41  ;;  %v528_v22 = vadd.f32 1.0, %v2339_v0  ;;  %v2341_v17 = vpop.eup %2340  ;;  %v1386_v3 = vor.u32 1.1754944e-38, %v1385_v44  ;;  %v1753_v6 = vmul.f32 -1.442695, %v4172_v36 }
 0x131   :  { %v1377_v13 = vmul.f32 %v2335_v19, %v1376_v30  ;;  %v1391_v7 = vsub.f32 1.0, %v1390_v24  ;;  %2346 = vpow2.f32 %v1752_v37  ;;  %v529_v48 = vadd.f32 1.0, %v2341_v17  ;;  %vm1396_vm6 = vmor %vm1394_vm1, %vm1395_vm4 }
 0x132   :  { %2348 = vrcp.f32 %v528_v22  ;;  %v1401_v10 = vor.u32 1.1754944e-38, %v1400_v62  ;;  %vm1399_vm7 = vcmp.eq.f32.partialorder %v1398_v49, 8.507059e+37  ;;  %v1413_v47 = vand.u32 2147483647, %v528_v22 }
 0x133   :  { %v1378_v9 = vadd.f32 %v2335_v19, %v1377_v13  ;;  %v1392_v14 = vmul.f32 %v2337_v41, %v1391_v7  ;;  %2350 = vpow2.f32 %v1753_v6  ;;  %v1415_v60 = vand.u32 2147483648, %v528_v22 }
 0x134   :  { %v2343_v38 = vpop.eup %2342  ;;  %2352 = vrcp.f32 %v529_v48  ;;  %v1428_v31 = vand.u32 2147483647, %v529_v48  ;;  %vm1409_vm8 = vweird.f32 %v528_v22  ;;  %v1430_v34 = vand.u32 2147483648, %v529_v48 }
 0x135   :  { %v1382_v63 = vsel %vm4176_vm3, %v2335_v19, %v1378_v9  ;;  %v1393_v18 = vadd.f32 %v2337_v41, %v1392_v14  ;;  %v2345_v58 = vpop.eup %2344  ;;  %v530_v28 = vadd.f32 1.0, %v2343_v38  ;;  %vm1424_vm10 = vweird.f32 %v529_v48 }
 0x136   :  { %v1387_v39 = vsel %vm4180_vm5, %v1386_v3, %v1382_v63  ;;  %v4191_v52 = vadd.f32 1.0, %v2345_v58  ;;  %vm4198_vm11 = vcmp.eq.f32.partialorder %v1413_v47, 8.507059e+37  ;;  %v1416_v1 = vor.u32 1.1754944e-38, %v1415_v60 }
 0x137   :  { %v1397_v56 = vsel %vm1396_vm6, %v2337_v41, %v1393_v18  ;;  %v1550_v20 = vmul.f32 %v1387_v39, %v4001_v21  ;;  %v2347_v33 = vpop.eup %2346  ;;  %2354 = vrcp.f32 %v530_v28  ;;  %vm4202_vm12 = vcmp.eq.f32.partialorder %v1428_v31, 8.507059e+37 }
 0x138   :  { %v1402_v8 = vsel %vm1399_vm7, %v1401_v10, %v1397_v56  ;;  %v2349_v27 = vpop.eup %2348  ;;  %2356 = vrcp.f32 %v4191_v52  ;;  %v4206_v5 = vadd.f32 1.0, %v2347_v33  ;;  %v1431_v12 = vor.u32 1.1754944e-38, %v1430_v34 }
 0x139   :  { %v1551_v54 = vmul.f32 %v1402_v8, %v4004_v4  ;;  %v2351_v43 = vpop.eup %2350  ;;  %v1405_v51 = vmul.f32 %v2349_v27, %v528_v22  ;;  %vm1410_vm9 = vweird.f32 %v2349_v27  ;;  %vm1439_vm15 = vweird.f32 %v530_v28 }
 0x13a   :  { %v2353_v46 = vpop.eup %2352  ;;  %v4208_v11 = vadd.f32 1.0, %v2351_v43  ;;  %vm4211_vm14 = vmor %vm1409_vm8, %vm1410_vm9  ;;  %v1443_v55 = vand.u32 2147483647, %v530_v28  ;;  %2358 = vrcp.f32 %v4206_v5  ;;  %v1445_v40 = vand.u32 2147483648, %v530_v28 }
 0x13b   :  { %v2025_v2 = vpack.c.bf16 %v1551_v54, %v1550_v20  ;;  %v1406_v21 = vsub.f32 1.0, %v1405_v51  ;;  %v1420_v35 = vmul.f32 %v2353_v46, %v529_v48  ;;  %vm1425_vm13 = vweird.f32 %v2353_v46 }
 0x13c   :  { %vm4217_vm0 = vmor %vm1424_vm10, %vm1425_vm13  ;;  %vm1454_vm2 = vweird.f32 %v4191_v52  ;;  %v1458_v15 = vand.u32 2147483647, %v4191_v52  ;;  %2360 = vrcp.f32 %v4208_v11  ;;  %vm4229_vm4 = vcmp.eq.f32.partialorder %v1443_v55, 8.507059e+37 }
 0x13d   :  { %2100 = vst [vmem:[%s4294_s3 + $0xe0] sm:$0xff] %v2025_v2   ;;  %v1407_v16 = vmul.f32 %v2349_v27, %v1406_v21  ;;  %v1421_v53 = vsub.f32 1.0, %v1420_v35  ;;  %v2355_v19 = vpop.eup %2354  ;;  %v1460_v7 = vand.u32 2147483648, %v4191_v52  ;;  %v1446_v14 = vor.u32 1.1754944e-38, %v1445_v40 }
 0x13e   :  { %v1435_v59 = vmul.f32 %v2355_v19, %v530_v28  ;;  %v2357_v41 = vpop.eup %2356  ;;  %vm1440_vm1 = vweird.f32 %v2355_v19  ;;  %vm4245_vm6 = vcmp.eq.f32.partialorder %v1458_v15, 8.507059e+37  ;;  %v1475_v10 = vand.u32 2147483648, %v4206_v5 }
 0x13f   :  { %v1408_v26 = vadd.f32 %v2349_v27, %v1407_v16  ;;  %v1422_v44 = vmul.f32 %v2353_v46, %v1421_v53  ;;  %v1450_v62 = vmul.f32 %v2357_v41, %v4191_v52  ;;  %vm1455_vm3 = vweird.f32 %v2357_v41  ;;  %vm4241_vm5 = vmor %vm1439_vm15, %vm1440_vm1 }
 0x140   :  { %v1436_v0 = vsub.f32 1.0, %v1435_v59  ;;  %v2359_v3 = vpop.eup %2358  ;;  %vm4255_vm7 = vmor %vm1454_vm2, %vm1455_vm3  ;;  %v1461_v56 = vor.u32 1.1754944e-38, %v1460_v7  ;;  %vm1469_vm8 = vweird.f32 %v4206_v5  ;;  %v1473_v20 = vand.u32 2147483647, %v4206_v5 }
 0x141   :  { %v1412_v30 = vsel %vm4211_vm14, %v2349_v27, %v1408_v26  ;;  %v1423_v24 = vadd.f32 %v2353_v46, %v1422_v44  ;;  %v1451_v23 = vsub.f32 1.0, %v1450_v62  ;;  %v1465_v18 = vmul.f32 %v2359_v3, %v4206_v5 }
 0x142   :  { %v1417_v37 = vsel %vm4198_vm11, %v1416_v1, %v1412_v30  ;;  %v1437_v25 = vmul.f32 %v2355_v19, %v1436_v0  ;;  %v2361_v58 = vpop.eup %2360  ;;  %vm1470_vm9 = vweird.f32 %v2359_v3  ;;  %v1476_v52 = vor.u32 1.1754944e-38, %v1475_v10 }
 0x143   :  { %v1427_v22 = vsel %vm4217_vm0, %v2353_v46, %v1423_v24  ;;  %v1552_v17 = vmul.f32 %v1417_v37, %v4120_v32  ;;  %v1452_v63 = vmul.f32 %v2357_v41, %v1451_v23  ;;  %v1466_v8 = vsub.f32 1.0, %v1465_v18  ;;  %vm1471_vm11 = vmor %vm1469_vm8, %vm1470_vm9 }
 0x144   :  { %v1432_v6 = vsel %vm4202_vm12, %v1431_v12, %v1427_v22  ;;  %v1438_v38 = vadd.f32 %v2355_v19, %v1437_v25  ;;  %v1480_v27 = vmul.f32 %v2361_v58, %v4208_v11  ;;  %vm1484_vm10 = vweird.f32 %v4208_v11 }
 0x145   :  { %v1553_v32 = vmul.f32 %v1432_v6, %v4135_v42  ;;  %v1453_v33 = vadd.f32 %v2357_v41, %v1452_v63  ;;  %v1467_v31 = vmul.f32 %v2359_v3, %v1466_v8  ;;  %v1490_v43 = vand.u32 2147483648, %v4208_v11 }
 0x146   :  { %v1442_v42 = vsel %vm4241_vm5, %v2355_v19, %v1438_v38  ;;  %v1481_v46 = vsub.f32 1.0, %v1480_v27  ;;  %vm1485_vm12 = vweird.f32 %v2361_v58  ;;  %v1488_v2 = vand.u32 2147483647, %v4208_v11 }
 0x147   :  { %v2030_v28 = vpack.c.bf16 %v1553_v32, %v1552_v17  ;;  %v1447_v47 = vsel %vm4229_vm4, %v1446_v14, %v1442_v42  ;;  %v1457_v54 = vsel %vm4255_vm7, %v2357_v41, %v1453_v33  ;;  %v1468_v21 = vadd.f32 %v2359_v3, %v1467_v31  ;;  %vm1486_vm14 = vmor %vm1484_vm10, %vm1485_vm12 }
 0x148   :  { %v1554_v60 = vmul.f32 %v1447_v47, %v4156_v57  ;;  %v1462_v51 = vsel %vm4245_vm6, %v1461_v56, %v1457_v54  ;;  %vm1474_vm13 = vcmp.eq.f32.partialorder %v1473_v20, 8.507059e+37  ;;  %v1482_v35 = vmul.f32 %v2361_v58, %v1481_v46 }
 0x149   :  { %2101 = vst [vmem:[%s4294_s3 + $0xe8] sm:$0xff] %v2030_v28   ;;  %v1555_v34 = vmul.f32 %v1462_v51, %v4159_v29  ;;  %v1472_v4 = vsel %vm1471_vm11, %v2359_v3, %v1468_v21  ;;  %v1491_v1 = vor.u32 1.1754944e-38, %v1490_v43  ;;  %vm1489_vm15 = vcmp.eq.f32.partialorder %v1488_v2, 8.507059e+37 }
 0x14a   :  { %v1477_v61 = vsel %vm1474_vm13, %v1476_v52, %v1472_v4  ;;  %v1483_v16 = vadd.f32 %v2361_v58, %v1482_v35 }
 0x14b   :  { %v2035_v57 = vpack.c.bf16 %v1555_v34, %v1554_v60  ;;  %v1556_v53 = vmul.f32 %v1477_v61, %v4169_v45 }
 0x14c   :  { %v1487_v5 = vsel %vm1486_vm14, %v2361_v58, %v1483_v16 }
 0x14d   :  { %2102 = vst [vmem:[%s4294_s3 + $0xf0] sm:$0xff] %v2035_v57   ;;  %v1492_v29 = vsel %vm1489_vm15, %v1491_v1, %v1487_v5 }
 0x14e   :  { %v1557_v19 = vmul.f32 %v1492_v29, %v4172_v36 }
 0x150   :  { %v2040_v50 = vpack.c.bf16 %v1557_v19, %v1556_v53 }
 0x152   :  { %2103 = vst [vmem:[%s4294_s3 + $0xf8] sm:$0xff] %v2040_v50  }

// kernel: conv_bn_silu.2
= control target key start
LH: loop header
LB: loop body
LE: loop exit
PB: predicated region body
PF: predicated region fallthrough
CT: control target
= control target key end

     0   :  { %s3727_s15 = smov 0   ;;  %s3729_s16 = smov 0   ;;  %s4557_s0 = inlined_call_operand.vmem [shape: bf16[2,18,18,128], index: 0, kind: input, shape index: {}]   ;;  %s4558_s1 = inlined_call_operand.vmem [shape: bf16[4,2,18,128], index: 1, kind: input, shape index: {}]   ;;  %s4559_s2 = inlined_call_operand.vmem [shape: bf16[1152,128], index: 2, kind: input, shape index: {}]   ;;  %s4560_s3 = inlined_call_operand.vmem [shape: bf16[32,16,128], index: 3, kind: output, shape index: {0}]   ;;  %s4561_s4 = inlined_call_operand.vmem [shape: f32[4,2,128], index: 4, kind: output, shape index: {1}]  }
   0x1   :  { %s3731_s17 = smov 0   ;;  %s3733_s18 = smov 0  }
   0x2   :  { %s3735_s19 = smov 0  }
   0x3 LB: > { %s24_s20 = sadd.s32 1, %s3692_s17  ;;  %s27_s21 = sadd.s32 1, %s3696_s18  ;;  %s3700_s19 = sphi %s3735_s19, %s15_s19   ;;  %s3696_s18 = sphi %s3733_s18, %s4569_s18   ;;  %s3692_s17 = sphi %s3731_s17, %s4568_s17   ;;  %s3688_s16 = sphi %s3729_s16, %s4567_s16   ;;  %s3684_s15 = sphi %s3727_s15, %s4566_s15  }
   0x4   : > { %p25_p0 = scmp.ge.s32.totalorder %s24_s20, 2  ;;  %p3028_p1 = scmp.ge.s32.totalorder %s3700_s19, 1 }
   0x5   : > { %p221_p2 = scmp.lt.s32.totalorder %s3700_s19, 5 }
   0x6   : > { %s4571_s20 = smov (%p25_p0, %s24_s20), 0  ;;  %s4573_s21 = smov (!%p25_p0, %s27_s21), %s3696_s18 }
   0x7   : > { %p222_p3 = pnand %p3028_p1, %p221_p2  ;;  %p29_p4 = scmp.ge.s32.totalorder %s4573_s21, 2 }
   0x8   : > { %s3029_s24 = sshll.u32 (!%p222_p3), %s3684_s15, 3  ;;  %p279_p5 = scmp.lt.s32.totalorder (!%p222_p3), %s3688_s16, 1 }
   0x9   : > { %s4575_s21 = smov (%p29_p4, %s4573_s21), 0  ;;  %225 = sbr.rel (%p222_p3) target bundleno = 490 (0x1ea), region = 32 }
   0xa   : > { %p281_p6 = scmp.lt.s32.totalorder (!%p222_p3), %s3029_s24, 17  ;;  %s3031_s11 = sshll.u32 (!%p222_p3), %s3688_s16, 1 }
   0xb   : > { %s4146_s13 = sadd.s32 (!%p222_p3), %s3684_s15, %s3031_s11 }
   0xc   : > { %p296_p7 = scmp.lt.s32.totalorder (!%p222_p3), %s4146_s13, 3 }
   0xe   : > { %v3473_v0 = vld [vmem:[%s4559_s2 + $0x78] sm:$0xff]  ;;  %v3472_v1 = vld [vmem:[%s4559_s2 + $0x70] sm:$0xff]  ;;  %s280_s27 = scalar_select %p279_p5, %s3688_s16, 1  ;;  %v3471_v2 = vld [vmem:[%s4559_s2 + $0x68] sm:$0xff]  ;;  %vm423_vm0 = vsmask.f32 3328 }
   0xf   : > { %3593 = vmatpush.bf16.msra.mxu1 %v3473_v0  ;;  %3594 = vmatpush.bf16.msra.mxu2 %v3473_v0  ;;  %s4577_s24 = smov (!%p281_p6, %s3029_s24), 17  ;;  %v3470_v3 = vld [vmem:[%s4559_s2 + $0x60] sm:$0xff]  ;;  %v3469_v10 = vld [vmem:[%s4559_s2 + $0x58] sm:$0xff]  ;;  %v3468_v13 = vld [vmem:[%s4559_s2 + $0x50] sm:$0xff]  ;;  %vm424_vm1 = vsmask.f32 7440 }
  0x10   : > { %3595 = vmatpush.bf16.msra.mxu3 %v3473_v0  ;;  %714 = vmatpush.bf16.msra.mxu0 %v3473_v0  ;;  %s3618_s28 = smul.u32 54, %s280_s27  ;;  %v3467_v22 = vld [vmem:[%s4559_s2 + $0x48] sm:$0xff]  ;;  %v3466_v42 = vld [vmem:[%s4559_s2 + $0x40] sm:$0xff]  ;;  %vm3819_vm2 = vmor %vm423_vm0, %vm424_vm1  ;;  %vm932_vm3 = vcmask 1042432   ;;  %vm933_vm4 = vcmask 1046532  }
  0x11   : > { %s3617_s29 = smul.u32 3, %s4577_s24  ;;  %v3481_v58 = vld [vmem:[%s4559_s2 + $0xb8] sm:$0xff]  ;;  %vm3989_vm5 = vmor %vm932_vm3, %vm933_vm4 }
  0x12   : > { %v3465_v59 = vld [vmem:[%s4559_s2 + $0x38] sm:$0xff]  ;;  %s4158_s15 = scalar_select %p296_p7, %s4146_s13, 3 }
  0x13   : > { %3596 = vmatpush.bf16.msra.mxu1 %v3472_v1  ;;  %3597 = vmatpush.bf16.msra.mxu2 %v3472_v1  ;;  %s285_s6 = sadd.s32 %s3618_s28, %s3617_s29  ;;  %v3497_v0 = vld [vmem:[%s4559_s2 + $0xf8] sm:$0xff]  ;;  %s3034_s28 = sshll.u32 %s4146_s13, 3 }
  0x14   : > { %3598 = vmatpush.bf16.msra.mxu3 %v3472_v1  ;;  %715 = vmatpush.bf16.msra.mxu0 %v3472_v1  ;;  %s3030_s7 = sshll.u32 %s285_s6, 2  ;;  %s3619_s27 = smul.u32 24, %s4158_s15 }
  0x15   : > { %s3779_s12 = scalar_lea.vmem %s4557_s0, %s3030_s7  ;;  %p306_p8 = scmp.lt.s32.totalorder %s3034_s28, 31 }
  0x16   : > { %v328_v4 = vld [vmem:[%s3779_s12 + $0x18] sm:$0xff]   ;;  %v330_v5 = vld [vmem:[%s3779_s12 + $0x20] sm:$0x1]  ;;  %v334_v6 = vld [vmem:[%s3779_s12 + $0x30] sm:$0xff]   ;;  %s4183_s30 = scalar_lea.vmem %s4558_s1, %s3619_s27  ;;  %s3038_s6 = sshll.u32 %s4158_s15, 1 }
  0x17   : > { %3599 = vmatpush.bf16.msra.mxu1 %v3471_v2  ;;  %3600 = vmatpush.bf16.msra.mxu2 %v3471_v2  ;;  %352 = vst [vmem:[#allocation2 + $0x18] sm:$0xff] %v328_v4   ;;  %v336_v7 = vld [vmem:[%s3779_s12 + $0x38] sm:$0x1]  ;;  %v340_v8 = vld [vmem:[%s3779_s12 + $0x48] sm:$0xff]   ;;  %v342_v9 = vld [vmem:[%s3779_s12 + $0x50] sm:$0x1]  ;;  %s319_s9 = scalar_lea.vmem %s4561_s4, %s3038_s6 }
  0x18   : > { %3601 = vmatpush.bf16.msra.mxu3 %v3471_v2  ;;  %716 = vmatpush.bf16.msra.mxu0 %v3471_v2  ;;  %354 = vst [vmem:[#allocation2 + $0x20] sm:$0x1] %v330_v5  ;;  %v322_v11 = vld [vmem:[%s3779_s12] sm:$0xff]   ;;  %v324_v12 = vld [vmem:[%s3779_s12 + $0x8] sm:$0x1]  ;;  %v343_v2 = vld [vmem:[%s3779_s12 + $0x54] sm:$0xff]  }
  0x19   : > { %358 = vst [vmem:[#allocation2 + $0x30] sm:$0xff] %v334_v6   ;;  %v331_v14 = vld [vmem:[%s3779_s12 + $0x24] sm:$0xff]   ;;  %v337_v41 = vld [vmem:[%s3779_s12 + $0x3c] sm:$0xff]   ;;  %v333_v52 = vld [vmem:[%s3779_s12 + $0x2c] sm:$0x1]  ;;  %s4579_s28 = smov (!%p306_p8, %s3034_s28), 31 }
  0x1a   : > { %360 = vst [vmem:[#allocation2 + $0x38] sm:$0x1] %v336_v7  ;;  %s3449_s29 = sshll.u32 %s4579_s28, 3 }
  0x1b   : > { %3602 = vmatpush.bf16.msra.mxu1 %v3470_v3  ;;  %3603 = vmatpush.bf16.msra.mxu2 %v3470_v3  ;;  %364 = vst [vmem:[#allocation2 + $0x48] sm:$0xff] %v340_v8   ;;  %s4515_s5 = scalar_lea.vmem %s4560_s3, %s3449_s29 }
  0x1c   : > { %3604 = vmatpush.bf16.msra.mxu3 %v3470_v3  ;;  %717 = vmatpush.bf16.msra.mxu0 %v3470_v3  ;;  %366 = vst [vmem:[#allocation2 + $0x50] sm:$0x1] %v342_v9  ;;  %v339_v9 = vld [vmem:[%s3779_s12 + $0x44] sm:$0x1] }
  0x1d   : > { %346 = vst [vmem:[#allocation2] sm:$0xff] %v322_v11  }
  0x1e   : > { %v387_v15 = vld [vmem:[#allocation2 + $0x18] sm:$0xf]  ;;  %v3796_v16 = vld [vmem:[#allocation2 + $0x1c] sm:$0xf]  ;;  %348 = vst [vmem:[#allocation2 + $0x8] sm:$0x1] %v324_v12 }
  0x1f   : > { %3605 = vmatpush.bf16.msra.mxu1 %v3469_v10  ;;  %3606 = vmatpush.bf16.msra.mxu2 %v3469_v10  ;;  %v3798_v17 = vld [vmem:[#allocation2 + $0x20] sm:$0x1]  ;;  %v475_v18 = vshrl.u32 %v387_v15, 16  ;;  %v478_v19 = vshll.u32 %v387_v15, 16  ;;  %v484_v20 = vshll.u32 %v3796_v16, 16  ;;  %v488_v21 = vshrl.u32 %v3796_v16, 16 }
  0x20   : > { %3607 = vmatpush.bf16.msra.mxu3 %v3469_v10  ;;  %718 = vmatpush.bf16.msra.mxu0 %v3469_v10  ;;  %v494_v23 = vshll.u32 %v3798_v17, 16  ;;  %v391_v24 = vld [vmem:[#allocation2 + $0x30] sm:$0xf]  ;;  %v3806_v25 = vld [vmem:[#allocation2 + $0x34] sm:$0xf]  ;;  %355 = vst [vmem:[#allocation2 + $0x24] sm:$0xff] %v331_v14  }
  0x21   : > { %v477_v26 = vrot.slane %v475_v18, 4  ;;  %v480_v27 = vrot.slane %v478_v19, 5  ;;  %v486_v28 = vrot.slane %v484_v20, 5  ;;  %v490_v29 = vrot.slane %v488_v21, 4  ;;  %v3808_v30 = vld [vmem:[#allocation2 + $0x38] sm:$0x1] }
  0x22   : > { %v496_v31 = vrot.slane %v494_v23, 5  ;;  %v523_v32 = vshrl.u32 %v391_v24, 16  ;;  %v526_v33 = vshll.u32 %v391_v24, 16  ;;  %v532_v34 = vshll.u32 %v3806_v25, 16  ;;  %v395_v35 = vld [vmem:[#allocation2 + $0x48] sm:$0xf] }
  0x23   : > { %3608 = vmatpush.bf16.msra.mxu1 %v3468_v13  ;;  %3609 = vmatpush.bf16.msra.mxu2 %v3468_v13  ;;  %v481_v36 = vor.u32 %v480_v27, %v477_v26  ;;  %v491_v37 = vor.u32 %v490_v29, %v486_v28  ;;  %v536_v38 = vshrl.u32 %v3806_v25, 16  ;;  %v542_v39 = vshll.u32 %v3808_v30, 16  ;;  %v396_v40 = vld [vmem:[#allocation2 + $0x4c] sm:$0xf]  ;;  %v421_v54 = vld [vmem:[#allocation2 + $0x50] sm:$0x1] }
  0x24   : > { %3610 = vmatpush.bf16.msra.mxu3 %v3468_v13  ;;  %719 = vmatpush.bf16.msra.mxu0 %v3468_v13  ;;  %v525_v44 = vrot.slane %v523_v32, 4  ;;  %v528_v45 = vrot.slane %v526_v33, 5  ;;  %v534_v46 = vrot.slane %v532_v34, 5  ;;  %v571_v47 = vshrl.u32 %v395_v35, 16  ;;  %361 = vst [vmem:[#allocation2 + $0x3c] sm:$0xff] %v337_v41   ;;  %v3505_v20 = vld [vmem:[%s4559_s2 + $0x138] sm:$0xff] }
  0x25   : > { %v482_v48 = vrot.slane %v481_v36, 4  ;;  %v492_v49 = vrot.slane %v491_v37, 4  ;;  %v538_v50 = vrot.slane %v536_v38, 4  ;;  %v544_v51 = vrot.slane %v542_v39, 5  ;;  %v383_v1 = vld [vmem:[#allocation2] sm:$0xf] }
  0x26   : > { %v529_v53 = vor.u32 %v528_v45, %v525_v44  ;;  %v573_v55 = vrot.slane %v571_v47, 4  ;;  %v574_v56 = vshll.u32 %v395_v35, 16  ;;  %v580_v57 = vshll.u32 %v396_v40, 16  ;;  %v3838_v7 = vld [vmem:[#allocation2 + $0x4] sm:$0xf]  ;;  %v3464_v29 = vld [vmem:[%s4559_s2 + $0x30] sm:$0xff] }
  0x27   : > { %3611 = vmatpush.bf16.msra.mxu1 %v3467_v22  ;;  %3612 = vmatpush.bf16.msra.mxu2 %v3467_v22  ;;  %v487_v60 = vsel %vm3819_vm2, %v482_v48, %v486_v28  ;;  %v497_v61 = vsel %vm3819_vm2, %v492_v49, %v496_v31  ;;  %v539_v62 = vor.u32 %v538_v50, %v534_v46  ;;  %v584_v63 = vshrl.u32 %v396_v40, 16  ;;  %v3840_v8 = vld [vmem:[#allocation2 + $0x8] sm:$0x1]  ;;  %v3848_v21 = vld [vmem:[#allocation2 + $0x24] sm:$0xf]  ;;  %v3480_v28 = vld [vmem:[%s4559_s2 + $0xb0] sm:$0xff] }
  0x28   : > { %3613 = vmatpush.bf16.msra.mxu3 %v3467_v22  ;;  %720 = vmatpush.bf16.msra.mxu0 %v3467_v22  ;;  %v638_v3 = vunpack.c.l.b16 %v487_v60  ;;  %v639_v4 = vunpack.c.l.b16 %v497_v61  ;;  %v530_v5 = vrot.slane %v529_v53, 4  ;;  %v576_v6 = vrot.slane %v574_v56, 5  ;;  %357 = vst [vmem:[#allocation2 + $0x2c] sm:$0x1] %v333_v52  ;;  %v345_v22 = vld [vmem:[%s3779_s12 + $0x5c] sm:$0x1] }
  0x29   : > { %v540_v10 = vrot.slane %v539_v62, 4  ;;  %v582_v11 = vrot.slane %v580_v57, 5  ;;  %v586_v12 = vrot.slane %v584_v63, 4  ;;  %v590_v13 = vshll.u32 %v421_v54, 16  ;;  %363 = vst [vmem:[#allocation2 + $0x44] sm:$0x1] %v339_v9 }
  0x2a   : > { %v652_v14 = vpack.c.b16 %v639_v4, %v638_v3  ;;  %v535_v15 = vsel %vm3819_vm2, %v530_v5, %v534_v46  ;;  %v577_v18 = vor.u32 %v576_v6, %v573_v55  ;;  %v427_v19 = vshrl.u32 %v383_v1, 16  ;;  %367 = vst [vmem:[#allocation2 + $0x54] sm:$0xff] %v343_v2   ;;  %v325_v31 = vld [vmem:[%s3779_s12 + $0xc] sm:$0xff]   ;;  %v327_v32 = vld [vmem:[%s3779_s12 + $0x14] sm:$0x1] }
  0x2b   : > { %3614 = vmatpush.bf16.msra.mxu1 %v3466_v42  ;;  %3615 = vmatpush.bf16.msra.mxu2 %v3466_v42  ;;  %v545_v23 = vsel %vm3819_vm2, %v540_v10, %v544_v51  ;;  %v642_v24 = vunpack.c.l.b16 %v535_v15  ;;  %v587_v26 = vor.u32 %v586_v12, %v582_v11  ;;  %v592_v27 = vrot.slane %v590_v13, 5  ;;  %v3496_v37 = vld [vmem:[%s4559_s2 + $0xf0] sm:$0xff]  ;;  %369 = vst [vmem:[#allocation2 + $0x5c] sm:$0x1] %v345_v22  ;;  %v393_v49 = vld [vmem:[#allocation2 + $0x3c] sm:$0xf] }
  0x2c   : > { %3616 = vmatpush.bf16.msra.mxu3 %v3466_v42  ;;  %721 = vmatpush.bf16.msra.mxu0 %v3466_v42  ;;  %v643_v33 = vunpack.c.l.b16 %v545_v23  ;;  %v578_v34 = vrot.slane %v577_v18, 4  ;;  %v429_v35 = vrot.slane %v427_v19, 4  ;;  %v430_v36 = vshll.u32 %v383_v1, 16  ;;  %v3867_v42 = vld [vmem:[#allocation2 + $0x28] sm:$0xf]  ;;  %v3504_v47 = vld [vmem:[%s4559_s2 + $0x130] sm:$0xff] }
  0x2d   : > { %v588_v38 = vrot.slane %v587_v26, 4  ;;  %v436_v39 = vshll.u32 %v3838_v7, 16  ;;  %v440_v40 = vshrl.u32 %v3838_v7, 16  ;;  %v446_v41 = vshll.u32 %v3840_v8, 16  ;;  %349 = vst [vmem:[#allocation2 + $0xc] sm:$0xff] %v325_v31   ;;  %v3479_v61 = vld [vmem:[%s4559_s2 + $0xa8] sm:$0xff] }
  0x2e   : > { %732 = vmatmul.bf16.vlgmr.msra.gmra.mxu1 %v652_v14  ;;  %v654_v44 = vpack.c.b16 %v643_v33, %v642_v24  ;;  %v583_v45 = vsel %vm3819_vm2, %v578_v34, %v582_v11  ;;  %v432_v46 = vrot.slane %v430_v36, 5  ;;  %v499_v48 = vshrl.u32 %v3848_v21, 16  ;;  %351 = vst [vmem:[#allocation2 + $0x14] sm:$0x1] %v327_v32  ;;  %v3495_v62 = vld [vmem:[%s4559_s2 + $0xe8] sm:$0xff]  ;;  %v3462_v18 = vld [vmem:[%s4559_s2 + $0x20] sm:$0xff] }
  0x2f   : > { %1087 = vmatpush.bf16.msrb.mxu2 %v3481_v58  ;;  %859 = vmatpush.bf16.msrb.mxu1 %v3465_v59  ;;  %v593_v50 = vsel %vm3819_vm2, %v588_v38, %v592_v27  ;;  %v646_v51 = vunpack.c.l.b16 %v583_v45  ;;  %v438_v52 = vrot.slane %v436_v39, 5  ;;  %v442_v53 = vrot.slane %v440_v40, 4  ;;  %v3877_v54 = vld [vmem:[#allocation2 + $0x2c] sm:$0x1]  ;;  %v3895_v6 = vld [vmem:[#allocation2 + $0x40] sm:$0xf] }
  0x30   : > { %1281 = vmatpush.bf16.msrb.mxu3 %v3497_v0  ;;  %1658 = vmatpush.bf16.msrb.mxu0 %v3505_v20  ;;  %v647_v55 = vunpack.c.l.b16 %v593_v50  ;;  %v433_v56 = vor.u32 %v432_v46, %v429_v35  ;;  %v448_v57 = vrot.slane %v446_v41, 5  ;;  %v3463_v58 = vld [vmem:[%s4559_s2 + $0x28] sm:$0xff]  ;;  %v501_v59 = vrot.slane %v499_v48, 4  ;;  %v3897_v14 = vld [vmem:[#allocation2 + $0x44] sm:$0x1]  ;;  %v3461_v40 = vld [vmem:[%s4559_s2 + $0x18] sm:$0xff] }
  0x31   : > { %742 = vmatmul.bf16.vlgmr.msra.gmra.mxu2 %v654_v44  ;;  %v443_v60 = vor.u32 %v442_v53, %v438_v52  ;;  %v502_v63 = vshll.u32 %v3848_v21, 16  ;;  %v508_v0 = vshll.u32 %v3867_v42, 16  ;;  %v512_v1 = vshrl.u32 %v3867_v42, 16  ;;  %v3503_v4 = vld [vmem:[%s4559_s2 + $0x128] sm:$0xff]  ;;  %v397_v22 = vld [vmem:[#allocation2 + $0x54] sm:$0xf] }
  0x32   : > { %v656_v2 = vpack.c.b16 %v647_v55, %v646_v51  ;;  %v434_v3 = vrot.slane %v433_v56, 4  ;;  %v518_v5 = vshll.u32 %v3877_v54, 16  ;;  %v547_v9 = vshrl.u32 %v393_v49, 16  ;;  %v3478_v26 = vld [vmem:[%s4559_s2 + $0xa0] sm:$0xff]  ;;  %v3923_v48 = vld [vmem:[#allocation2 + $0x5c] sm:$0x1] }
  0x33   : > { %860 = vmatpush.bf16.msrb.mxu1 %v3464_v29  ;;  %1088 = vmatpush.bf16.msrb.mxu2 %v3480_v28  ;;  %v444_v10 = vrot.slane %v443_v60, 4  ;;  %v504_v11 = vrot.slane %v502_v63, 5  ;;  %v510_v12 = vrot.slane %v508_v0, 5  ;;  %v514_v13 = vrot.slane %v512_v1, 4  ;;  %v3494_v27 = vld [vmem:[%s4559_s2 + $0xe0] sm:$0xff]  ;;  %v3477_v53 = vld [vmem:[%s4559_s2 + $0x98] sm:$0xff] }
  0x34   : > { %1282 = vmatpush.bf16.msrb.mxu3 %v3496_v37  ;;  %1659 = vmatpush.bf16.msrb.mxu0 %v3504_v47  ;;  %v439_v15 = vsel %vm3819_vm2, %v434_v3, %v438_v52  ;;  %v520_v19 = vrot.slane %v518_v5, 5  ;;  %v549_v20 = vrot.slane %v547_v9, 4  ;;  %v550_v21 = vshll.u32 %v393_v49, 16  ;;  %v3502_v35 = vld [vmem:[%s4559_s2 + $0x120] sm:$0xff]  ;;  %v3921_v47 = vld [vmem:[#allocation2 + $0x58] sm:$0xf] }
  0x35   : > { %752 = vmatmul.bf16.vlgmr.msra.gmra.mxu3 %v656_v2  ;;  %v449_v23 = vsel %vm3819_vm2, %v444_v10, %v448_v57  ;;  %v634_v24 = vunpack.c.l.b16 %v439_v15  ;;  %v505_v28 = vor.u32 %v504_v11, %v501_v59  ;;  %v515_v29 = vor.u32 %v514_v13, %v510_v12  ;;  %v3493_v55 = vld [vmem:[%s4559_s2 + $0xd8] sm:$0xff]  ;;  %v385_v56 = vld [vmem:[#allocation2 + $0xc] sm:$0xf]  ;;  %v3943_v5 = vld [vmem:[#allocation2 + $0x10] sm:$0xf] }
  0x36   : > { %v635_v31 = vunpack.c.l.b16 %v449_v23  ;;  %v552_v32 = vrot.slane %v550_v21, 5  ;;  %v556_v33 = vshll.u32 %v3895_v6, 16  ;;  %v560_v34 = vshrl.u32 %v3895_v6, 16  ;;  %v3501_v1 = vld [vmem:[%s4559_s2 + $0x118] sm:$0xff]  ;;  %v3476_v10 = vld [vmem:[%s4559_s2 + $0x90] sm:$0xff] }
  0x37   : > { %861 = vmatpush.bf16.msrb.mxu1 %v3463_v58  ;;  %1089 = vmatpush.bf16.msrb.mxu2 %v3479_v61  ;;  %v506_v36 = vrot.slane %v505_v28, 4  ;;  %v516_v37 = vrot.slane %v515_v29, 4  ;;  %v566_v38 = vshll.u32 %v3897_v14, 16  ;;  %v595_v39 = vshrl.u32 %v397_v22, 16  ;;  %v3460_v11 = vld [vmem:[%s4559_s2 + $0x10] sm:$0xff] }
  0x38   : > { %1283 = vmatpush.bf16.msrb.mxu3 %v3495_v62  ;;  %1660 = vmatpush.bf16.msrb.mxu0 %v3503_v4  ;;  %v650_v41 = vpack.c.b16 %v635_v31, %v634_v24  ;;  %v553_v44 = vor.u32 %v552_v32, %v549_v20  ;;  %v558_v45 = vrot.slane %v556_v33, 5  ;;  %v562_v46 = vrot.slane %v560_v34, 4  ;;  %v3492_v20 = vld [vmem:[%s4559_s2 + $0xd0] sm:$0xff]  ;;  %v3459_v32 = vld [vmem:[%s4559_s2 + $0x8] sm:$0xff] }
  0x39   : > { %v511_v49 = vsel %vm3819_vm2, %v506_v36, %v510_v12  ;;  %v521_v50 = vsel %vm3819_vm2, %v516_v37, %v520_v19  ;;  %v568_v51 = vrot.slane %v566_v38, 5  ;;  %v597_v52 = vrot.slane %v595_v39, 4  ;;  %v3951_v19 = vld [vmem:[#allocation2 + $0x14] sm:$0x1]  ;;  %v908_v36 = vld [vmem:[#allocation2] sm:$0xe] }
  0x3a   : > { %722 = vmatmul.bf16.vlgmr.msra.gmra.mxu0 %v650_v41  ;;  %v640_v57 = vunpack.c.l.b16 %v511_v49  ;;  %v641_v58 = vunpack.c.l.b16 %v521_v50  ;;  %v554_v59 = vrot.slane %v553_v44, 4  ;;  %v563_v60 = vor.u32 %v562_v46, %v558_v45  ;;  %v3500_v31 = vld [vmem:[%s4559_s2 + $0x110] sm:$0xff]  ;;  %v3475_v41 = vld [vmem:[%s4559_s2 + $0x88] sm:$0xff] }
  0x3b   : > { %862 = vmatpush.bf16.msrb.mxu1 %v3462_v18  ;;  %1090 = vmatpush.bf16.msrb.mxu2 %v3478_v26  ;;  %v598_v61 = vshll.u32 %v397_v22, 16  ;;  %v604_v62 = vshll.u32 %v3921_v47, 16  ;;  %v608_v63 = vshrl.u32 %v3921_v47, 16  ;;  %v614_v0 = vshll.u32 %v3923_v48, 16  ;;  %v3491_v44 = vld [vmem:[%s4559_s2 + $0xc8] sm:$0xff] }
  0x3c   : > { %1284 = vmatpush.bf16.msrb.mxu3 %v3494_v27  ;;  %1661 = vmatpush.bf16.msrb.mxu0 %v3502_v35  ;;  %v653_v2 = vpack.c.b16 %v641_v58, %v640_v57  ;;  %v559_v3 = vsel %vm3819_vm2, %v554_v59, %v558_v45  ;;  %v564_v4 = vrot.slane %v563_v60, 4  ;;  %v451_v9 = vshrl.u32 %v385_v56, 16  ;;  %v1346_v50 = vld [vmem:[#allocation2 + $0xc] sm:$0xf] }
  0x3d   : > { %v644_v12 = vunpack.c.l.b16 %v559_v3  ;;  %v600_v13 = vrot.slane %v598_v61, 5  ;;  %v606_v15 = vrot.slane %v604_v62, 5  ;;  %v610_v18 = vrot.slane %v608_v63, 4  ;;  %v3474_v61 = vld [vmem:[%s4559_s2 + $0x80] sm:$0xff] }
  0x3e   : > { %737 = vmatmul.bf16.gmra.mxu1 %v653_v2  ;;  %v569_v21 = vsel %vm3819_vm2, %v564_v4, %v568_v51  ;;  %v616_v22 = vrot.slane %v614_v0, 5  ;;  %v453_v23 = vrot.slane %v451_v9, 4  ;;  %v454_v24 = vshll.u32 %v385_v56, 16  ;;  %v3458_v62 = vld [vmem:[%s4559_s2] sm:$0xff]  ;;  %v3997_v2 = vld [vmem:[#allocation2 + $0x10] sm:$0xf] }
  0x3f   : > { %863 = vmatpush.bf16.msrb.mxu1 %v3461_v40  ;;  %1091 = vmatpush.bf16.msrb.mxu2 %v3477_v53  ;;  %v645_v26 = vunpack.c.l.b16 %v569_v21  ;;  %v601_v27 = vor.u32 %v600_v13, %v597_v52  ;;  %v611_v28 = vor.u32 %v610_v18, %v606_v15  ;;  %v460_v29 = vshll.u32 %v3943_v5, 16  ;;  %v3499_v53 = vld [vmem:[%s4559_s2 + $0x108] sm:$0xff]  ;;  %v4012_v18 = vld [vmem:[#allocation2 + $0x14] sm:$0x1] }
  0x40   : > { %1285 = vmatpush.bf16.msrb.mxu3 %v3493_v55  ;;  %1662 = vmatpush.bf16.msrb.mxu0 %v3501_v1  ;;  %v456_v33 = vrot.slane %v454_v24, 5  ;;  %v464_v34 = vshrl.u32 %v3943_v5, 16  ;;  %v470_v35 = vshll.u32 %v3951_v19, 16  ;;  %v3135_v55 = vrot.slane %v908_v36, 9  ;;  %v3528_v36 = vld [vmem:[%s4559_s2 + $0x1b0] sm:$0xff] }
  0x41   : > { %v655_v37 = vpack.c.b16 %v645_v26, %v644_v12  ;;  %v602_v38 = vrot.slane %v601_v27, 4  ;;  %v612_v39 = vrot.slane %v611_v28, 4  ;;  %v462_v40 = vrot.slane %v460_v29, 5  ;;  %v3537_v12 = vld [vmem:[%s4559_s2 + $0x1f8] sm:$0xff] }
  0x42   : > { %v457_v45 = vor.u32 %v456_v33, %v453_v23  ;;  %v466_v46 = vrot.slane %v464_v34, 4  ;;  %v472_v49 = vrot.slane %v470_v35, 5  ;;  %v937_v56 = vrot.slane %v3838_v7, 5  ;;  %v3490_v7 = vld [vmem:[%s4559_s2 + $0xc0] sm:$0xff]  ;;  %v3545_v28 = vld [vmem:[%s4559_s2 + $0x238] sm:$0xff] }
  0x43   : > { %864 = vmatpush.bf16.msrb.mxu1 %v3460_v11  ;;  %1092 = vmatpush.bf16.msrb.mxu2 %v3476_v10  ;;  %v607_v51 = vsel %vm3819_vm2, %v602_v38, %v606_v15  ;;  %v617_v52 = vsel %vm3819_vm2, %v612_v39, %v616_v22  ;;  %v940_v1 = vrot.slane %v3840_v8, 5  ;;  %v1371_v3 = vshrl.u32 %v1346_v50, 16  ;;  %v3529_v11 = vld [vmem:[%s4559_s2 + $0x1b8] sm:$0xff]  ;;  %v3498_v8 = vld [vmem:[%s4559_s2 + $0x100] sm:$0xff] }
  0x44   : > { %1286 = vmatpush.bf16.msrb.mxu3 %v3492_v20  ;;  %747 = vmatmul.bf16.gmra.mxu2 %v655_v37  ;;  %v648_v57 = vunpack.c.l.b16 %v607_v51  ;;  %v649_v58 = vunpack.c.l.b16 %v617_v52  ;;  %v458_v59 = vrot.slane %v457_v45, 4  ;;  %v467_v60 = vor.u32 %v466_v46, %v462_v40  ;;  %v3513_v22 = vld [vmem:[%s4559_s2 + $0x178] sm:$0xff]  ;;  %v3536_v46 = vld [vmem:[%s4559_s2 + $0x1f0] sm:$0xff] }
  0x45   : > { %1663 = vmatpush.bf16.msrb.mxu0 %v3500_v31  ;;  %v939_v0 = vrot.slane %v937_v56, 4  ;;  %v938_v15 = vsel %vm3989_vm5, %v3135_v55, %v937_v56  ;;  %v1373_v20 = vrot.slane %v1371_v3, 4  ;;  %v1374_v21 = vshll.u32 %v1346_v50, 16  ;;  %v3544_v50 = vld [vmem:[%s4559_s2 + $0x230] sm:$0xff]  ;;  %v910_v55 = vld [vmem:[#allocation2 + $0x18] sm:$0xe] }
  0x46   : > { %v657_v4 = vpack.c.b16 %v649_v58, %v648_v57  ;;  %v463_v9 = vsel %vm3819_vm2, %v458_v59, %v462_v40  ;;  %v468_v10 = vrot.slane %v467_v60, 4  ;;  %v1380_v26 = vshll.u32 %v3997_v2, 16  ;;  %v909_v57 = vld [vmem:[#allocation2 + $0xc] sm:$0xe] }
  0x47   : > { %865 = vmatpush.bf16.msrb.mxu1 %v3459_v32  ;;  %1093 = vmatpush.bf16.msrb.mxu2 %v3475_v41  ;;  %v636_v13 = vunpack.c.l.b16 %v463_v9  ;;  %v941_v24 = vsel %vm3989_vm5, %v939_v0, %v940_v1  ;;  %v1384_v27 = vshrl.u32 %v3997_v2, 16  ;;  %v1376_v31 = vrot.slane %v1374_v21, 5  ;;  %v3450_v32 = vld [vmem:[#allocation2] sm:$0xff] }
  0x48   : > { %1287 = vmatpush.bf16.msrb.mxu3 %v3491_v44  ;;  %v473_v23 = vsel %vm3819_vm2, %v468_v10, %v472_v49  ;;  %v1382_v33 = vrot.slane %v1380_v26, 5  ;;  %v1390_v35 = vshll.u32 %v4012_v18, 16  ;;  %v1007_v38 = vunpack.c.l.b16 %v938_v15  ;;  %v1349_v44 = vld [vmem:[#allocation2 + $0x18] sm:$0xf]  ;;  %v3512_v49 = vld [vmem:[%s4559_s2 + $0x170] sm:$0xff] }
  0x49   : > { %1664 = vmatpush.bf16.msrb.mxu0 %v3499_v53  ;;  %757 = vmatmul.bf16.gmra.mxu3 %v657_v4  ;;  %v637_v29 = vunpack.c.l.b16 %v473_v23  ;;  %v1386_v34 = vrot.slane %v1384_v27, 4  ;;  %v1008_v39 = vunpack.c.l.b16 %v941_v24  ;;  %v1377_v40 = vor.u32 %v1376_v31, %v1373_v20  ;;  %v4039_v53 = vld [vmem:[#allocation2 + $0x1c] sm:$0xf]  ;;  %v3482_v10 = vld [vmem:[#allocation2 + $0xc] sm:$0xff] }
  0x4a   : > { %v1392_v52 = vrot.slane %v1390_v35, 5  ;;  %v944_v58 = vrot.slane %v3943_v5, 5  ;;  %v1395_v59 = vshrl.u32 %v1349_v44, 16  ;;  %v1408_v1 = vshrl.u32 %v4039_v53, 16 }
  0x4b   : > { %866 = vmatpush.bf16.msrb.mxu1 %v3458_v62  ;;  %1094 = vmatpush.bf16.msrb.mxu2 %v3474_v61  ;;  %v651_v37 = vpack.c.b16 %v637_v29, %v636_v13  ;;  %v1387_v41 = vor.u32 %v1386_v34, %v1382_v33  ;;  %v1378_v45 = vrot.slane %v1377_v40, 4  ;;  %v1023_v56 = vpack.c.b16 %v1008_v39, %v1007_v38  ;;  %v1352_v38 = vld [vmem:[#allocation2 + $0x24] sm:$0xf]  ;;  %v4067_v39 = vld [vmem:[#allocation2 + $0x28] sm:$0xf] }
  0x4c   : > { %1288 = vmatpush.bf16.msrb.mxu3 %v3490_v7  ;;  %v1398_v61 = vshll.u32 %v1349_v44, 16  ;;  %v1404_v62 = vshll.u32 %v4039_v53, 16  ;;  %v3137_v7 = vrot.slane %v910_v55, 9  ;;  %v951_v3 = vrot.slane %v3796_v16, 5  ;;  %v3511_v44 = vld [vmem:[%s4559_s2 + $0x168] sm:$0xff] }
  0x4d   : > { %1665 = vmatpush.bf16.msrb.mxu0 %v3498_v8  ;;  %v1388_v51 = vrot.slane %v1387_v41, 4  ;;  %v1383_v60 = vsel %vm3819_vm2, %v1378_v45, %v1382_v33  ;;  %v954_v4 = vrot.slane %v3798_v17, 5  ;;  %v3136_v5 = vrot.slane %v909_v57, 9  ;;  %v4055_v17 = vld [vmem:[#allocation2 + $0x20] sm:$0x1]  ;;  %v3451_v33 = vld [vmem:[#allocation2 + $0xc] sm:$0xff] }
  0x4e   : > { %727 = vmatmul.bf16.gmra.mxu0 %v651_v37  ;;  %867 = vmatmul.bf16.vlgmr.msrb.gmra.mxu1 %v3450_v32  ;;  %v947_v9 = vrot.slane %v3951_v19, 5  ;;  %v952_v13 = vsel %vm3989_vm5, %v3137_v7, %v951_v3  ;;  %v953_v8 = vrot.slane %v951_v3, 4  ;;  %v1578_v15 = vunpack.c.l.b16 %v1383_v60  ;;  %v3535_v41 = vld [vmem:[%s4559_s2 + $0x1e8] sm:$0xff]  ;;  %v3483_v3 = vld [vmem:[#allocation2 + $0x18] sm:$0xff] }
  0x4f   : > { %2101 = vmatpush.bf16.msra.mxu2 %v3529_v11  ;;  %1907 = vmatpush.bf16.msra.mxu1 %v3513_v22  ;;  %v1393_v0 = vsel %vm3819_vm2, %v1388_v51, %v1392_v52  ;;  %v946_v11 = vrot.slane %v944_v58, 4  ;;  %v1400_v21 = vrot.slane %v1398_v61, 5  ;;  %v1011_v22 = vunpack.c.l.b16 %v952_v13  ;;  %v3543_v45 = vld [vmem:[%s4559_s2 + $0x228] sm:$0xff] }
  0x50   : > { %2478 = vmatpush.bf16.msra.mxu3 %v3537_v12  ;;  %v1397_v12 = vrot.slane %v1395_v59, 4  ;;  %v1579_v20 = vunpack.c.l.b16 %v1393_v0  ;;  %v1406_v23 = vrot.slane %v1404_v62, 5  ;;  %v1410_v24 = vrot.slane %v1408_v1, 4 }
  0x51   : > { %2727 = vmatpush.bf16.msra.mxu0 %v3545_v28  ;;  %v955_v16 = vsel %vm3989_vm5, %v953_v8, %v954_v4  ;;  %v945_v19 = vsel %vm3989_vm5, %v3136_v5, %v944_v58  ;;  %v948_v27 = vsel %vm3989_vm5, %v946_v11, %v947_v9  ;;  %v3527_v28 = vld [vmem:[%s4559_s2 + $0x1a8] sm:$0xff]  ;;  %v1414_v35 = vshll.u32 %v4055_v17, 16 }
  0x52   : > { %v1012_v26 = vunpack.c.l.b16 %v955_v16  ;;  %v1594_v29 = vpack.c.b16 %v1579_v20, %v1578_v15  ;;  %v1401_v31 = vor.u32 %v1400_v21, %v1397_v12  ;;  %v1411_v34 = vor.u32 %v1410_v24, %v1406_v23  ;;  %v4092_v8 = vld [vmem:[#allocation2 + $0x2c] sm:$0x1]  ;;  %v3526_v15 = vld [vmem:[%s4559_s2 + $0x1a0] sm:$0xff]  ;;  %v3452_v24 = vld [vmem:[#allocation2 + $0x18] sm:$0xff] }
  0x53   : > { %2102 = vmatpush.bf16.msra.mxu2 %v3528_v36  ;;  %1908 = vmatpush.bf16.msra.mxu1 %v3512_v49  ;;  %v1009_v36 = vunpack.c.l.b16 %v945_v19  ;;  %v1010_v37 = vunpack.c.l.b16 %v948_v27  ;;  %v1416_v49 = vrot.slane %v1414_v35, 5  ;;  %v958_v51 = vrot.slane %v3867_v42, 5  ;;  %v3534_v27 = vld [vmem:[%s4559_s2 + $0x1e0] sm:$0xff] }
  0x54   : > { %2479 = vmatpush.bf16.msra.mxu3 %v3536_v46  ;;  %1095 = vmatmul.bf16.vlgmr.msrb.gmra.mxu2 %v1023_v56  ;;  %v4064_v32 = vpack.c.b16 %v1012_v26, %v1011_v22  ;;  %v1402_v40 = vrot.slane %v1401_v31, 4  ;;  %v1412_v46 = vrot.slane %v1411_v34, 4  ;;  %v961_v52 = vrot.slane %v3877_v54, 5  ;;  %v1355_v31 = vld [vmem:[#allocation2 + $0x30] sm:$0xf] }
  0x55   : > { %2728 = vmatpush.bf16.msra.mxu0 %v3544_v50  ;;  %v911_v50 = vld [vmem:[#allocation2 + $0x24] sm:$0xe]  ;;  %v1024_v55 = vpack.c.b16 %v1010_v37, %v1009_v36  ;;  %v1419_v57 = vshrl.u32 %v1352_v38, 16  ;;  %v1422_v58 = vshll.u32 %v1352_v38, 16  ;;  %v960_v59 = vrot.slane %v958_v51, 4 }
  0x56   : > { %v3138_v56 = vrot.slane %v911_v50, 9  ;;  %v1407_v60 = vsel %vm3819_vm2, %v1402_v40, %v1406_v23  ;;  %v1428_v61 = vshll.u32 %v4067_v39, 16  ;;  %v1432_v62 = vshrl.u32 %v4067_v39, 16 }
  0x57   : > { %2103 = vmatpush.bf16.msra.mxu2 %v3527_v28  ;;  %1909 = vmatpush.bf16.msra.mxu1 %v3511_v44  ;;  %v1417_v54 = vsel %vm3819_vm2, %v1412_v46, %v1416_v49  ;;  %v962_v7 = vsel %vm3989_vm5, %v960_v59, %v961_v52  ;;  %v1580_v4 = vunpack.c.l.b16 %v1407_v60  ;;  %v1421_v5 = vrot.slane %v1419_v57, 4  ;;  %v3510_v28 = vld [vmem:[%s4559_s2 + $0x160] sm:$0xff]  ;;  %v4116_v52 = vld [vmem:[#allocation2 + $0x38] sm:$0x1]  ;;  %v1358_v60 = vld [vmem:[#allocation2 + $0x3c] sm:$0xf] }
  0x58   : > { %2480 = vmatpush.bf16.msra.mxu3 %v3535_v41  ;;  %v959_v42 = vsel %vm3989_vm5, %v3138_v56, %v958_v51  ;;  %v1014_v1 = vunpack.c.l.b16 %v962_v7  ;;  %v1424_v9 = vrot.slane %v1422_v58, 5  ;;  %v1430_v11 = vrot.slane %v1428_v61, 5  ;;  %v3484_v41 = vld [vmem:[#allocation2 + $0x24] sm:$0xff]  ;;  %v4122_v61 = vld [vmem:[#allocation2 + $0x40] sm:$0xf] }
  0x59   : > { %1289 = vmatmul.bf16.vlgmr.msrb.gmra.mxu3 %v3482_v10  ;;  %2729 = vmatpush.bf16.msra.mxu0 %v3543_v45  ;;  %v1013_v0 = vunpack.c.l.b16 %v959_v42  ;;  %v1581_v10 = vunpack.c.l.b16 %v1417_v54  ;;  %v1434_v12 = vrot.slane %v1432_v62, 4  ;;  %v1438_v23 = vshll.u32 %v4092_v8, 16  ;;  %v3453_v57 = vld [vmem:[#allocation2 + $0x24] sm:$0xff]  ;;  %v3533_v62 = vld [vmem:[%s4559_s2 + $0x1d8] sm:$0xff] }
  0x5a   : > { %v1425_v21 = vor.u32 %v1424_v9, %v1421_v5  ;;  %v1443_v36 = vshrl.u32 %v1355_v31, 16  ;;  %v1446_v37 = vshll.u32 %v1355_v31, 16  ;;  %v3509_v42 = vld [vmem:[%s4559_s2 + $0x158] sm:$0xff]  ;;  %v1467_v5 = vshrl.u32 %v1358_v60, 16 }
  0x5b   : > { %v4090_v13 = vpack.c.b16 %v1014_v1, %v1013_v0  ;;  %v1595_v20 = vpack.c.b16 %v1581_v10, %v1580_v4  ;;  %v1435_v22 = vor.u32 %v1434_v12, %v1430_v11  ;;  %2104 = vmatpush.bf16.msra.mxu2 %v3526_v15  ;;  %v1440_v19 = vrot.slane %v1438_v23, 5  ;;  %1910 = vmatpush.bf16.msra.mxu1 %v3510_v28  ;;  %v3541_v54 = vld [vmem:[%s4559_s2 + $0x218] sm:$0xff]  ;;  %v912_v4 = vld [vmem:[#allocation2 + $0x30] sm:$0xe]  ;;  %v4143_v28 = vld [vmem:[#allocation2 + $0x44] sm:$0x1] }
  0x5c   : > { %v1426_v16 = vrot.slane %v1425_v21, 4  ;;  %2481 = vmatpush.bf16.msra.mxu3 %v3534_v27  ;;  %v1445_v46 = vrot.slane %v1443_v36, 4  ;;  %v1448_v49 = vrot.slane %v1446_v37, 5  ;;  %v1470_v9 = vshll.u32 %v1358_v60, 16  ;;  %v3454_v37 = vld [vmem:[#allocation2 + $0x30] sm:$0xff] }
  0x5d   : > { %v1436_v26 = vrot.slane %v1435_v22, 4  ;;  %v1476_v10 = vshll.u32 %v4122_v61, 16  ;;  %v968_v21 = vrot.slane %v3808_v30, 5  ;;  %v3485_v22 = vld [vmem:[#allocation2 + $0x30] sm:$0xff]  ;;  %v1469_v23 = vrot.slane %v1467_v5, 4 }
  0x5e   : > { %1666 = vmatmul.bf16.vlgmr.msrb.gmra.mxu0 %v1594_v29  ;;  %872 = vmatmul.bf16.gmra.mxu1 %v3451_v33  ;;  %v3542_v29 = vld [vmem:[%s4559_s2 + $0x220] sm:$0xff]  ;;  %v4107_v33 = vld [vmem:[#allocation2 + $0x34] sm:$0xf]  ;;  %v1431_v34 = vsel %vm3819_vm2, %v1426_v16, %v1430_v11  ;;  %v1449_v58 = vor.u32 %v1448_v49, %v1445_v46  ;;  %v1480_v11 = vshrl.u32 %v4122_v61, 16  ;;  %v975_v5 = vrot.slane %v3897_v14, 5 }
  0x5f   : > { %2730 = vmatpush.bf16.msra.mxu0 %v3542_v29  ;;  %v1441_v35 = vsel %vm3819_vm2, %v1436_v26, %v1440_v19  ;;  %v1452_v38 = vshll.u32 %v4107_v33, 16  ;;  %v1456_v40 = vshrl.u32 %v4107_v33, 16  ;;  %v1582_v44 = vunpack.c.l.b16 %v1431_v34  ;;  %1911 = vmatpush.bf16.msra.mxu1 %v3509_v42  ;;  %v3532_v46 = vld [vmem:[%s4559_s2 + $0x1d0] sm:$0xff] }
  0x60   : > { %v1583_v45 = vunpack.c.l.b16 %v1441_v35  ;;  %v1450_v7 = vrot.slane %v1449_v58, 4  ;;  %2482 = vmatpush.bf16.msra.mxu3 %v3533_v62  ;;  %v1478_v16 = vrot.slane %v1476_v10, 5  ;;  %v1482_v26 = vrot.slane %v1480_v11, 4  ;;  %v3524_v35 = vld [vmem:[%s4559_s2 + $0x190] sm:$0xff] }
  0x61   : > { %v1454_v50 = vrot.slane %v1452_v38, 5  ;;  %v1458_v51 = vrot.slane %v1456_v40, 4  ;;  %v1486_v34 = vshll.u32 %v4143_v28, 16  ;;  %v3508_v49 = vld [vmem:[%s4559_s2 + $0x150] sm:$0xff] }
  0x62   : > { %v1596_v56 = vpack.c.b16 %v1583_v45, %v1582_v44  ;;  %v1483_v31 = vor.u32 %v1482_v26, %v1478_v16 }
  0x63   : > { %v1459_v59 = vor.u32 %v1458_v51, %v1454_v50  ;;  %2731 = vmatpush.bf16.msra.mxu0 %v3541_v54  ;;  %v1455_v12 = vsel %vm3819_vm2, %v1450_v7, %v1454_v50  ;;  %v1488_v45 = vrot.slane %v1486_v34, 5  ;;  %v3540_v50 = vld [vmem:[%s4559_s2 + $0x210] sm:$0xff]  ;;  %v1361_v51 = vld [vmem:[#allocation2 + $0x48] sm:$0xf]  ;;  %1912 = vmatpush.bf16.msra.mxu1 %v3508_v49 }
  0x64   : > { %1100 = vmatmul.bf16.gmra.mxu2 %v1024_v55  ;;  %v3525_v55 = vld [vmem:[%s4559_s2 + $0x198] sm:$0xff]  ;;  %v1584_v19 = vunpack.c.l.b16 %v1455_v12  ;;  %v1484_v44 = vrot.slane %v1483_v31, 4  ;;  %2483 = vmatpush.bf16.msra.mxu3 %v3532_v46  ;;  %v1491_v60 = vshrl.u32 %v1361_v51, 16  ;;  %v1494_v62 = vshll.u32 %v1361_v51, 16  ;;  %v4185_v12 = vld [vmem:[#allocation2 + $0x50] sm:$0x1] }
  0x65   : > { %2105 = vmatpush.bf16.msra.mxu2 %v3525_v55  ;;  %v1460_v0 = vrot.slane %v1459_v59, 4  ;;  %v4169_v55 = vld [vmem:[#allocation2 + $0x4c] sm:$0xf]  ;;  %v972_v59 = vrot.slane %v3895_v6, 5  ;;  %v914_v46 = vld [vmem:[#allocation2 + $0x48] sm:$0xe] }
  0x66   : > { %v1489_v58 = vsel %vm3819_vm2, %v1484_v44, %v1488_v45  ;;  %v1500_v42 = vshll.u32 %v4169_v55, 16  ;;  %v1504_v54 = vshrl.u32 %v4169_v55, 16  ;;  %v1493_v6 = vrot.slane %v1491_v60, 4  ;;  %v3531_v31 = vld [vmem:[%s4559_s2 + $0x1c8] sm:$0xff] }
  0x67   : > { %2732 = vmatpush.bf16.msra.mxu0 %v3540_v50  ;;  %v3507_v34 = vld [vmem:[%s4559_s2 + $0x148] sm:$0xff] }
  0x68   : > { %v1502_v10 = vrot.slane %v1500_v42, 5  ;;  %v1506_v11 = vrot.slane %v1504_v54, 4  ;;  %2484 = vmatpush.bf16.msra.mxu3 %v3531_v31  ;;  %1913 = vmatpush.bf16.msra.mxu1 %v3507_v34 }
  0x69   : > { %1294 = vmatmul.bf16.gmra.mxu3 %v3483_v3  ;;  %v965_v3 = vrot.slane %v3806_v25, 5  ;;  %v3139_v25 = vrot.slane %v912_v4, 9  ;;  %2106 = vmatpush.bf16.msra.mxu2 %v3524_v35  ;;  %v974_v4 = vrot.slane %v972_v59, 4 }
  0x6b   : > { %v966_v29 = vsel %vm3989_vm5, %v3139_v25, %v965_v3  ;;  %v976_v14 = vsel %vm3989_vm5, %v974_v4, %v975_v5 }
  0x6c   : > { %v1015_v38 = vunpack.c.l.b16 %v966_v29 }
  0x6e   : > { %1671 = vmatmul.bf16.gmra.mxu0 %v1595_v20  ;;  %877 = vmatmul.bf16.gmra.mxu1 %v3452_v24  ;;  %v967_v20 = vrot.slane %v965_v3, 4  ;;  %v1472_v24 = vrot.slane %v1470_v9, 5  ;;  %v1496_v9 = vrot.slane %v1494_v62, 5 }
  0x70   : > { %v969_v30 = vsel %vm3989_vm5, %v967_v20, %v968_v21  ;;  %v3523_v20 = vld [vmem:[%s4559_s2 + $0x188] sm:$0xff] }
  0x71   : > { %v1016_v40 = vunpack.c.l.b16 %v969_v30  ;;  %2107 = vmatpush.bf16.msra.mxu2 %v3523_v20 }
  0x74   : > { %1105 = vmatmul.bf16.gmra.mxu2 %v4064_v32  ;;  %v1462_v32 = vshll.u32 %v4116_v52, 16 }
  0x76   : > { %v1464_v1 = vrot.slane %v1462_v32, 5  ;;  %v913_v32 = vld [vmem:[#allocation2 + $0x3c] sm:$0xe] }
  0x77   : > { %v3140_v3 = vrot.slane %v913_v32, 9  ;;  %v3661_v32 = vld [vmem:[#allocation2 + $0x50] sm:$0x1] }
  0x78   : > { %v1465_v15 = vsel %vm3819_vm2, %v1460_v0, %v1464_v1  ;;  %v3486_v0 = vld [vmem:[#allocation2 + $0x3c] sm:$0xff]  ;;  %v1587_v1 = vunpack.c.l.b16 %v1489_v58  ;;  %v3141_v58 = vrot.slane %v914_v46, 9  ;;  %v982_v60 = vrot.slane %v3661_v32, 5 }
  0x79   : > { %1299 = vmatmul.bf16.gmra.mxu3 %v3484_v41  ;;  %v1585_v27 = vunpack.c.l.b16 %v1465_v15  ;;  %v370_v15 = vld [vmem:[%s4183_s30] sm:$0xff]   ;;  %v973_v25 = vsel %vm3989_vm5, %v3140_v3, %v972_v59  ;;  %v4214_v3 = vld [vmem:[#allocation2 + $0x5c] sm:$0x1] }
  0x7a   : > { %377 = vst [vmem:[#allocation2 + $0x60] sm:$0xff] %v370_v15   ;;  %v1017_v26 = vunpack.c.l.b16 %v973_v25  ;;  %v1534_v25 = vshll.u32 %v4214_v3, 16 }
  0x7b   : > { %v1597_v36 = vpack.c.b16 %v1585_v27, %v1584_v19  ;;  %v1018_v19 = vunpack.c.l.b16 %v976_v14  ;;  %v372_v27 = vld [vmem:[%s4183_s30 + $0x8] sm:$0x1]  ;;  %v3522_v14 = vld [vmem:[%s4559_s2 + $0x180] sm:$0xff] }
  0x7c   : > { %379 = vst [vmem:[#allocation2 + $0x68] sm:$0x1] %v372_v27  ;;  %2108 = vmatpush.bf16.msra.mxu2 %v3522_v14  ;;  %v1757_v14 = vrot.slane %v3997_v2, 5 }
  0x7d   : > { %v1028_v35 = vpack.c.b16 %v1018_v19, %v1017_v26  ;;  %v1536_v26 = vrot.slane %v1534_v25, 5 }
  0x7e   : > { %1676 = vmatmul.bf16.gmra.mxu0 %v1596_v56  ;;  %882 = vmatmul.bf16.gmra.mxu1 %v3453_v57  ;;  %v1027_v56 = vpack.c.b16 %v1016_v40, %v1015_v38  ;;  %v3539_v38 = vld [vmem:[%s4559_s2 + $0x208] sm:$0xff] }
  0x7f   : > { %v3660_v40 = vld [vmem:[#allocation2 + $0x4c] sm:$0xf]  ;;  %2733 = vmatpush.bf16.msra.mxu0 %v3539_v38 }
  0x81   : > { %v1367_v19 = vld [vmem:[#allocation2 + $0x60] sm:$0xf] }
  0x82   : > { %v1539_v31 = vshrl.u32 %v1367_v19, 16  ;;  %v1542_v34 = vshll.u32 %v1367_v19, 16 }
  0x84   : > { %1110 = vmatmul.bf16.gmra.mxu2 %v4090_v13  ;;  %v1473_v13 = vor.u32 %v1472_v24, %v1469_v23  ;;  %v1507_v23 = vor.u32 %v1506_v11, %v1502_v10  ;;  %v1510_v24 = vshll.u32 %v4185_v12, 16 }
  0x86   : > { %v1474_v41 = vrot.slane %v1473_v13, 4  ;;  %v1508_v30 = vrot.slane %v1507_v23, 4  ;;  %v1512_v13 = vrot.slane %v1510_v24, 5  ;;  %v3506_v23 = vld [vmem:[%s4559_s2 + $0x140] sm:$0xff] }
  0x87   : > { %1914 = vmatpush.bf16.msra.mxu1 %v3506_v23  ;;  %v1723_v23 = vld [vmem:[#allocation2 + $0xc] sm:$0xe] }
  0x88   : > { %v1479_v57 = vsel %vm3819_vm2, %v1474_v41, %v1478_v16  ;;  %v3455_v16 = vld [vmem:[#allocation2 + $0x3c] sm:$0xff]  ;;  %v979_v41 = vrot.slane %v3660_v40, 5  ;;  %v1513_v45 = vsel %vm3819_vm2, %v1508_v30, %v1512_v13  ;;  %v4233_v30 = vld [vmem:[#allocation2 + $0x64] sm:$0xf]  ;;  %v915_v13 = vld [vmem:[#allocation2 + $0x54] sm:$0xe] }
  0x89   : > { %1304 = vmatmul.bf16.gmra.mxu3 %v3485_v22  ;;  %v1586_v7 = vunpack.c.l.b16 %v1479_v57  ;;  %v1497_v22 = vor.u32 %v1496_v9, %v1493_v6  ;;  %v3487_v57 = vld [vmem:[#allocation2 + $0x48] sm:$0xff]  ;;  %v1589_v42 = vunpack.c.l.b16 %v1513_v45  ;;  %v1548_v40 = vshll.u32 %v4233_v30, 16 }
  0x8a   : > { %v981_v59 = vrot.slane %v979_v41, 4  ;;  %v980_v4 = vsel %vm3989_vm5, %v3141_v58, %v979_v41  ;;  %v1552_v41 = vshrl.u32 %v4233_v30, 16  ;;  %v3142_v45 = vrot.slane %v915_v13, 9 }
  0x8b   : > { %v1598_v21 = vpack.c.b16 %v1587_v1, %v1586_v7  ;;  %v1498_v29 = vrot.slane %v1497_v22, 4  ;;  %v1019_v20 = vunpack.c.l.b16 %v980_v4  ;;  %v3530_v22 = vld [vmem:[%s4559_s2 + $0x1c0] sm:$0xff]  ;;  %v1544_v58 = vrot.slane %v1542_v34, 5  ;;  %v4259_v4 = vld [vmem:[#allocation2 + $0x1c] sm:$0xf] }
  0x8c   : > { %v983_v5 = vsel %vm3989_vm5, %v981_v59, %v982_v60  ;;  %2485 = vmatpush.bf16.msra.mxu3 %v3530_v22  ;;  %v1550_v59 = vrot.slane %v1548_v40, 5  ;;  %v1554_v32 = vrot.slane %v1552_v41, 4  ;;  %v1759_v34 = vrot.slane %v1757_v14, 4 }
  0x8d   : > { %v1503_v44 = vsel %vm3819_vm2, %v1498_v29, %v1502_v10  ;;  %v3456_v10 = vld [vmem:[#allocation2 + $0x48] sm:$0xff]  ;;  %v986_v29 = vrot.slane %v3921_v47, 5  ;;  %v3538_v47 = vld [vmem:[%s4559_s2 + $0x200] sm:$0xff] }
  0x8e   : > { %1681 = vmatmul.bf16.gmra.mxu0 %v1597_v36  ;;  %887 = vmatmul.bf16.gmra.mxu1 %v3454_v37  ;;  %v1364_v36 = vld [vmem:[#allocation2 + $0x54] sm:$0xf]  ;;  %v4203_v37 = vld [vmem:[#allocation2 + $0x58] sm:$0xf]  ;;  %v1588_v62 = vunpack.c.l.b16 %v1503_v44 }
  0x8f   : > { %v1515_v49 = vshrl.u32 %v1364_v36, 16  ;;  %v1518_v50 = vshll.u32 %v1364_v36, 16  ;;  %v1524_v51 = vshll.u32 %v4203_v37, 16  ;;  %v988_v46 = vrot.slane %v986_v29, 4  ;;  %2734 = vmatpush.bf16.msra.mxu0 %v3538_v47 }
  0x90   : > { %v1599_v6 = vpack.c.b16 %v1589_v42, %v1588_v62  ;;  %v987_v42 = vsel %vm3989_vm5, %v3142_v45, %v986_v29  ;;  %v2168_v45 = vld [vmem:[#allocation2 + $0x20] sm:$0x1] }
  0x91   : > { %v1517_v54 = vrot.slane %v1515_v49, 4  ;;  %v1520_v7 = vrot.slane %v1518_v50, 5  ;;  %v989_v49 = vrot.slane %v3923_v48, 5  ;;  %v3488_v50 = vld [vmem:[#allocation2 + $0x54] sm:$0xff] }
  0x92   : > { %v2166_v48 = vld [vmem:[#allocation2 + $0x18] sm:$0xf] }
  0x93   : > { %v1521_v11 = vor.u32 %v1520_v7, %v1517_v54  ;;  %v990_v54 = vsel %vm3989_vm5, %v988_v46, %v989_v49  ;;  %v4257_v7 = vld [vmem:[#allocation2 + $0x68] sm:$0x1] }
  0x94   : > { %1115 = vmatmul.bf16.gmra.mxu2 %v1027_v56  ;;  %v1528_v56 = vshrl.u32 %v4203_v37, 16 }
  0x95   : > { %v1522_v24 = vrot.slane %v1521_v11, 4  ;;  %v1555_v11 = vor.u32 %v1554_v32, %v1550_v59  ;;  %v2210_v32 = vshll.u32 %v2168_v45, 16 }
  0x96   : > { %v1530_v1 = vrot.slane %v1528_v56, 4 }
  0x97   : > { %v1556_v29 = vrot.slane %v1555_v11, 4 }
  0x99   : > { %1309 = vmatmul.bf16.gmra.mxu3 %v3486_v0  ;;  %v1526_v0 = vrot.slane %v1524_v51, 5 }
  0x9b   : > { %v1531_v15 = vor.u32 %v1530_v1, %v1526_v0 }
  0x9e   : > { %1686 = vmatmul.bf16.gmra.mxu0 %v1598_v21  ;;  %892 = vmatmul.bf16.gmra.mxu1 %v3455_v16  ;;  %v1020_v21 = vunpack.c.l.b16 %v983_v5  ;;  %v1532_v16 = vrot.slane %v1531_v15, 4  ;;  %v3457_v5 = vld [vmem:[#allocation2 + $0x54] sm:$0xff]  ;;  %v1558_v15 = vshll.u32 %v4257_v7, 16 }
  0xa0   : > { %v1029_v27 = vpack.c.b16 %v1020_v21, %v1019_v20  ;;  %v1537_v36 = vsel %vm3819_vm2, %v1532_v16, %v1536_v26  ;;  %v2191_v20 = vshrl.u32 %v2166_v48, 16  ;;  %v2194_v21 = vshll.u32 %v2166_v48, 16 }
  0xa1   : > { %v1591_v56 = vunpack.c.l.b16 %v1537_v36  ;;  %v2204_v16 = vshrl.u32 %v4259_v4, 16  ;;  %v1760_v26 = vrot.slane %v4012_v18, 5  ;;  %v1560_v13 = vrot.slane %v1558_v15, 5 }
  0xa2   : > { %v2193_v2 = vrot.slane %v2191_v20, 4  ;;  %v2577_v15 = vrot.slane %v4259_v4, 5 }
  0xa3   : > { %v2206_v41 = vrot.slane %v2204_v16, 4  ;;  %v1561_v46 = vsel %vm3819_vm2, %v1556_v29, %v1560_v13  ;;  %v1724_v13 = vld [vmem:[#allocation2 + $0x18] sm:$0xe] }
  0xa4   : > { %1120 = vmatmul.bf16.gmra.mxu2 %v1028_v35  ;;  %v1527_v35 = vsel %vm3819_vm2, %v1522_v24, %v1526_v0  ;;  %v2200_v24 = vshll.u32 %v4259_v4, 16 }
  0xa5   : > { %v1590_v51 = vunpack.c.l.b16 %v1527_v35  ;;  %v2196_v35 = vrot.slane %v2194_v21, 5 }
  0xa6   : > { %v2202_v40 = vrot.slane %v2200_v24, 5 }
  0xa7   : > { %v1600_v0 = vpack.c.b16 %v1591_v56, %v1590_v51  ;;  %v1761_v51 = vsel %vm3989_vm5, %v1759_v34, %v1760_v26  ;;  %v2197_v56 = vor.u32 %v2196_v35, %v2193_v2  ;;  %v2579_v2 = vrot.slane %v2577_v15, 4 }
  0xa8   : > { %v2580_v35 = vrot.slane %v2168_v45, 5 }
  0xa9   : > { %1314 = vmatmul.bf16.gmra.mxu3 %v3487_v57  ;;  %v1541_v57 = vrot.slane %v1539_v31, 4  ;;  %v3271_v31 = vrot.slane %v1723_v23, 9  ;;  %v4289_v23 = vld [vmem:[#allocation2 + $0x28] sm:$0xf] }
  0xaa   : > { %v2581_v45 = vsel %vm3989_vm5, %v2579_v2, %v2580_v35  ;;  %v4320_v2 = vld [vmem:[#allocation2 + $0x34] sm:$0xf] }
  0xab   : > { %v4220_v9 = vpop.f32.mrf.mxu1  ;;  %v1545_v1 = vor.u32 %v1544_v58, %v1541_v57  ;;  %v3489_v57 = vld [vmem:[#allocation2 + $0x60] sm:$0xff]  ;;  %v2207_v58 = vor.u32 %v2206_v41, %v2202_v40  ;;  %v2224_v41 = vshll.u32 %v4289_v23, 16 }
  0xae   : > { %1691 = vmatmul.bf16.gmra.mxu0 %v1599_v6  ;;  %897 = vmatmul.bf16.gmra.mxu1 %v3456_v10  ;;  %v1021_v6 = vunpack.c.l.b16 %v987_v42  ;;  %v1022_v10 = vunpack.c.l.b16 %v990_v54  ;;  %v1593_v54 = vunpack.c.l.b16 %v1561_v46 }
  0xb0   : > { %v1030_v19 = vpack.c.b16 %v1022_v10, %v1021_v6  ;;  %v2212_v6 = vrot.slane %v2210_v32, 5  ;;  %v2543_v10 = vld [vmem:[#allocation2 + $0x18] sm:$0xe] }
  0xb3   : > { %v4239_v38 = vpop.f32.mrf.mxu1 }
  0xb4   : > { %1125 = vmatmul.bf16.gmra.mxu2 %v1029_v27  ;;  %v4246_v44 = vpop.f32.mrf.mxu2  ;;  %v1546_v27 = vrot.slane %v1545_v1, 4  ;;  %v2198_v1 = vrot.slane %v2197_v56, 4 }
  0xb6   : > { %v1551_v18 = vsel %vm3819_vm2, %v1546_v27, %v1550_v59  ;;  %v2203_v26 = vsel %vm3819_vm2, %v2198_v1, %v2202_v40  ;;  %v1764_v27 = vrot.slane %v4039_v53, 5  ;;  %v3514_v40 = vld [vmem:[#allocation2 + $0x18] sm:$0xff] }
  0xb7   : > { %v4249_v60 = vpop.f32.mrf.mxu0  ;;  %v1592_v42 = vunpack.c.l.b16 %v1551_v18  ;;  %v2228_v18 = vshrl.u32 %v4289_v23, 16  ;;  %v2398_v53 = vunpack.c.l.b16 %v2203_v26 }
  0xb8   : > { %v4251_v62 = vpop.f32.mrf.mxu3 }
  0xb9   : > { %1319 = vmatmul.bf16.gmra.mxu3 %v3488_v50  ;;  %v1758_v50 = vsel %vm3989_vm5, %v3271_v31, %v1757_v14  ;;  %v1601_v11 = vpack.c.b16 %v1593_v54, %v1592_v42  ;;  %v2169_v14 = vld [vmem:[#allocation2 + $0x24] sm:$0xf]  ;;  %v2226_v42 = vrot.slane %v2224_v41, 5  ;;  %v2230_v54 = vrot.slane %v2228_v18, 4 }
  0xba   : > { %v1827_v59 = vunpack.c.l.b16 %v1758_v50  ;;  %v2215_v31 = vshrl.u32 %v2169_v14, 16  ;;  %v2218_v34 = vshll.u32 %v2169_v14, 16  ;;  %v3272_v50 = vrot.slane %v1724_v13, 9 }
  0xbb   : > { %v4262_v25 = vpop.f32.mrf.mxu1 }
  0xbc   : > { %v4265_v22 = vpop.f32.mrf.mxu2  ;;  %v2220_v32 = vrot.slane %v2218_v34, 5 }
  0xbe   : > { %1696 = vmatmul.bf16.gmra.mxu0 %v1600_v0  ;;  %902 = vmatmul.bf16.gmra.mxu1 %v3457_v5  ;;  %v1828_v0 = vunpack.c.l.b16 %v1761_v51  ;;  %v2208_v5 = vrot.slane %v2207_v58, 4  ;;  %v1767_v51 = vrot.slane %v4055_v17, 5  ;;  %v2217_v58 = vrot.slane %v2215_v31, 4  ;;  %v2172_v31 = vld [vmem:[#allocation2 + $0x30] sm:$0xf] }
  0xbf   : > { %v4270_v36 = vpop.f32.mrf.mxu0 }
  0xc0   : > { %v4272_v47 = vpop.f32.mrf.mxu3  ;;  %v1843_v21 = vpack.c.b16 %v1828_v0, %v1827_v59  ;;  %v2213_v4 = vsel %vm3819_vm2, %v2208_v5, %v2212_v6  ;;  %v4310_v0 = vld [vmem:[#allocation2 + $0x2c] sm:$0x1]  ;;  %v1765_v6 = vsel %vm3989_vm5, %v3272_v50, %v1764_v27 }
  0xc1   : > { %v2399_v56 = vunpack.c.l.b16 %v2213_v4  ;;  %v2234_v26 = vshll.u32 %v4310_v0, 16  ;;  %v1829_v4 = vunpack.c.l.b16 %v1765_v6 }
  0xc3   : > { %v4278_v49 = vpop.f32.mrf.mxu1  ;;  %v2236_v18 = vrot.slane %v2234_v26, 5 }
  0xc4   : > { %1130 = vmatmul.bf16.gmra.mxu2 %v1030_v19  ;;  %v3407_v19 = vrot.slane %v2543_v10, 9 }
  0xc7   : > { %v4284_v48 = vpop.f32.mrf.mxu2 }
  0xc9   : > { %1324 = vmatmul.bf16.gmra.mxu3 %v3489_v57  ;;  %v2578_v57 = vsel %vm3989_vm5, %v3407_v19, %v2577_v15  ;;  %v2648_v15 = vunpack.c.l.b16 %v2581_v45  ;;  %v1771_v45 = vrot.slane %v4067_v39, 5 }
  0xca   : > { %v2647_v5 = vunpack.c.l.b16 %v2578_v57  ;;  %v2252_v57 = vshrl.u32 %v4320_v2, 16 }
  0xcb   : > { %v4287_v20 = vpop.f32.mrf.mxu0  ;;  %v868_v16 = vpop.f32.mrf.mxu1 }
  0xcc   : > { %v4291_v24 = vpop.f32.mrf.mxu3  ;;  %v869_v29 = vadd.f32 %v868_v16, %v4249_v60  ;;  %v1766_v60 = vrot.slane %v1764_v27, 4  ;;  %v2231_v16 = vor.u32 %v2230_v54, %v2226_v42  ;;  %v2663_v27 = vpack.c.b16 %v2648_v15, %v2647_v5 }
  0xce   : > { %1701 = vmatmul.bf16.gmra.mxu0 %v1601_v11  ;;  %1915 = vmatmul.bf16.vlgmr.msra.gmra.mxu1 %v1843_v21  ;;  %v1768_v10 = vsel %vm3989_vm5, %v1766_v60, %v1767_v51  ;;  %v2414_v11 = vpack.c.b16 %v2399_v56, %v2398_v53  ;;  %v2221_v21 = vor.u32 %v2220_v32, %v2217_v58  ;;  %v2232_v41 = vrot.slane %v2231_v16, 4  ;;  %v1725_v32 = vld [vmem:[#allocation2 + $0x24] sm:$0xe] }
  0xcf   : > { %v4301_v46 = vpop.f32.mrf.mxu2  ;;  %v1830_v13 = vunpack.c.l.b16 %v1768_v10  ;;  %v2584_v53 = vrot.slane %v4289_v23, 5  ;;  %v2242_v51 = vshll.u32 %v2172_v31, 16  ;;  %v2248_v56 = vshll.u32 %v4320_v2, 16 }
  0xd0   : > { %v2222_v35 = vrot.slane %v2221_v21, 4  ;;  %v2237_v6 = vsel %vm3819_vm2, %v2232_v41, %v2236_v18  ;;  %v3273_v16 = vrot.slane %v1725_v32, 9 }
  0xd1   : > { %v1844_v60 = vpack.c.b16 %v1830_v13, %v1829_v4  ;;  %v2586_v10 = vrot.slane %v2584_v53, 4  ;;  %v2244_v26 = vrot.slane %v2242_v51, 5  ;;  %v2250_v39 = vrot.slane %v2248_v56, 5 }
  0xd2   : > { %v1773_v13 = vrot.slane %v1771_v45, 4 }
  0xd3   : > { %v4308_v59 = vpop.f32.mrf.mxu0  ;;  %v870_v17 = vpop.f32.mrf.mxu1 }
  0xd4   : > { %v4312_v1 = vpop.f32.mrf.mxu3  ;;  %2109 = vmatmul.bf16.vlgmr.msra.gmra.mxu2 %v3514_v40  ;;  %v871_v14 = vadd.f32 %v870_v17, %v4270_v36  ;;  %v2544_v40 = vld [vmem:[#allocation2 + $0x24] sm:$0xe]  ;;  %v2239_v36 = vshrl.u32 %v2172_v31, 16  ;;  %v2227_v17 = vsel %vm3819_vm2, %v2222_v35, %v2226_v42  ;;  %v1774_v42 = vrot.slane %v4092_v8, 5  ;;  %v2174_v35 = vld [vmem:[#allocation2 + $0x38] sm:$0x1] }
  0xd5   : > { %v3408_v23 = vrot.slane %v2544_v40, 9  ;;  %v2258_v51 = vshll.u32 %v2174_v35, 16 }
  0xd6   : > { %v2241_v15 = vrot.slane %v2239_v36, 4  ;;  %v1775_v8 = vsel %vm3989_vm5, %v1773_v13, %v1774_v42 }
  0xd7   : > { %v1096_v19 = vpop.f32.mrf.mxu2 }
  0xd8   : > { %v1136_v34 = vadd.f32 %v1096_v19, %v869_v29  ;;  %v2254_v19 = vrot.slane %v2252_v57, 4  ;;  %v2245_v40 = vor.u32 %v2244_v26, %v2241_v15  ;;  %v2260_v15 = vrot.slane %v2258_v51, 5 }
  0xd9   : > { %2486 = vmatmul.bf16.vlgmr.msra.gmra.mxu3 %v2414_v11  ;;  %v2587_v11 = vrot.slane %v4310_v0, 5  ;;  %v2585_v0 = vsel %vm3989_vm5, %v3408_v23, %v2584_v53 }
  0xda   : > { %v2649_v53 = vunpack.c.l.b16 %v2585_v0  ;;  %v2246_v23 = vrot.slane %v2245_v40, 4  ;;  %v1726_v0 = vld [vmem:[#allocation2 + $0x30] sm:$0xe] }
  0xdb   : > { %v1667_v50 = vpop.f32.mrf.mxu0  ;;  %v873_v29 = vpop.f32.mrf.mxu1  ;;  %v2588_v18 = vsel %vm3989_vm5, %v2586_v10, %v2587_v11  ;;  %v2591_v10 = vrot.slane %v4320_v2, 5 }
  0xdc   : > { %v1290_v58 = vpop.f32.mrf.mxu3  ;;  %v874_v5 = vadd.f32 %v873_v29, %v4287_v20  ;;  %v3515_v20 = vld [vmem:[#allocation2 + $0x24] sm:$0xff]  ;;  %v2650_v29 = vunpack.c.l.b16 %v2588_v18  ;;  %v2251_v13 = vsel %vm3819_vm2, %v2246_v23, %v2250_v39  ;;  %v1778_v18 = vrot.slane %v4107_v33, 5 }
  0xdd   : > { %v1330_v54 = vadd.f32 %v1290_v58, %v1136_v34  ;;  %v2400_v34 = vunpack.c.l.b16 %v2227_v17  ;;  %v1832_v17 = vunpack.c.l.b16 %v1775_v8  ;;  %v2593_v42 = vrot.slane %v2591_v10, 4 }
  0xde   : > { %2735 = vmatmul.bf16.vlgmr.msra.gmra.mxu0 %v2663_v27  ;;  %1920 = vmatmul.bf16.gmra.mxu1 %v1844_v60  ;;  %v2401_v27 = vunpack.c.l.b16 %v2237_v6  ;;  %v1772_v60 = vsel %vm3989_vm5, %v3273_v16, %v1771_v45  ;;  %v2545_v6 = vld [vmem:[#allocation2 + $0x30] sm:$0xe]  ;;  %v2664_v16 = vpack.c.b16 %v2650_v29, %v2649_v53  ;;  %v1780_v29 = vrot.slane %v1778_v18, 4 }
  0xdf   : > { %v1098_v21 = vpop.f32.mrf.mxu2  ;;  %v4333_v31 = vadd.f32 %v1667_v50, %v1330_v54  ;;  %v2255_v50 = vor.u32 %v2254_v19, %v2250_v39  ;;  %v1831_v54 = vunpack.c.l.b16 %v1772_v60  ;;  %v3409_v26 = vrot.slane %v2545_v6, 9  ;;  %v4345_v19 = vld [vmem:[#allocation2 + $0x40] sm:$0xf]  ;;  %v3516_v53 = vld [vmem:[#allocation2 + $0x30] sm:$0xff] }
  0xe0   : > { %v1137_v4 = vadd.f32 %v1098_v21, %v871_v14  ;;  %v2415_v57 = vpack.c.b16 %v2401_v27, %v2400_v34  ;;  %v2175_v21 = vld [vmem:[#allocation2 + $0x3c] sm:$0xf]  ;;  %v2594_v34 = vrot.slane %v2174_v35, 5  ;;  %v2272_v60 = vshll.u32 %v4345_v19, 16 }
  0xe1   : > { %v2256_v45 = vrot.slane %v2255_v50, 4  ;;  %v2263_v40 = vshrl.u32 %v2175_v21, 16  ;;  %v2276_v8 = vshrl.u32 %v4345_v19, 16  ;;  %v2402_v39 = vunpack.c.l.b16 %v2251_v13 }
  0xe2   : > { %v2592_v51 = vsel %vm3989_vm5, %v3409_v26, %v2591_v10  ;;  %v2595_v33 = vsel %vm3989_vm5, %v2593_v42, %v2594_v34  ;;  %v2274_v23 = vrot.slane %v2272_v60, 5 }
  0xe3   : > { %v1669_v41 = vpop.f32.mrf.mxu0  ;;  %v875_v14 = vpop.f32.mrf.mxu1  ;;  %v2278_v6 = vrot.slane %v2276_v8, 4 }
  0xe4   : > { %v1292_v36 = vpop.f32.mrf.mxu3  ;;  %2114 = vmatmul.bf16.gmra.mxu2 %v3515_v20  ;;  %v876_v58 = vadd.f32 %v875_v14, %v4308_v59  ;;  %v1845_v20 = vpack.c.b16 %v1832_v17, %v1831_v54  ;;  %v2265_v54 = vrot.slane %v2263_v40, 4 }
  0xe5   : > { %v1331_v56 = vadd.f32 %v1292_v36, %v1137_v4  ;;  %v2266_v36 = vshll.u32 %v2175_v21, 16  ;;  %v2279_v42 = vor.u32 %v2278_v6, %v2274_v23 }
  0xe7   : > { %v1101_v32 = vpop.f32.mrf.mxu2  ;;  %v4347_v4 = vadd.f32 %v1669_v41, %v1331_v56  ;;  %v3274_v56 = vrot.slane %v1726_v0, 9  ;;  %v2268_v17 = vrot.slane %v2266_v36, 5  ;;  %v2178_v0 = vld [vmem:[#allocation2 + $0x48] sm:$0xf]  ;;  %v4372_v36 = vld [vmem:[#allocation2 + $0x4c] sm:$0xf] }
  0xe8   : > { %v1138_v11 = vadd.f32 %v1101_v32, %v874_v5  ;;  %v2261_v5 = vsel %vm3819_vm2, %v2256_v45, %v2260_v15  ;;  %v2651_v45 = vunpack.c.l.b16 %v2592_v51  ;;  %v4364_v15 = vld [vmem:[#allocation2 + $0x44] sm:$0x1]  ;;  %v2280_v60 = vrot.slane %v2279_v42, 4 }
  0xe9   : > { %2491 = vmatmul.bf16.gmra.mxu3 %v2415_v57  ;;  %v2403_v50 = vunpack.c.l.b16 %v2261_v5  ;;  %v2269_v13 = vor.u32 %v2268_v17, %v2265_v54  ;;  %v2282_v34 = vshll.u32 %v4364_v15, 16  ;;  %v1785_v54 = vrot.slane %v4122_v61, 5 }
  0xeb   : > { %v1672_v59 = vpop.f32.mrf.mxu0  ;;  %v878_v2 = vpop.f32.mrf.mxu1  ;;  %v2416_v21 = vpack.c.b16 %v2403_v50, %v2402_v39  ;;  %v2284_v8 = vrot.slane %v2282_v34, 5  ;;  %v2546_v39 = vld [vmem:[#allocation2 + $0x3c] sm:$0xe]  ;;  %v1787_v42 = vrot.slane %v1785_v54, 4 }
  0xec   : > { %v1295_v27 = vpop.f32.mrf.mxu3  ;;  %v879_v41 = vadd.f32 %v878_v2, %v4220_v9  ;;  %v1781_v9 = vrot.slane %v4116_v52, 5 }
  0xed   : > { %v1332_v14 = vadd.f32 %v1295_v27, %v1138_v11 }
  0xee   : > { %2740 = vmatmul.bf16.gmra.mxu0 %v2664_v16  ;;  %1925 = vmatmul.bf16.gmra.mxu1 %v1845_v20  ;;  %v2652_v16 = vunpack.c.l.b16 %v2595_v33  ;;  %v1782_v52 = vsel %vm3989_vm5, %v1780_v29, %v1781_v9  ;;  %v1727_v9 = vld [vmem:[#allocation2 + $0x3c] sm:$0xe] }
  0xef   : > { %v1103_v35 = vpop.f32.mrf.mxu2  ;;  %v4362_v32 = vadd.f32 %v1672_v59, %v1332_v14  ;;  %v1834_v5 = vunpack.c.l.b16 %v1782_v52 }
  0xf0   : > { %v1139_v57 = vadd.f32 %v1103_v35, %v876_v58  ;;  %v1779_v58 = vsel %vm3989_vm5, %v3274_v56, %v1778_v18  ;;  %v2665_v14 = vpack.c.b16 %v2652_v16, %v2651_v45  ;;  %v2270_v18 = vrot.slane %v2269_v13, 4 }
  0xf1   : > { %v1833_v2 = vunpack.c.l.b16 %v1779_v58  ;;  %v2598_v35 = vrot.slane %v4345_v19, 5  ;;  %v2290_v56 = vshll.u32 %v2178_v0, 16  ;;  %v3410_v45 = vrot.slane %v2546_v39, 9 }
  0xf2   : > { %v2601_v19 = vrot.slane %v4364_v15, 5  ;;  %v3275_v58 = vrot.slane %v1727_v9, 9  ;;  %v1788_v15 = vrot.slane %v4143_v28, 5 }
  0xf3   : > { %v1674_v11 = vpop.f32.mrf.mxu0  ;;  %v880_v26 = vpop.f32.mrf.mxu1  ;;  %v1846_v33 = vpack.c.b16 %v1834_v5, %v1833_v2  ;;  %v2292_v52 = vrot.slane %v2290_v56, 5  ;;  %v4389_v2 = vld [vmem:[#allocation2 + $0x50] sm:$0x1] }
  0xf4   : > { %v1297_v10 = vpop.f32.mrf.mxu3  ;;  %2119 = vmatmul.bf16.gmra.mxu2 %v3516_v53  ;;  %v881_v20 = vadd.f32 %v880_v26, %v4239_v38  ;;  %v2287_v38 = vshrl.u32 %v2178_v0, 16  ;;  %v2599_v0 = vsel %vm3989_vm5, %v3410_v45, %v2598_v35  ;;  %v1786_v28 = vsel %vm3989_vm5, %v3275_v58, %v1785_v54  ;;  %v2181_v54 = vld [vmem:[#allocation2 + $0x54] sm:$0xf] }
  0xf5   : > { %v1333_v59 = vadd.f32 %v1297_v10, %v1139_v57  ;;  %v2296_v57 = vshll.u32 %v4372_v36, 16  ;;  %v2285_v10 = vsel %vm3819_vm2, %v2280_v60, %v2284_v8  ;;  %v1789_v60 = vsel %vm3989_vm5, %v1787_v42, %v1788_v15 }
  0xf6   : > { %v2289_v16 = vrot.slane %v2287_v38, 4  ;;  %v2306_v39 = vshll.u32 %v4389_v2, 16  ;;  %v2311_v42 = vshrl.u32 %v2181_v54, 16 }
  0xf7   : > { %v1106_v27 = vpop.f32.mrf.mxu2  ;;  %v4375_v50 = vadd.f32 %v1674_v11, %v1333_v59  ;;  %v2275_v11 = vsel %vm3819_vm2, %v2270_v18, %v2274_v23  ;;  %v2298_v61 = vrot.slane %v2296_v57, 5  ;;  %v2405_v23 = vunpack.c.l.b16 %v2285_v10 }
  0xf8   : > { %v1140_v40 = vadd.f32 %v1106_v27, %v879_v41  ;;  %v2300_v41 = vshrl.u32 %v4372_v36, 16  ;;  %v2404_v27 = vunpack.c.l.b16 %v2275_v11  ;;  %v2308_v45 = vrot.slane %v2306_v39, 5  ;;  %v4401_v11 = vld [vmem:[#allocation2 + $0x58] sm:$0xf] }
  0xf9   : > { %2496 = vmatmul.bf16.gmra.mxu3 %v2416_v21  ;;  %v2600_v21 = vrot.slane %v2598_v35, 4 }
  0xfa   : > { %v2302_v59 = vrot.slane %v2300_v41, 4  ;;  %v1835_v41 = vunpack.c.l.b16 %v1786_v28 }
  0xfb   : > { %v1677_v51 = vpop.f32.mrf.mxu0  ;;  %v883_v29 = vpop.f32.mrf.mxu1 }
  0xfc   : > { %v1300_v53 = vpop.f32.mrf.mxu3  ;;  %v884_v6 = vadd.f32 %v883_v29, %v4262_v25  ;;  %v3517_v25 = vld [vmem:[#allocation2 + $0x3c] sm:$0xff]  ;;  %v2303_v8 = vor.u32 %v2302_v59, %v2298_v61 }
  0xfd   : > { %v1334_v17 = vadd.f32 %v1300_v53, %v1140_v40  ;;  %v2602_v40 = vsel %vm3989_vm5, %v2600_v21, %v2601_v19  ;;  %v1836_v53 = vunpack.c.l.b16 %v1789_v60  ;;  %v3518_v60 = vld [vmem:[#allocation2 + $0x48] sm:$0xff] }
  0xfe   : > { %2745 = vmatmul.bf16.gmra.mxu0 %v2665_v14  ;;  %1930 = vmatmul.bf16.gmra.mxu1 %v1846_v33  ;;  %v2293_v14 = vor.u32 %v2292_v52, %v2289_v16  ;;  %v2653_v33 = vunpack.c.l.b16 %v2599_v0  ;;  %v2654_v56 = vunpack.c.l.b16 %v2602_v40  ;;  %v2608_v0 = vrot.slane %v4389_v2, 5 }
  0xff   : > { %v1108_v26 = vpop.f32.mrf.mxu2  ;;  %v4387_v34 = vadd.f32 %v1677_v51, %v1334_v17  ;;  %v2417_v51 = vpack.c.b16 %v2405_v23, %v2404_v27  ;;  %v2304_v17 = vrot.slane %v2303_v8, 4  ;;  %v1847_v16 = vpack.c.b16 %v1836_v53, %v1835_v41 }
 0x100   : > { %v1141_v13 = vadd.f32 %v1108_v26, %v881_v20  ;;  %v2294_v9 = vrot.slane %v2293_v14, 4  ;;  %v2666_v19 = vpack.c.b16 %v2654_v56, %v2653_v33  ;;  %v2547_v26 = vld [vmem:[#allocation2 + $0x48] sm:$0xe]  ;;  %v2314_v27 = vshll.u32 %v2181_v54, 16 }
 0x101   : > { %v2309_v59 = vsel %vm3819_vm2, %v2304_v17, %v2308_v45  ;;  %v2320_v23 = vshll.u32 %v4401_v11, 16  ;;  %v1795_v8 = vrot.slane %v4185_v12, 5 }
 0x102   : > { %v2407_v14 = vunpack.c.l.b16 %v2309_v59 }
 0x103   : > { %v1679_v5 = vpop.f32.mrf.mxu0  ;;  %v885_v20 = vpop.f32.mrf.mxu1  ;;  %v4417_v33 = vrot.slane %v2320_v23, 5 }
 0x104   : > { %v1302_v18 = vpop.f32.mrf.mxu3  ;;  %2124 = vmatmul.bf16.gmra.mxu2 %v3517_v25  ;;  %v886_v35 = vadd.f32 %v885_v20, %v4278_v49  ;;  %v2605_v49 = vrot.slane %v4372_v36, 5  ;;  %v1792_v25 = vrot.slane %v4169_v55, 5  ;;  %v3411_v36 = vrot.slane %v2547_v26, 9 }
 0x105   : > { %v1335_v38 = vadd.f32 %v1302_v18, %v1141_v13  ;;  %v1728_v13 = vld [vmem:[#allocation2 + $0x48] sm:$0xe] }
 0x106   : > { %v2607_v18 = vrot.slane %v2605_v49, 4  ;;  %v3276_v20 = vrot.slane %v1728_v13, 9  ;;  %v1794_v55 = vrot.slane %v1792_v25, 4  ;;  %v2606_v41 = vsel %vm3989_vm5, %v3411_v36, %v2605_v49  ;;  %v373_v13 = vld [vmem:[%s4183_s30 + $0xc] sm:$0xff]   ;;  %v2548_v36 = vld [vmem:[#allocation2 + $0x54] sm:$0xe] }
 0x107   : > { %v1111_v57 = vpop.f32.mrf.mxu2  ;;  %v4403_v10 = vadd.f32 %v1679_v5, %v1335_v38  ;;  %v2324_v5 = vshrl.u32 %v4401_v11, 16  ;;  %v2313_v38 = vrot.slane %v2311_v42, 4  ;;  %v2655_v26 = vunpack.c.l.b16 %v2606_v41  ;;  %380 = vst [vmem:[#allocation2 + $0x6c] sm:$0xff] %v373_v13  }
 0x108   : > { %v1142_v29 = vadd.f32 %v1111_v57, %v884_v6  ;;  %v2299_v6 = vsel %vm3819_vm2, %v2294_v9, %v2298_v61  ;;  %v4419_v57 = vld [vmem:[#allocation2 + $0x5c] sm:$0x1]  ;;  %v1793_v9 = vsel %vm3989_vm5, %v3276_v20, %v1792_v25  ;;  %v1796_v17 = vsel %vm3989_vm5, %v1794_v55, %v1795_v8  ;;  %v2184_v25 = vld [vmem:[#allocation2 + $0x60] sm:$0xf] }
 0x109   : > { %2501 = vmatmul.bf16.gmra.mxu3 %v2417_v51  ;;  %v2406_v61 = vunpack.c.l.b16 %v2299_v6  ;;  %v2316_v51 = vrot.slane %v2314_v27, 5  ;;  %v2326_v56 = vrot.slane %v2324_v5, 4  ;;  %v1837_v6 = vunpack.c.l.b16 %v1793_v9 }
 0x10a   : > { %v1838_v59 = vunpack.c.l.b16 %v1796_v17  ;;  %v2338_v20 = vshll.u32 %v2184_v25, 16  ;;  %v1799_v55 = vrot.slane %v4203_v37, 5 }
 0x10b   : > { %v1682_v21 = vpop.f32.mrf.mxu0  ;;  %v888_v52 = vpop.f32.mrf.mxu1  ;;  %v2418_v12 = vpack.c.b16 %v2407_v14, %v2406_v61  ;;  %v2317_v54 = vor.u32 %v2316_v51, %v2313_v38  ;;  %v2612_v14 = vrot.slane %v4401_v11, 5  ;;  %v3412_v38 = vrot.slane %v2548_v36, 9  ;;  %v1729_v51 = vld [vmem:[#allocation2 + $0x54] sm:$0xe] }
 0x10c   : > { %v1305_v58 = vpop.f32.mrf.mxu3  ;;  %v1848_v61 = vpack.c.b16 %v1838_v59, %v1837_v6  ;;  %v2340_v17 = vrot.slane %v2338_v20, 5 }
 0x10d   : > { %v1336_v15 = vadd.f32 %v1305_v58, %v1142_v29 }
 0x10e   : > { %2750 = vmatmul.bf16.gmra.mxu0 %v2666_v19  ;;  %1935 = vmatmul.bf16.gmra.mxu1 %v1847_v16  ;;  %v2327_v19 = vor.u32 %v2326_v56, %v4417_v33  ;;  %v889_v16 = vadd.f32 %v888_v52, %v4246_v44 }
 0x10f   : > { %v1113_v40 = vpop.f32.mrf.mxu2  ;;  %v4415_v39 = vadd.f32 %v1682_v21, %v1336_v15  ;;  %v2330_v21 = vshll.u32 %v4419_v57, 16  ;;  %v2318_v15 = vrot.slane %v2317_v54, 4 }
 0x110   : > { %v1143_v28 = vadd.f32 %v1113_v40, %v886_v35  ;;  %v2609_v35 = vsel %vm3989_vm5, %v2607_v18, %v2608_v0  ;;  %v2328_v27 = vrot.slane %v2327_v19, 4  ;;  %v4433_v0 = vld [vmem:[#allocation2 + $0x64] sm:$0xf]  ;;  %v375_v40 = vld [vmem:[%s4183_s30 + $0x14] sm:$0x1]  ;;  %v2335_v18 = vshrl.u32 %v2184_v25, 16 }
 0x111   : > { %v2656_v49 = vunpack.c.l.b16 %v2609_v35  ;;  %v2332_v23 = vrot.slane %v2330_v21, 5  ;;  %382 = vst [vmem:[#allocation2 + $0x74] sm:$0x1] %v375_v40  ;;  %v2344_v56 = vshll.u32 %v4433_v0, 16  ;;  %v2348_v41 = vshrl.u32 %v4433_v0, 16  ;;  %v3519_v19 = vld [vmem:[#allocation2 + $0x54] sm:$0xff] }
 0x112   : > { %v2323_v11 = vsel %vm3819_vm2, %v2318_v15, %v4417_v33  ;;  %v2337_v9 = vrot.slane %v2335_v18, 4  ;;  %v3277_v21 = vrot.slane %v1729_v51, 9  ;;  %v2549_v51 = vld [vmem:[#allocation2 + $0x60] sm:$0xe] }
 0x113   : > { %v1684_v2 = vpop.f32.mrf.mxu0  ;;  %v890_v29 = vpop.f32.mrf.mxu1  ;;  %v2667_v5 = vpack.c.b16 %v2656_v49, %v2655_v26  ;;  %v2333_v35 = vsel %vm3819_vm2, %v2328_v27, %v2332_v23  ;;  %v2346_v26 = vrot.slane %v2344_v56, 5  ;;  %v2350_v49 = vrot.slane %v2348_v41, 4 }
 0x114   : > { %v1307_v53 = vpop.f32.mrf.mxu3  ;;  %2129 = vmatmul.bf16.gmra.mxu2 %v3518_v60  ;;  %v2409_v33 = vunpack.c.l.b16 %v2333_v35  ;;  %v1800_v25 = vsel %vm3989_vm5, %v3277_v21, %v1799_v55  ;;  %v2341_v15 = vor.u32 %v2340_v17, %v2337_v9  ;;  %v2619_v56 = vrot.slane %v4433_v0, 5 }
 0x115   : > { %v1337_v45 = vadd.f32 %v1307_v53, %v1143_v28  ;;  %v2615_v53 = vrot.slane %v4419_v57, 5  ;;  %v2613_v57 = vsel %vm3989_vm5, %v3412_v38, %v2612_v14  ;;  %v1839_v18 = vunpack.c.l.b16 %v1800_v25 }
 0x116   : > { %v3413_v9 = vrot.slane %v2549_v51, 9  ;;  %v2621_v21 = vrot.slane %v2619_v56, 4  ;;  %v1809_v25 = vrot.slane %v4257_v7, 5 }
 0x117   : > { %v1116_v58 = vpop.f32.mrf.mxu2  ;;  %v4436_v44 = vadd.f32 %v1684_v2, %v1337_v45  ;;  %v891_v2 = vadd.f32 %v890_v29, %v4265_v22  ;;  %v1801_v22 = vrot.slane %v1799_v55, 4  ;;  %v1802_v29 = vrot.slane %v4214_v3, 5 }
 0x118   : > { %v1144_v42 = vadd.f32 %v1116_v58, %v889_v16  ;;  %v2408_v16 = vunpack.c.l.b16 %v2323_v11  ;;  %v2186_v58 = vld [vmem:[#allocation2 + $0x68] sm:$0x1] }
 0x119   : > { %2506 = vmatmul.bf16.gmra.mxu3 %v2418_v12  ;;  %v2614_v12 = vrot.slane %v2612_v14, 4  ;;  %v1803_v3 = vsel %vm3989_vm5, %v1801_v22, %v1802_v29  ;;  %v2354_v36 = vshll.u32 %v2186_v58, 16  ;;  %v2622_v17 = vrot.slane %v2186_v58, 5  ;;  %v1730_v22 = vld [vmem:[#allocation2 + $0x60] sm:$0xe] }
 0x11a   : > { %v2419_v23 = vpack.c.b16 %v2409_v33, %v2408_v16  ;;  %v1840_v20 = vunpack.c.l.b16 %v1803_v3 }
 0x11b   : > { %v1687_v52 = vpop.f32.mrf.mxu0  ;;  %v893_v60 = vpop.f32.mrf.mxu1  ;;  %v2616_v59 = vsel %vm3989_vm5, %v2614_v12, %v2615_v53  ;;  %v2356_v55 = vrot.slane %v2354_v36, 5 }
 0x11c   : > { %v1310_v28 = vpop.f32.mrf.mxu3  ;;  %v894_v40 = vadd.f32 %v893_v60, %v4284_v48  ;;  %v1849_v53 = vpack.c.b16 %v1840_v20, %v1839_v18  ;;  %v4464_v48 = vld [vmem:[#allocation2 + $0x70] sm:$0xf] }
 0x11d   : > { %v1338_v8 = vadd.f32 %v1310_v28, %v1144_v42 }
 0x11e   : > { %2755 = vmatmul.bf16.gmra.mxu0 %v2667_v5  ;;  %1940 = vmatmul.bf16.gmra.mxu1 %v1848_v61  ;;  %v2351_v5 = vor.u32 %v2350_v49, %v2346_v26  ;;  %v2658_v61 = vunpack.c.l.b16 %v2616_v59  ;;  %v2368_v49 = vshll.u32 %v4464_v48, 16  ;;  %v3278_v59 = vrot.slane %v1730_v22, 9 }
 0x11f   : > { %v1118_v37 = vpop.f32.mrf.mxu2  ;;  %v4449_v45 = vadd.f32 %v1687_v52, %v1338_v8  ;;  %v2657_v52 = vunpack.c.l.b16 %v2613_v57  ;;  %v2342_v8 = vrot.slane %v2341_v15, 4  ;;  %v3520_v57 = vld [vmem:[#allocation2 + $0x60] sm:$0xff]  ;;  %v2626_v22 = vrot.slane %v4464_v48, 5 }
 0x120   : > { %v1145_v54 = vadd.f32 %v1118_v37, %v891_v2  ;;  %v2352_v38 = vrot.slane %v2351_v5, 4  ;;  %v2187_v2 = vld [vmem:[#allocation2 + $0x6c] sm:$0xf]  ;;  %v2370_v5 = vrot.slane %v2368_v49, 5 }
 0x121   : > { %v2668_v41 = vpack.c.b16 %v2658_v61, %v2657_v52  ;;  %v2347_v12 = vsel %vm3819_vm2, %v2342_v8, %v2346_v26  ;;  %v2359_v29 = vshrl.u32 %v2187_v2, 16  ;;  %v2362_v33 = vshll.u32 %v2187_v2, 16  ;;  %v2189_v52 = vld [vmem:[#allocation2 + $0x74] sm:$0x1] }
 0x122   : > { %v2357_v0 = vsel %vm3819_vm2, %v2352_v38, %v2356_v55  ;;  %v2410_v3 = vunpack.c.l.b16 %v2347_v12 }
 0x123   : > { %v1689_v6 = vpop.f32.mrf.mxu0  ;;  %v895_v42 = vpop.f32.mrf.mxu1  ;;  %v2411_v15 = vunpack.c.l.b16 %v2357_v0 }
 0x124   : > { %v1312_v13 = vpop.f32.mrf.mxu3  ;;  %2134 = vmatmul.bf16.gmra.mxu2 %v3519_v19  ;;  %v896_v16 = vadd.f32 %v895_v42, %v4301_v46  ;;  %v2620_v46 = vsel %vm3989_vm5, %v3413_v9, %v2619_v56  ;;  %v2623_v42 = vsel %vm3989_vm5, %v2621_v21, %v2622_v17 }
 0x125   : > { %v1339_v27 = vadd.f32 %v1312_v13, %v1145_v54  ;;  %v1806_v54 = vrot.slane %v4233_v30, 5  ;;  %v2659_v8 = vunpack.c.l.b16 %v2620_v46  ;;  %v2660_v38 = vunpack.c.l.b16 %v2623_v42 }
 0x127   : > { %v1121_v14 = vpop.f32.mrf.mxu2  ;;  %v4462_v11 = vadd.f32 %v1689_v6, %v1339_v27  ;;  %v2372_v6 = vshrl.u32 %v4464_v48, 16  ;;  %v1808_v13 = vrot.slane %v1806_v54, 4  ;;  %v2361_v27 = vrot.slane %v2359_v29, 4 }
 0x128   : > { %v1146_v28 = vadd.f32 %v1121_v14, %v894_v40  ;;  %v1807_v7 = vsel %vm3989_vm5, %v3278_v59, %v1806_v54  ;;  %v2669_v9 = vpack.c.b16 %v2660_v38, %v2659_v8  ;;  %v2629_v59 = vrot.slane %v2189_v52, 5 }
 0x129   : > { %2511 = vmatmul.bf16.gmra.mxu3 %v2419_v23  ;;  %v2364_v23 = vrot.slane %v2362_v33, 5  ;;  %v2374_v36 = vrot.slane %v2372_v6, 4  ;;  %v1810_v18 = vsel %vm3989_vm5, %v1808_v13, %v1809_v25  ;;  %v3521_v25 = vld [vmem:[#allocation2 + $0x6c] sm:$0xff] }
 0x12b   : > { %v1692_v35 = vpop.f32.mrf.mxu0  ;;  %v898_v37 = vpop.f32.mrf.mxu1  ;;  %v2365_v51 = vor.u32 %v2364_v23, %v2361_v27  ;;  %v2375_v56 = vor.u32 %v2374_v36, %v2370_v5 }
 0x12c   : > { %v1315_v60 = vpop.f32.mrf.mxu3  ;;  %v899_v55 = vadd.f32 %v898_v37, %v4251_v62  ;;  %v2550_v37 = vld [vmem:[#allocation2 + $0x6c] sm:$0xe] }
 0x12d   : > { %v1340_v19 = vadd.f32 %v1315_v60, %v1146_v28  ;;  %v2420_v28 = vpack.c.b16 %v2411_v15, %v2410_v3  ;;  %v2366_v17 = vrot.slane %v2365_v51, 4  ;;  %v2376_v54 = vrot.slane %v2375_v56, 4 }
 0x12e   : > { %2760 = vmatmul.bf16.gmra.mxu0 %v2668_v41  ;;  %1945 = vmatmul.bf16.gmra.mxu1 %v1849_v53  ;;  %v2378_v41 = vshll.u32 %v2189_v52, 16  ;;  %v1842_v53 = vunpack.c.l.b16 %v1810_v18 }
 0x12f   : > { %v1123_v26 = vpop.f32.mrf.mxu2  ;;  %v4474_v58 = vadd.f32 %v1692_v35, %v1340_v19  ;;  %v1841_v35 = vunpack.c.l.b16 %v1807_v7  ;;  %v2371_v49 = vsel %vm3819_vm2, %v2366_v17, %v2370_v5 }
 0x130   : > { %v1147_v30 = vadd.f32 %v1123_v26, %v896_v16  ;;  %v2380_v19 = vrot.slane %v2378_v41, 5  ;;  %v2412_v3 = vunpack.c.l.b16 %v2371_v49 }
 0x131   : > { %v1850_v21 = vpack.c.b16 %v1842_v53, %v1841_v35 }
 0x132   : > { %v2381_v6 = vsel %vm3819_vm2, %v2376_v54, %v2380_v19 }
 0x133   : > { %v1694_v40 = vpop.f32.mrf.mxu0  ;;  %v900_v14 = vpop.f32.mrf.mxu1  ;;  %v2413_v15 = vunpack.c.l.b16 %v2381_v6 }
 0x134   : > { %v1317_v61 = vpop.f32.mrf.mxu3  ;;  %2139 = vmatmul.bf16.gmra.mxu2 %v3520_v57  ;;  %v901_v33 = vadd.f32 %v900_v14, %v4272_v47  ;;  %v2628_v57 = vrot.slane %v2626_v22, 4 }
 0x135   : > { %v1341_v20 = vadd.f32 %v1317_v61, %v1147_v30  ;;  %v3414_v30 = vrot.slane %v2550_v37, 9  ;;  %v2421_v5 = vpack.c.b16 %v2413_v15, %v2412_v3 }
 0x136   : > { %v2630_v42 = vsel %vm3989_vm5, %v2628_v57, %v2629_v59 }
 0x137   : > { %v1126_v2 = vpop.f32.mrf.mxu2  ;;  %v4486_v60 = vadd.f32 %v1694_v40, %v1341_v20  ;;  %v2627_v47 = vsel %vm3989_vm5, %v3414_v30, %v2626_v22  ;;  %v2662_v52 = vunpack.c.l.b16 %v2630_v42 }
 0x138   : > { %v1148_v12 = vadd.f32 %v1126_v2, %v899_v55  ;;  %v2661_v40 = vunpack.c.l.b16 %v2627_v47 }
 0x139   : > { %2516 = vmatmul.bf16.gmra.mxu3 %v2420_v28 }
 0x13a   : > { %v2670_v18 = vpack.c.b16 %v2662_v52, %v2661_v40 }
 0x13b   : > { %v1697_v0 = vpop.f32.mrf.mxu0  ;;  %v903_v62 = vpop.f32.mrf.mxu1 }
 0x13c   : > { %v1320_v29 = vpop.f32.mrf.mxu3  ;;  %v904_v36 = vadd.f32 %v903_v62, %v4291_v24 }
 0x13d   : > { %v1342_v16 = vadd.f32 %v1320_v29, %v1148_v12 }
 0x13e   : > { %2765 = vmatmul.bf16.gmra.mxu0 %v2669_v9  ;;  %1950 = vmatmul.bf16.gmra.mxu1 %v1850_v21 }
 0x13f   : > { %v1128_v26 = vpop.f32.mrf.mxu2  ;;  %v4494_v13 = vadd.f32 %v1697_v0, %v1342_v16 }
 0x140   : > { %v1149_v48 = vadd.f32 %v1128_v26, %v901_v33 }
 0x143   : > { %v1699_v46 = vpop.f32.mrf.mxu0  ;;  %v905_v27 = vpop.f32.mrf.mxu1 }
 0x144   : > { %v1322_v43 = vpop.f32.mrf.mxu3  ;;  %2144 = vmatmul.bf16.gmra.mxu2 %v3521_v25  ;;  %v906_v38 = vadd.f32 %v905_v27, %v4312_v1 }
 0x145   : > { %v1343_v23 = vadd.f32 %v1322_v43, %v1149_v48 }
 0x147   : > { %v1131_v61 = vpop.f32.mrf.mxu2  ;;  %v4501_v14 = vadd.f32 %v1699_v46, %v1343_v23 }
 0x148   : > { %v1150_v7 = vadd.f32 %v1131_v61, %v904_v36 }
 0x149   : > { %2521 = vmatmul.bf16.gmra.mxu3 %v2421_v5 }
 0x14b   : > { %v1702_v20 = vpop.f32.mrf.mxu0  ;;  %v1916_v63 = vpop.f32.mrf.mxu1 }
 0x14c   : > { %v1325_v28 = vpop.f32.mrf.mxu3  ;;  %v1956_v9 = vadd.f32 %v1916_v63, %v4333_v31 }
 0x14d   : > { %v1344_v8 = vadd.f32 %v1325_v28, %v1150_v7 }
 0x14e   : > { %2770 = vmatmul.bf16.gmra.mxu0 %v2670_v18 }
 0x14f   : > { %v1133_v55 = vpop.f32.mrf.mxu2  ;;  %v4504_v51 = vadd.f32 %v1702_v20, %v1344_v8 }
 0x150   : > { %v1151_v24 = vadd.f32 %v1133_v55, %v906_v38 }
 0x153   : > { %v1704_v56 = vpop.f32.mrf.mxu0  ;;  %v1918_v2 = vpop.f32.mrf.mxu1 }
 0x154   : > { %v1327_v41 = vpop.f32.mrf.mxu3  ;;  %v1957_v1 = vadd.f32 %v1918_v2, %v4347_v4 }
 0x155   : > { %v1345_v35 = vadd.f32 %v1327_v41, %v1151_v24 }
 0x157   : > { %v2110_v53 = vpop.f32.mrf.mxu2  ;;  %v4506_v12 = vadd.f32 %v1704_v56, %v1345_v35 }
 0x158   : > { %v2150_v54 = vadd.f32 %v2110_v53, %v1956_v9 }
 0x15b   : > { %v2736_v17 = vpop.f32.mrf.mxu0  ;;  %v1921_v0 = vpop.f32.mrf.mxu1 }
 0x15c   : > { %v2487_v19 = vpop.f32.mrf.mxu3  ;;  %v1958_v31 = vadd.f32 %v1921_v0, %v4362_v32 }
 0x15d   : > { %v2527_v22 = vadd.f32 %v2487_v19, %v2150_v54 }
 0x15f   : > { %v2112_v21 = vpop.f32.mrf.mxu2  ;;  %v2776_v37 = vadd.f32 %v2736_v17, %v2527_v22 }
 0x160   : > { %v2151_v29 = vadd.f32 %v2112_v21, %v1957_v1 }
 0x161   : > { %v2846_v30 = vmul.f32 %v2776_v37, %v2776_v37 }
 0x163   : > { %v2738_v62 = vpop.f32.mrf.mxu0  ;;  %v1923_v33 = vpop.f32.mrf.mxu1 }
 0x164   : > { %v2489_v16 = vpop.f32.mrf.mxu3  ;;  %v1959_v32 = vadd.f32 %v1923_v33, %v4375_v50 }
 0x165   : > { %v2528_v49 = vadd.f32 %v2489_v16, %v2151_v29 }
 0x167   : > { %v2777_v6 = vadd.f32 %v2738_v62, %v2528_v49  ;;  %v2115_v26 = vpop.f32.mrf.mxu2 }
 0x168   : > { %v2152_v48 = vadd.f32 %v2115_v26, %v1958_v31 }
 0x169   : > { %v3549_v4 = vpack.c.bf16 %v2777_v6, %v2776_v37  ;;  %v2824_v57 = vadd.f32 %v2777_v6, %v2776_v37  ;;  %v2847_v59 = vmul.f32 %v2777_v6, %v2777_v6 }
 0x16b   : > { %3550 = vst [vmem:[%s4515_s5] sm:$0xff] %v3549_v4   ;;  %v2862_v25 = vadd.f32 %v2847_v59, %v2846_v30  ;;  %v2741_v3 = vpop.f32.mrf.mxu0  ;;  %v1926_v46 = vpop.f32.mrf.mxu1 }
 0x16c   : > { %v2492_v15 = vpop.f32.mrf.mxu3  ;;  %v1960_v20 = vadd.f32 %v1926_v46, %v4387_v34 }
 0x16d   : > { %v2529_v47 = vadd.f32 %v2492_v15, %v2152_v48 }
 0x16f   : > { %v2778_v42 = vadd.f32 %v2741_v3, %v2529_v47  ;;  %v2117_v43 = vpop.f32.mrf.mxu2 }
 0x170   : > { %v2153_v5 = vadd.f32 %v2117_v43, %v1959_v32 }
 0x171   : > { %v2825_v27 = vadd.f32 %v2824_v57, %v2778_v42  ;;  %v2848_v23 = vmul.f32 %v2778_v42, %v2778_v42 }
 0x173   : > { %v2863_v36 = vadd.f32 %v2862_v25, %v2848_v23  ;;  %v2743_v40 = vpop.f32.mrf.mxu0  ;;  %v1928_v61 = vpop.f32.mrf.mxu1 }
 0x174   : > { %v2494_v52 = vpop.f32.mrf.mxu3  ;;  %v1961_v53 = vadd.f32 %v1928_v61, %v4403_v10 }
 0x175   : > { %v2530_v7 = vadd.f32 %v2494_v52, %v2153_v5 }
 0x177   : > { %v2779_v18 = vadd.f32 %v2743_v40, %v2530_v7  ;;  %v2120_v28 = vpop.f32.mrf.mxu2 }
 0x178   : > { %v2154_v55 = vadd.f32 %v2120_v28, %v1960_v20 }
 0x179   : > { %v3554_v63 = vpack.c.bf16 %v2779_v18, %v2778_v42  ;;  %v2826_v8 = vadd.f32 %v2825_v27, %v2779_v18  ;;  %v2849_v38 = vmul.f32 %v2779_v18, %v2779_v18 }
 0x17b   : > { %3586 = vst [vmem:[%s4515_s5 + $0x8] sm:$0xff] %v3554_v63   ;;  %v2864_v50 = vadd.f32 %v2863_v36, %v2849_v38  ;;  %v2746_v24 = vpop.f32.mrf.mxu0  ;;  %v1931_v41 = vpop.f32.mrf.mxu1 }
 0x17c   : > { %v2497_v56 = vpop.f32.mrf.mxu3  ;;  %v1962_v62 = vadd.f32 %v1931_v41, %v4415_v39 }
 0x17d   : > { %v2531_v2 = vadd.f32 %v2497_v56, %v2154_v55 }
 0x17f   : > { %v2780_v35 = vadd.f32 %v2746_v24, %v2531_v2  ;;  %v2122_v9 = vpop.f32.mrf.mxu2 }
 0x180   : > { %v2155_v19 = vadd.f32 %v2122_v9, %v1961_v53 }
 0x181   : > { %v2827_v17 = vadd.f32 %v2826_v8, %v2780_v35  ;;  %v2850_v54 = vmul.f32 %v2780_v35, %v2780_v35 }
 0x183   : > { %v2865_v34 = vadd.f32 %v2864_v50, %v2850_v54  ;;  %v2748_v0 = vpop.f32.mrf.mxu0  ;;  %v1933_v21 = vpop.f32.mrf.mxu1 }
 0x184   : > { %v2499_v1 = vpop.f32.mrf.mxu3  ;;  %v1963_v59 = vadd.f32 %v1933_v21, %v4436_v44 }
 0x185   : > { %v2532_v22 = vadd.f32 %v2499_v1, %v2155_v19 }
 0x187   : > { %v2781_v29 = vadd.f32 %v2748_v0, %v2532_v22  ;;  %v2125_v37 = vpop.f32.mrf.mxu2 }
 0x188   : > { %v2156_v6 = vadd.f32 %v2125_v37, %v1962_v62 }
 0x189   : > { %v3559_v16 = vpack.c.bf16 %v2781_v29, %v2780_v35  ;;  %v2828_v33 = vadd.f32 %v2827_v17, %v2781_v29  ;;  %v2851_v49 = vmul.f32 %v2781_v29, %v2781_v29 }
 0x18b   : > { %3587 = vst [vmem:[%s4515_s5 + $0x10] sm:$0xff] %v3559_v16   ;;  %v2866_v10 = vadd.f32 %v2865_v34, %v2851_v49  ;;  %v2751_v31 = vpop.f32.mrf.mxu0  ;;  %v1936_v30 = vpop.f32.mrf.mxu1 }
 0x18c   : > { %v2502_v26 = vpop.f32.mrf.mxu3  ;;  %v1964_v27 = vadd.f32 %v1936_v30, %v4449_v45 }
 0x18d   : > { %v2533_v4 = vadd.f32 %v2502_v26, %v2156_v6 }
 0x18f   : > { %v2782_v57 = vadd.f32 %v2751_v31, %v2533_v4  ;;  %v2127_v48 = vpop.f32.mrf.mxu2 }
 0x190   : > { %v2157_v15 = vadd.f32 %v2127_v48, %v1963_v59 }
 0x191   : > { %v2829_v25 = vadd.f32 %v2828_v33, %v2782_v57  ;;  %v2852_v3 = vmul.f32 %v2782_v57, %v2782_v57 }
 0x193   : > { %v2867_v39 = vadd.f32 %v2866_v10, %v2852_v3  ;;  %v2753_v46 = vpop.f32.mrf.mxu0  ;;  %v1938_v42 = vpop.f32.mrf.mxu1 }
 0x194   : > { %v2504_v47 = vpop.f32.mrf.mxu3  ;;  %v1965_v63 = vadd.f32 %v1938_v42, %v4462_v11 }
 0x195   : > { %v2534_v32 = vadd.f32 %v2504_v47, %v2157_v15 }
 0x197   : > { %v2783_v43 = vadd.f32 %v2753_v46, %v2534_v32  ;;  %v2130_v23 = vpop.f32.mrf.mxu2 }
 0x198   : > { %v2158_v52 = vadd.f32 %v2130_v23, %v1964_v27 }
 0x199   : > { %v3564_v5 = vpack.c.bf16 %v2783_v43, %v2782_v57  ;;  %v2830_v36 = vadd.f32 %v2829_v25, %v2783_v43  ;;  %v2853_v40 = vmul.f32 %v2783_v43, %v2783_v43 }
 0x19b   : > { %3588 = vst [vmem:[%s4515_s5 + $0x18] sm:$0xff] %v3564_v5   ;;  %v2868_v44 = vadd.f32 %v2867_v39, %v2853_v40  ;;  %v2756_v61 = vpop.f32.mrf.mxu0  ;;  %v1941_v18 = vpop.f32.mrf.mxu1 }
 0x19c   : > { %v2507_v7 = vpop.f32.mrf.mxu3  ;;  %v1966_v53 = vadd.f32 %v1941_v18, %v4474_v58 }
 0x19d   : > { %v2535_v20 = vadd.f32 %v2507_v7, %v2158_v52 }
 0x19f   : > { %v2784_v28 = vadd.f32 %v2756_v61, %v2535_v20  ;;  %v2132_v8 = vpop.f32.mrf.mxu2 }
 0x1a0   : > { %v2159_v50 = vadd.f32 %v2132_v8, %v1965_v63 }
 0x1a1   : > { %v2831_v38 = vadd.f32 %v2830_v36, %v2784_v28  ;;  %v2854_v55 = vmul.f32 %v2784_v28, %v2784_v28 }
 0x1a3   : > { %v2869_v45 = vadd.f32 %v2868_v44, %v2854_v55  ;;  %v2758_v24 = vpop.f32.mrf.mxu0  ;;  %v1943_v41 = vpop.f32.mrf.mxu1 }
 0x1a4   : > { %v2509_v56 = vpop.f32.mrf.mxu3  ;;  %v1967_v62 = vadd.f32 %v1943_v41, %v4486_v60 }
 0x1a5   : > { %v2536_v2 = vadd.f32 %v2509_v56, %v2159_v50 }
 0x1a7   : > { %v2785_v35 = vadd.f32 %v2758_v24, %v2536_v2  ;;  %v2135_v9 = vpop.f32.mrf.mxu2 }
 0x1a8   : > { %v2160_v34 = vadd.f32 %v2135_v9, %v1966_v53 }
 0x1a9   : > { %v3569_v17 = vpack.c.bf16 %v2785_v35, %v2784_v28  ;;  %v2832_v54 = vadd.f32 %v2831_v38, %v2785_v35  ;;  %v2855_v19 = vmul.f32 %v2785_v35, %v2785_v35 }
 0x1ab   : > { %3589 = vst [vmem:[%s4515_s5 + $0x20] sm:$0xff] %v3569_v17   ;;  %v2870_v11 = vadd.f32 %v2869_v45, %v2855_v19  ;;  %v2761_v0 = vpop.f32.mrf.mxu0  ;;  %v1946_v22 = vpop.f32.mrf.mxu1 }
 0x1ac   : > { %v2512_v1 = vpop.f32.mrf.mxu3  ;;  %v1968_v30 = vadd.f32 %v1946_v22, %v4494_v13 }
 0x1ad   : > { %v2537_v21 = vadd.f32 %v2512_v1, %v2160_v34 }
 0x1af   : > { %v2786_v29 = vadd.f32 %v2761_v0, %v2537_v21  ;;  %v2137_v37 = vpop.f32.mrf.mxu2 }
 0x1b0   : > { %v2161_v49 = vadd.f32 %v2137_v37, %v1967_v62 }
 0x1b1   : > { %v2833_v16 = vadd.f32 %v2832_v54, %v2786_v29  ;;  %v2856_v33 = vmul.f32 %v2786_v29, %v2786_v29 }
 0x1b3   : > { %v2871_v58 = vadd.f32 %v2870_v11, %v2856_v33  ;;  %v2763_v6 = vpop.f32.mrf.mxu0  ;;  %v1948_v57 = vpop.f32.mrf.mxu1 }
 0x1b4   : > { %v2514_v10 = vpop.f32.mrf.mxu3  ;;  %v1969_v42 = vadd.f32 %v1948_v57, %v4501_v14 }
 0x1b5   : > { %v2538_v31 = vadd.f32 %v2514_v10, %v2161_v49 }
 0x1b7   : > { %v2787_v26 = vadd.f32 %v2763_v6, %v2538_v31  ;;  %v2140_v4 = vpop.f32.mrf.mxu2 }
 0x1b8   : > { %v2162_v3 = vadd.f32 %v2140_v4, %v1968_v30 }
 0x1b9   : > { %v3574_v59 = vpack.c.bf16 %v2787_v26, %v2786_v29  ;;  %v2834_v48 = vadd.f32 %v2833_v16, %v2787_v26  ;;  %v2857_v25 = vmul.f32 %v2787_v26, %v2787_v26 }
 0x1bb   : > { %3590 = vst [vmem:[%s4515_s5 + $0x28] sm:$0xff] %v3574_v59   ;;  %v2872_v60 = vadd.f32 %v2871_v58, %v2857_v25  ;;  %v2766_v15 = vpop.f32.mrf.mxu0  ;;  %v1951_v13 = vpop.f32.mrf.mxu1 }
 0x1bc   : > { %v2517_v39 = vpop.f32.mrf.mxu3  ;;  %v1970_v61 = vadd.f32 %v1951_v13, %v4504_v51 }
 0x1bd   : > { %v2539_v46 = vadd.f32 %v2517_v39, %v2162_v3 }
 0x1bf   : > { %v2788_v47 = vadd.f32 %v2766_v15, %v2539_v46  ;;  %v2142_v32 = vpop.f32.mrf.mxu2 }
 0x1c0   : > { %v2163_v23 = vadd.f32 %v2142_v32, %v1969_v42 }
 0x1c1   : > { %v2835_v43 = vadd.f32 %v2834_v48, %v2788_v47  ;;  %v2858_v27 = vmul.f32 %v2788_v47, %v2788_v47 }
 0x1c3   : > { %v2873_v5 = vadd.f32 %v2872_v60, %v2858_v27  ;;  %v2768_v36 = vpop.f32.mrf.mxu0  ;;  %v1953_v8 = vpop.f32.mrf.mxu1 }
 0x1c4   : > { %v2519_v40 = vpop.f32.mrf.mxu3  ;;  %v1971_v24 = vadd.f32 %v1953_v8, %v4506_v12 }
 0x1c5   : > { %v2540_v52 = vadd.f32 %v2519_v40, %v2163_v23 }
 0x1c7   : > { %v2789_v44 = vadd.f32 %v2768_v36, %v2540_v52  ;;  %v2145_v7 = vpop.f32.mrf.mxu2 }
 0x1c8   : > { %v2164_v63 = vadd.f32 %v2145_v7, %v1970_v61 }
 0x1c9   : > { %v3579_v18 = vpack.c.bf16 %v2789_v44, %v2788_v47  ;;  %v2836_v20 = vadd.f32 %v2835_v43, %v2789_v44  ;;  %v2859_v28 = vmul.f32 %v2789_v44, %v2789_v44 }
 0x1cb   : > { %3591 = vst [vmem:[%s4515_s5 + $0x30] sm:$0xff] %v3579_v18   ;;  %v2874_v14 = vadd.f32 %v2873_v5, %v2859_v28  ;;  %v2771_v38 = vpop.f32.mrf.mxu0 }
 0x1cc   : > { %v2522_v55 = vpop.f32.mrf.mxu3 }
 0x1cd   : > { %v2541_v50 = vadd.f32 %v2522_v55, %v2164_v63 }
 0x1cf   : > { %v2790_v45 = vadd.f32 %v2771_v38, %v2541_v50  ;;  %v2147_v56 = vpop.f32.mrf.mxu2 }
 0x1d0   : > { %v2165_v35 = vadd.f32 %v2147_v56, %v1971_v24 }
 0x1d1   : > { %v2837_v41 = vadd.f32 %v2836_v20, %v2790_v45  ;;  %v2860_v2 = vmul.f32 %v2790_v45, %v2790_v45 }
 0x1d3   : > { %v2875_v51 = vadd.f32 %v2874_v14, %v2860_v2  ;;  %v2773_v17 = vpop.f32.mrf.mxu0 }
 0x1d4   : > { %v2524_v53 = vpop.f32.mrf.mxu3 }
 0x1d5   : > { %v2542_v9 = vadd.f32 %v2524_v53, %v2165_v35 }
 0x1d7   : > { %v2791_v54 = vadd.f32 %v2773_v17, %v2542_v9 }
 0x1d9   : > { %v3584_v19 = vpack.c.bf16 %v2791_v54, %v2790_v45  ;;  %v2838_v34 = vadd.f32 %v2837_v41, %v2791_v54  ;;  %v2861_v11 = vmul.f32 %v2791_v54, %v2791_v54 }
 0x1db   : > { %3592 = vst [vmem:[%s4515_s5 + $0x38] sm:$0xff] %v3584_v19   ;;  %v2839_v0 = vrot.slane %v2838_v34, 4  ;;  %v2876_v1 = vadd.f32 %v2875_v51, %v2861_v11 }
 0x1dd   : > { %v2840_v21 = vadd.f32 %v2839_v0, %v2838_v34  ;;  %v2877_v22 = vrot.slane %v2876_v1, 4 }
 0x1df   : > { %v2841_v29 = vrot.slane %v2840_v21, 2  ;;  %v2878_v12 = vadd.f32 %v2877_v22, %v2876_v1 }
 0x1e1   : > { %v2842_v62 = vadd.f32 %v2841_v29, %v2840_v21  ;;  %v2879_v37 = vrot.slane %v2878_v12, 2 }
 0x1e3   : > { %v2843_v16 = vrot.slane %v2842_v62, 1  ;;  %v2880_v33 = vadd.f32 %v2879_v37, %v2878_v12 }
 0x1e5   : > { %v2844_v49 = vadd.f32 %v2843_v16, %v2842_v62  ;;  %v2881_v58 = vrot.slane %v2880_v33, 1 }
 0x1e7   : > { %2845 = vst [vmem:[%s319_s9] sm:$0x1] %v2844_v49  ;;  %v2882_v6 = vadd.f32 %v2881_v58, %v2880_v33 }
 0x1e9   : > { %2883 = vst [vmem:[%s319_s9 + $0x1] sm:$0x1] %v2882_v6 }
 0x1ea PF: > { %s15_s19 = sadd.s32 1, %s3700_s19   ;;  %s4566_s15 = smov %s3692_s17 }
 0x1eb   : > { %p12_p9 = scmp.ge.s32.totalorder %s15_s19, 6   ;;  %s4567_s16 = smov %s3696_s18 }
 0x1ec   : > { %s4568_s17 = smov %s4571_s20  ;;  %s4569_s18 = smov %s4575_s21 }
 0x1ed   :  { %14 = sbr.rel (!%p12_p9) target bundleno = 3 (0x3), region = 80 }

</bundles_post_ra>
